<compile_context>
chip_gen: v6e
topology: v6e:2x2x1
jax: 0.10.0
libtpu: 0.0.40
codegen_flags: <defaults>
</compile_context>

<pallas_src>
import jax
import jax.numpy as jnp
from jax import lax
from jax.experimental import pallas as pl
from jax.experimental.pallas import tpu as pltpu


# ----------------------------------------------------------------------------
# The fused Pallas kernel (one grid step == one image)
# ----------------------------------------------------------------------------
def _cnn_fused_kernel(p1_ref, w1_ref, b1_ref, w2_ref, b2_ref,
                      fc1_ref, fb1_ref, fc2_ref, fb2_ref, fc3_ref, fb3_ref,
                      o_ref):
    # ---- conv1 + bias + tanh + AvgPool(2, s=5): ONE MXU call for all 4 taps ----
    # p1_ref: (1, 2304, 80) bf16, rows ordered (tap1, a, b, u, v); cols (kh,kw,c).
    z1 = jnp.dot(p1_ref[0], w1_ref[...], preferred_element_type=jnp.float32)
    t1 = jnp.tanh(z1 + b1_ref[...])                      # (2304, 16); bias hoisted
    # 4-tap average -> pooled conv1 activations, grouped as 36 S-blocks of 16 rows
    y1 = 0.25 * (t1[0:576] + t1[576:1152] + t1[1152:1728] + t1[1728:2304])
    y1 = y1.astype(jnp.bfloat16)                         # (576, 16), chans 6..15 = 0

    # ---- conv2 (pool-aware offset-sum GEMMs on S-blocks) + bias + tanh + pool ----
    # S-block (a, b) = rows [(a*6+b)*16 : +16] = y1 at positions (a+5u, b+5v).
    # accA rows: taps (dr2=0, dc2=0|1); accB rows: taps (dr2=1, dc2=0|1).
    accA = jnp.zeros((32, 16), jnp.float32)
    accB = jnp.zeros((32, 16), jnp.float32)
    for kh in range(5):
        for kw in range(5):
            w2b = w2_ref[(kh * 5 + kw) * 16:(kh * 5 + kw) * 16 + 16, :]   # (16,16)
            top = (kh * 6 + kw) * 16          # blocks (kh, kw), (kh, kw+1)
            bot = ((kh + 1) * 6 + kw) * 16    # blocks (kh+1, kw), (kh+1, kw+1)
            accA = accA + jnp.dot(y1[top:top + 32, :], w2b,
                                  preferred_element_type=jnp.float32)
            accB = accB + jnp.dot(y1[bot:bot + 32, :], w2b,
                                  preferred_element_type=jnp.float32)
    tA = jnp.tanh(accA + b2_ref[...])                    # taps (0,0) / (0,1)
    tB = jnp.tanh(accB + b2_ref[...])                    # taps (1,0) / (1,1)
    feat = 0.25 * (tA[0:16] + tA[16:32] + tB[0:16] + tB[16:32])   # (16 pos, 16 ch)

    # ---- FC head: 256 -> 120 -> 84 -> 1 (bf16 GEMMs, f32 accum; last layer f32) ----
    # Flatten is folded into fc1's row order (row = pos*16 + ch), so no in-kernel
    # reshape is needed: accumulate 16 aligned (1,16)@(16,128) dots.
    h1 = fb1_ref[...]                                    # (1, 128) f32
    for s in range(16):
        h1 = h1 + jnp.dot(feat[s:s + 1, :].astype(jnp.bfloat16),
                          fc1_ref[s * 16:(s + 1) * 16, :],
                          preferred_element_type=jnp.float32)
    h1 = jnp.tanh(h1).astype(jnp.bfloat16)               # (1, 128)
    h2 = jnp.tanh(jnp.dot(h1, fc2_ref[...], preferred_element_type=jnp.float32)
                  + fb2_ref[...])                        # (1, 128) f32
    z3 = jnp.dot(h2, fc3_ref[...], preferred_element_type=jnp.float32) + fb3_ref[...]
    o_ref[0] = jnp.broadcast_to(jax.nn.sigmoid(z3), (1, 128))   # lane 0 is the output


def pallas_cnn(p1, w1m, b1p, w2m, b2p, fc1m, fb1p, fc2m, fb2p, fc3m, fb3p):
    B = p1.shape[0]
    out = pl.pallas_call(
        _cnn_fused_kernel,
        out_shape=jax.ShapeDtypeStruct((B, 1, 128), jnp.float32),
        grid=(B,),
        in_specs=[
            pl.BlockSpec((1, 2304, 80), lambda i: (i, 0, 0)),   # conv1 patches
            pl.BlockSpec((80, 16), lambda i: (0, 0)),           # conv1 weight
            pl.BlockSpec((1, 16), lambda i: (0, 0)),            # conv1 bias
            pl.BlockSpec((400, 16), lambda i: (0, 0)),          # conv2 weight
            pl.BlockSpec((1, 16), lambda i: (0, 0)),            # conv2 bias
            pl.BlockSpec((256, 128), lambda i: (0, 0)),         # fc1 weight
            pl.BlockSpec((1, 128), lambda i: (0, 0)),           # fc1 bias
            pl.BlockSpec((128, 128), lambda i: (0, 0)),         # fc2 weight
            pl.BlockSpec((1, 128), lambda i: (0, 0)),           # fc2 bias
            pl.BlockSpec((128, 1), lambda i: (0, 0)),           # fc3 weight
            pl.BlockSpec((1, 1), lambda i: (0, 0)),             # fc3 bias
        ],
        out_specs=pl.BlockSpec((1, 1, 128), lambda i: (i, 0, 0)),
        compiler_params=pltpu.CompilerParams(dimension_semantics=("parallel",)),
    )(p1, w1m, b1p, w2m, b2p, fc1m, fb1p, fc2m, fb2p, fc3m, fb3p)
    return out[:, 0, :1]                                        # (B, 1)


# ----------------------------------------------------------------------------
# XLA-side layout plumbing (bf16-first, pool-aware, S-block ordered patches)
# ----------------------------------------------------------------------------
def _conv1_pool_patches(x):
    """x: (B,128,128,3) bf16 NHWC -> (B, 2304, 80) bf16.

    Row order: (tap1 dr,dc in {0,1}^2) x (a,b in 0..5) x (u,v in 0..3), i.e. the
    pool-tap copies of conv1 patches at pooled positions (a+5u, b+5v) -- exactly
    the 6x6 grid of 16-row S-blocks conv2's in-kernel offset-sum GEMMs consume.
    Column order: (kh, kw, cin), zero-padded 75 -> 80."""
    B = x.shape[0]
    hi = 121
    sel = {}
    for a in range(6):
        for b in range(6):
            sel[(a, b)] = x[:, a:a + hi:5, b:b + hi:5, :]        # (B,25,25,3)
    taps = []
    for dr in (0, 1):
        for dc in (0, 1):
            cols = [sel[(dr + kh, dc + kw)] for kh in range(5) for kw in range(5)]
            full = jnp.concatenate(cols, axis=-1)                # (B,25,25,75)
            rows = jnp.stack([full[:, a:a + 16:5] for a in range(6)], axis=1)
            blk = jnp.stack([rows[:, :, :, b:b + 16:5] for b in range(6)], axis=2)
            taps.append(blk.reshape(B, 576, 75))                 # (B,576,75)
    p = jnp.stack(taps, axis=1).reshape(B, 4 * 576, 75)
    return jnp.pad(p, ((0, 0), (0, 0), (0, 5)))                  # (B,2304,80) bf16


def _conv1_weight(w1, b1):
    """Torch (6,3,5,5) -> (80,16) bf16 GEMM matrix, rows (kh,kw,cin), padded."""
    wm = jnp.transpose(w1, (2, 3, 1, 0)).reshape(75, 6)
    wm = jnp.pad(wm, ((0, 5), (0, 10))).astype(jnp.bfloat16)
    bp = jnp.pad(b1, (0, 10)).reshape(1, 16).astype(jnp.float32)
    return wm, bp


def _conv2_weight(w2, b2):
    """Torch (16,6,5,5) -> (400,16) bf16: one 16-row (cin padded 6->16) block per
    kernel offset (kh,kw)."""
    wm = jnp.transpose(w2, (2, 3, 1, 0))                         # (5,5,6,16)
    wm = jnp.pad(wm, ((0, 0), (0, 0), (0, 10), (0, 0)))          # (5,5,16,16)
    return (wm.reshape(400, 16).astype(jnp.bfloat16),
            b2.reshape(1, 16).astype(jnp.float32))


def _fc_weights(fw1, fb1, fw2, fb2, fw3, fb3):
    """Pad hidden dims 120/84 -> 128 (lane-dense, exact since tanh(0)=0) and fold
    torch's NCHW flatten (index c*16+s) into fc1's row order (s*16+c)."""
    fc1 = fw1.reshape(16, 16, 120).transpose(1, 0, 2).reshape(256, 120)
    fc1 = jnp.pad(fc1, ((0, 0), (0, 8))).astype(jnp.bfloat16)            # (256,128)
    fb1p = jnp.pad(fb1, (0, 8)).reshape(1, 128).astype(jnp.float32)
    fc2 = jnp.pad(fw2, ((0, 8), (0, 44))).astype(jnp.bfloat16)           # (128,128)
    fb2p = jnp.pad(fb2, (0, 44)).reshape(1, 128).astype(jnp.float32)
    fc3 = jnp.pad(fw3, ((0, 44), (0, 0))).astype(jnp.float32)            # (128,1)
    fb3p = fb3.reshape(1, 1).astype(jnp.float32)
    return fc1, fb1p, fc2, fb2p, fc3, fb3p


def init_params(key):
    """Deterministic synthetic params, PyTorch-shaped conv weights (O,C,kh,kw)."""
    ks = jax.random.split(key, 10)
    u = lambda k, shape, fan_in: jax.random.uniform(
        k, shape, jnp.float32, -1.0 / jnp.sqrt(fan_in), 1.0 / jnp.sqrt(fan_in))
    w1 = u(ks[0], (6, 3, 5, 5), 3 * 25)
    b1 = u(ks[1], (6,), 3 * 25)
    w2 = u(ks[2], (16, 6, 5, 5), 6 * 25)
    b2 = u(ks[3], (16,), 6 * 25)
    fw1 = u(ks[4], (256, 120), 256)
    fb1 = u(ks[5], (120,), 256)
    fw2 = u(ks[6], (120, 84), 120)
    fb2 = u(ks[7], (84,), 120)
    fw3 = u(ks[8], (84, 1), 84)
    fb3 = u(ks[9], (1,), 84)
    return (w1, b1, w2, b2, fw1, fb1, fw2, fb2, fw3, fb3)


@jax.jit
def cnn_forward(x_nchw, params):
    w1, b1, w2, b2, fw1, fb1, fw2, fb2, fw3, fb3 = params
    x = jnp.transpose(x_nchw, (0, 2, 3, 1)).astype(jnp.bfloat16)   # NHWC, bf16 FIRST
    p1 = _conv1_pool_patches(x)                                    # (B,2304,80) bf16
    w1m, b1p = _conv1_weight(w1, b1)
    w2m, b2p = _conv2_weight(w2, b2)
    fc1m, fb1p, fc2m, fb2p, fc3m, fb3p = _fc_weights(fw1, fb1, fw2, fb2, fw3, fb3)
    return pallas_cnn(p1, w1m, b1p, w2m, b2p, fc1m, fb1p, fc2m, fb2p, fc3m, fb3p)


# ----------------------------------------------------------------------------
# Pure-XLA f32 reference for correctness checking
# ----------------------------------------------------------------------------
def _avgpool2_s5(x):
    n = (x.shape[1] - 2) // 5 + 1
    m = (x.shape[2] - 2) // 5 + 1
    hi, wi = 5 * (n - 1) + 1, 5 * (m - 1) + 1
    acc = (x[:, 0:hi:5, 0:wi:5, :] + x[:, 0:hi:5, 1:wi + 1:5, :]
           + x[:, 1:hi + 1:5, 0:wi:5, :] + x[:, 1:hi + 1:5, 1:wi + 1:5, :])
    return acc * 0.25


def cnn_reference(x_nchw, params):
    w1, b1, w2, b2, fw1, fb1, fw2, fb2, fw3, fb3 = params
    x = jnp.transpose(x_nchw, (0, 2, 3, 1))
    dn = ("NHWC", "HWIO", "NHWC")
    y = lax.conv_general_dilated(x, jnp.transpose(w1, (2, 3, 1, 0)), (1, 1),
                                 "VALID", dimension_numbers=dn) + b1
    y = _avgpool2_s5(jnp.tanh(y))
    y = lax.conv_general_dilated(y, jnp.transpose(w2, (2, 3, 1, 0)), (1, 1),
                                 "VALID", dimension_numbers=dn) + b2
    y = _avgpool2_s5(jnp.tanh(y))
    feat = jnp.transpose(y, (0, 3, 1, 2)).reshape(x.shape[0], -1)
    h = jnp.tanh(feat @ fw1 + fb1)
    h = jnp.tanh(h @ fw2 + fb2)
    return jax.nn.sigmoid(h @ fw3 + fb3)


if __name__ == "__main__":
    key = jax.random.PRNGKey(0)
    pkey, xkey = jax.random.split(key)
    params = init_params(pkey)
    # Smallest input consistent with fc in_features=256 is 128x128.
    x = jax.random.normal(xkey, (2, 3, 128, 128), jnp.float32)
    out = jax.block_until_ready(cnn_forward(x, params))
    assert out.shape == (2, 1) and bool(jnp.all(jnp.isfinite(out)))
    ref = jax.block_until_ready(cnn_reference(x, params))
    assert float(jnp.max(jnp.abs(out - ref))) < 5e-2   # bf16-GEMM tolerance
    print("KERNEL_OK")
</pallas_src>

<mosaic_0001>
module attributes {stable_mosaic.version = 11 : i64} {
  func.func @_cnn_fused_kernel(%arg0: i32, %arg1: memref<1x2304x80xbf16, #tpu.memory_space<vmem>>, %arg2: memref<80x16xbf16, #tpu.memory_space<vmem>>, %arg3: memref<1x16xf32, #tpu.memory_space<vmem>>, %arg4: memref<400x16xbf16, #tpu.memory_space<vmem>>, %arg5: memref<1x16xf32, #tpu.memory_space<vmem>>, %arg6: memref<256x128xbf16, #tpu.memory_space<vmem>>, %arg7: memref<1x128xf32, #tpu.memory_space<vmem>>, %arg8: memref<128x128xbf16, #tpu.memory_space<vmem>>, %arg9: memref<1x128xf32, #tpu.memory_space<vmem>>, %arg10: memref<128x1xf32, #tpu.memory_space<vmem>>, %arg11: memref<1x1xf32, #tpu.memory_space<vmem>>, %arg12: memref<1x1x128xf32, #tpu.memory_space<vmem>>) attributes {dimension_semantics = [#tpu.dimension_semantics<parallel>], iteration_bounds = array<i64: 2>, scalar_prefetch = 0 : i64, scratch_operands = 0 : i64, tpu.core_type = #tpu.core_type<tc>, window_params = [{transform_indices = @transform_0, window_bounds = array<i64: 1, 2304, 80>}, {pipeline_mode = #tpu.pipeline_mode<synchronous>, transform_indices = @transform_1, window_bounds = array<i64: 80, 16>}, {pipeline_mode = #tpu.pipeline_mode<synchronous>, transform_indices = @transform_2, window_bounds = array<i64: 1, 16>}, {pipeline_mode = #tpu.pipeline_mode<synchronous>, transform_indices = @transform_3, window_bounds = array<i64: 400, 16>}, {pipeline_mode = #tpu.pipeline_mode<synchronous>, transform_indices = @transform_4, window_bounds = array<i64: 1, 16>}, {pipeline_mode = #tpu.pipeline_mode<synchronous>, transform_indices = @transform_5, window_bounds = array<i64: 256, 128>}, {pipeline_mode = #tpu.pipeline_mode<synchronous>, transform_indices = @transform_6, window_bounds = array<i64: 1, 128>}, {pipeline_mode = #tpu.pipeline_mode<synchronous>, transform_indices = @transform_7, window_bounds = array<i64: 128, 128>}, {pipeline_mode = #tpu.pipeline_mode<synchronous>, transform_indices = @transform_8, window_bounds = array<i64: 1, 128>}, {pipeline_mode = #tpu.pipeline_mode<synchronous>, transform_indices = @transform_9, window_bounds = array<i64: 128, 1>}, {pipeline_mode = #tpu.pipeline_mode<synchronous>, transform_indices = @transform_10, window_bounds = array<i64: 1, 1>}, {transform_indices = @transform_11, window_bounds = array<i64: 1, 1, 128>}]} {
    %c0 = arith.constant 0 : index
    %c0_0 = arith.constant 0 : index
    %c0_1 = arith.constant 0 : index
    %0 = vector.load %arg1[%c0, %c0_0, %c0_1] : memref<1x2304x80xbf16, #tpu.memory_space<vmem>>, vector<1x2304x80xbf16>
    %1 = vector.shape_cast %0 : vector<1x2304x80xbf16> to vector<2304x80xbf16>
    %c0_2 = arith.constant 0 : index
    %c0_3 = arith.constant 0 : index
    %2 = vector.load %arg2[%c0_2, %c0_3] : memref<80x16xbf16, #tpu.memory_space<vmem>>, vector<80x16xbf16>
    %cst = arith.constant dense<0.000000e+00> : vector<2304x16xf32>
    %3 = tpu.matmul %1, %2, %cst {dimension_numbers = #tpu.dot_dimension_numbers<[1], [0], [0], [1], [0, 0, 1, 1], [], []>} : vector<2304x80xbf16>, vector<80x16xbf16>, vector<2304x16xf32> -> vector<2304x16xf32>
    %c0_4 = arith.constant 0 : index
    %c0_5 = arith.constant 0 : index
    %4 = vector.load %arg3[%c0_4, %c0_5] : memref<1x16xf32, #tpu.memory_space<vmem>>, vector<1x16xf32>
    %5 = vector.broadcast %4 : vector<1x16xf32> to vector<2304x16xf32>
    %6 = arith.addf %3, %5 : vector<2304x16xf32>
    %7 = math.tanh %6 : vector<2304x16xf32>
    %8 = vector.extract_strided_slice %7 {offsets = [0, 0], sizes = [576, 16], strides = [1, 1]} : vector<2304x16xf32> to vector<576x16xf32>
    %9 = vector.extract_strided_slice %7 {offsets = [576, 0], sizes = [576, 16], strides = [1, 1]} : vector<2304x16xf32> to vector<576x16xf32>
    %10 = arith.addf %8, %9 : vector<576x16xf32>
    %11 = vector.extract_strided_slice %7 {offsets = [1152, 0], sizes = [576, 16], strides = [1, 1]} : vector<2304x16xf32> to vector<576x16xf32>
    %12 = arith.addf %10, %11 : vector<576x16xf32>
    %13 = vector.extract_strided_slice %7 {offsets = [1728, 0], sizes = [576, 16], strides = [1, 1]} : vector<2304x16xf32> to vector<576x16xf32>
    %14 = arith.addf %12, %13 : vector<576x16xf32>
    %cst_6 = arith.constant 2.500000e-01 : f32
    %15 = vector.broadcast %cst_6 : f32 to vector<576x16xf32>
    %16 = arith.mulf %15, %14 : vector<576x16xf32>
    %17 = arith.truncf %16 : vector<576x16xf32> to vector<576x16xbf16>
    %cst_7 = arith.constant 0.000000e+00 : f32
    %18 = vector.broadcast %cst_7 : f32 to vector<32x16xf32>
    %cst_8 = arith.constant 0.000000e+00 : f32
    %19 = vector.broadcast %cst_8 : f32 to vector<32x16xf32>
    %c0_9 = arith.constant 0 : index
    %c0_10 = arith.constant 0 : index
    %20 = vector.load %arg4[%c0_9, %c0_10] : memref<400x16xbf16, #tpu.memory_space<vmem>>, vector<16x16xbf16>
    %21 = vector.extract_strided_slice %17 {offsets = [0, 0], sizes = [32, 16], strides = [1, 1]} : vector<576x16xbf16> to vector<32x16xbf16>
    %cst_11 = arith.constant dense<0.000000e+00> : vector<32x16xf32>
    %22 = tpu.matmul %21, %20, %cst_11 {dimension_numbers = #tpu.dot_dimension_numbers<[1], [0], [0], [1], [0, 0, 1, 1], [], []>} : vector<32x16xbf16>, vector<16x16xbf16>, vector<32x16xf32> -> vector<32x16xf32>
    %23 = arith.addf %18, %22 : vector<32x16xf32>
    %24 = vector.extract_strided_slice %17 {offsets = [96, 0], sizes = [32, 16], strides = [1, 1]} : vector<576x16xbf16> to vector<32x16xbf16>
    %cst_12 = arith.constant dense<0.000000e+00> : vector<32x16xf32>
    %25 = tpu.matmul %24, %20, %cst_12 {dimension_numbers = #tpu.dot_dimension_numbers<[1], [0], [0], [1], [0, 0, 1, 1], [], []>} : vector<32x16xbf16>, vector<16x16xbf16>, vector<32x16xf32> -> vector<32x16xf32>
    %26 = arith.addf %19, %25 : vector<32x16xf32>
    %c16 = arith.constant 16 : index
    %c0_13 = arith.constant 0 : index
    %27 = vector.load %arg4[%c16, %c0_13] : memref<400x16xbf16, #tpu.memory_space<vmem>>, vector<16x16xbf16>
    %28 = vector.extract_strided_slice %17 {offsets = [16, 0], sizes = [32, 16], strides = [1, 1]} : vector<576x16xbf16> to vector<32x16xbf16>
    %cst_14 = arith.constant dense<0.000000e+00> : vector<32x16xf32>
    %29 = tpu.matmul %28, %27, %cst_14 {dimension_numbers = #tpu.dot_dimension_numbers<[1], [0], [0], [1], [0, 0, 1, 1], [], []>} : vector<32x16xbf16>, vector<16x16xbf16>, vector<32x16xf32> -> vector<32x16xf32>
    %30 = arith.addf %23, %29 : vector<32x16xf32>
    %31 = vector.extract_strided_slice %17 {offsets = [112, 0], sizes = [32, 16], strides = [1, 1]} : vector<576x16xbf16> to vector<32x16xbf16>
    %cst_15 = arith.constant dense<0.000000e+00> : vector<32x16xf32>
    %32 = tpu.matmul %31, %27, %cst_15 {dimension_numbers = #tpu.dot_dimension_numbers<[1], [0], [0], [1], [0, 0, 1, 1], [], []>} : vector<32x16xbf16>, vector<16x16xbf16>, vector<32x16xf32> -> vector<32x16xf32>
    %33 = arith.addf %26, %32 : vector<32x16xf32>
    %c32 = arith.constant 32 : index
    %c0_16 = arith.constant 0 : index
    %34 = vector.load %arg4[%c32, %c0_16] : memref<400x16xbf16, #tpu.memory_space<vmem>>, vector<16x16xbf16>
    %35 = vector.extract_strided_slice %17 {offsets = [32, 0], sizes = [32, 16], strides = [1, 1]} : vector<576x16xbf16> to vector<32x16xbf16>
    %cst_17 = arith.constant dense<0.000000e+00> : vector<32x16xf32>
    %36 = tpu.matmul %35, %34, %cst_17 {dimension_numbers = #tpu.dot_dimension_numbers<[1], [0], [0], [1], [0, 0, 1, 1], [], []>} : vector<32x16xbf16>, vector<16x16xbf16>, vector<32x16xf32> -> vector<32x16xf32>
    %37 = arith.addf %30, %36 : vector<32x16xf32>
    %38 = vector.extract_strided_slice %17 {offsets = [128, 0], sizes = [32, 16], strides = [1, 1]} : vector<576x16xbf16> to vector<32x16xbf16>
    %cst_18 = arith.constant dense<0.000000e+00> : vector<32x16xf32>
    %39 = tpu.matmul %38, %34, %cst_18 {dimension_numbers = #tpu.dot_dimension_numbers<[1], [0], [0], [1], [0, 0, 1, 1], [], []>} : vector<32x16xbf16>, vector<16x16xbf16>, vector<32x16xf32> -> vector<32x16xf32>
    %40 = arith.addf %33, %39 : vector<32x16xf32>
    %c48 = arith.constant 48 : index
    %c0_19 = arith.constant 0 : index
    %41 = vector.load %arg4[%c48, %c0_19] : memref<400x16xbf16, #tpu.memory_space<vmem>>, vector<16x16xbf16>
    %42 = vector.extract_strided_slice %17 {offsets = [48, 0], sizes = [32, 16], strides = [1, 1]} : vector<576x16xbf16> to vector<32x16xbf16>
    %cst_20 = arith.constant dense<0.000000e+00> : vector<32x16xf32>
    %43 = tpu.matmul %42, %41, %cst_20 {dimension_numbers = #tpu.dot_dimension_numbers<[1], [0], [0], [1], [0, 0, 1, 1], [], []>} : vector<32x16xbf16>, vector<16x16xbf16>, vector<32x16xf32> -> vector<32x16xf32>
    %44 = arith.addf %37, %43 : vector<32x16xf32>
    %45 = vector.extract_strided_slice %17 {offsets = [144, 0], sizes = [32, 16], strides = [1, 1]} : vector<576x16xbf16> to vector<32x16xbf16>
    %cst_21 = arith.constant dense<0.000000e+00> : vector<32x16xf32>
    %46 = tpu.matmul %45, %41, %cst_21 {dimension_numbers = #tpu.dot_dimension_numbers<[1], [0], [0], [1], [0, 0, 1, 1], [], []>} : vector<32x16xbf16>, vector<16x16xbf16>, vector<32x16xf32> -> vector<32x16xf32>
    %47 = arith.addf %40, %46 : vector<32x16xf32>
    %c64 = arith.constant 64 : index
    %c0_22 = arith.constant 0 : index
    %48 = vector.load %arg4[%c64, %c0_22] : memref<400x16xbf16, #tpu.memory_space<vmem>>, vector<16x16xbf16>
    %49 = vector.extract_strided_slice %17 {offsets = [64, 0], sizes = [32, 16], strides = [1, 1]} : vector<576x16xbf16> to vector<32x16xbf16>
    %cst_23 = arith.constant dense<0.000000e+00> : vector<32x16xf32>
    %50 = tpu.matmul %49, %48, %cst_23 {dimension_numbers = #tpu.dot_dimension_numbers<[1], [0], [0], [1], [0, 0, 1, 1], [], []>} : vector<32x16xbf16>, vector<16x16xbf16>, vector<32x16xf32> -> vector<32x16xf32>
    %51 = arith.addf %44, %50 : vector<32x16xf32>
    %52 = vector.extract_strided_slice %17 {offsets = [160, 0], sizes = [32, 16], strides = [1, 1]} : vector<576x16xbf16> to vector<32x16xbf16>
    %cst_24 = arith.constant dense<0.000000e+00> : vector<32x16xf32>
    %53 = tpu.matmul %52, %48, %cst_24 {dimension_numbers = #tpu.dot_dimension_numbers<[1], [0], [0], [1], [0, 0, 1, 1], [], []>} : vector<32x16xbf16>, vector<16x16xbf16>, vector<32x16xf32> -> vector<32x16xf32>
    %54 = arith.addf %47, %53 : vector<32x16xf32>
    %c80 = arith.constant 80 : index
    %c0_25 = arith.constant 0 : index
    %55 = vector.load %arg4[%c80, %c0_25] : memref<400x16xbf16, #tpu.memory_space<vmem>>, vector<16x16xbf16>
    %56 = vector.extract_strided_slice %17 {offsets = [96, 0], sizes = [32, 16], strides = [1, 1]} : vector<576x16xbf16> to vector<32x16xbf16>
    %cst_26 = arith.constant dense<0.000000e+00> : vector<32x16xf32>
    %57 = tpu.matmul %56, %55, %cst_26 {dimension_numbers = #tpu.dot_dimension_numbers<[1], [0], [0], [1], [0, 0, 1, 1], [], []>} : vector<32x16xbf16>, vector<16x16xbf16>, vector<32x16xf32> -> vector<32x16xf32>
    %58 = arith.addf %51, %57 : vector<32x16xf32>
    %59 = vector.extract_strided_slice %17 {offsets = [192, 0], sizes = [32, 16], strides = [1, 1]} : vector<576x16xbf16> to vector<32x16xbf16>
    %cst_27 = arith.constant dense<0.000000e+00> : vector<32x16xf32>
    %60 = tpu.matmul %59, %55, %cst_27 {dimension_numbers = #tpu.dot_dimension_numbers<[1], [0], [0], [1], [0, 0, 1, 1], [], []>} : vector<32x16xbf16>, vector<16x16xbf16>, vector<32x16xf32> -> vector<32x16xf32>
    %61 = arith.addf %54, %60 : vector<32x16xf32>
    %c96 = arith.constant 96 : index
    %c0_28 = arith.constant 0 : index
    %62 = vector.load %arg4[%c96, %c0_28] : memref<400x16xbf16, #tpu.memory_space<vmem>>, vector<16x16xbf16>
    %63 = vector.extract_strided_slice %17 {offsets = [112, 0], sizes = [32, 16], strides = [1, 1]} : vector<576x16xbf16> to vector<32x16xbf16>
    %cst_29 = arith.constant dense<0.000000e+00> : vector<32x16xf32>
    %64 = tpu.matmul %63, %62, %cst_29 {dimension_numbers = #tpu.dot_dimension_numbers<[1], [0], [0], [1], [0, 0, 1, 1], [], []>} : vector<32x16xbf16>, vector<16x16xbf16>, vector<32x16xf32> -> vector<32x16xf32>
    %65 = arith.addf %58, %64 : vector<32x16xf32>
    %66 = vector.extract_strided_slice %17 {offsets = [208, 0], sizes = [32, 16], strides = [1, 1]} : vector<576x16xbf16> to vector<32x16xbf16>
    %cst_30 = arith.constant dense<0.000000e+00> : vector<32x16xf32>
    %67 = tpu.matmul %66, %62, %cst_30 {dimension_numbers = #tpu.dot_dimension_numbers<[1], [0], [0], [1], [0, 0, 1, 1], [], []>} : vector<32x16xbf16>, vector<16x16xbf16>, vector<32x16xf32> -> vector<32x16xf32>
    %68 = arith.addf %61, %67 : vector<32x16xf32>
    %c112 = arith.constant 112 : index
    %c0_31 = arith.constant 0 : index
    %69 = vector.load %arg4[%c112, %c0_31] : memref<400x16xbf16, #tpu.memory_space<vmem>>, vector<16x16xbf16>
    %70 = vector.extract_strided_slice %17 {offsets = [128, 0], sizes = [32, 16], strides = [1, 1]} : vector<576x16xbf16> to vector<32x16xbf16>
    %cst_32 = arith.constant dense<0.000000e+00> : vector<32x16xf32>
    %71 = tpu.matmul %70, %69, %cst_32 {dimension_numbers = #tpu.dot_dimension_numbers<[1], [0], [0], [1], [0, 0, 1, 1], [], []>} : vector<32x16xbf16>, vector<16x16xbf16>, vector<32x16xf32> -> vector<32x16xf32>
    %72 = arith.addf %65, %71 : vector<32x16xf32>
    %73 = vector.extract_strided_slice %17 {offsets = [224, 0], sizes = [32, 16], strides = [1, 1]} : vector<576x16xbf16> to vector<32x16xbf16>
    %cst_33 = arith.constant dense<0.000000e+00> : vector<32x16xf32>
    %74 = tpu.matmul %73, %69, %cst_33 {dimension_numbers = #tpu.dot_dimension_numbers<[1], [0], [0], [1], [0, 0, 1, 1], [], []>} : vector<32x16xbf16>, vector<16x16xbf16>, vector<32x16xf32> -> vector<32x16xf32>
    %75 = arith.addf %68, %74 : vector<32x16xf32>
    %c128 = arith.constant 128 : index
    %c0_34 = arith.constant 0 : index
    %76 = vector.load %arg4[%c128, %c0_34] : memref<400x16xbf16, #tpu.memory_space<vmem>>, vector<16x16xbf16>
    %77 = vector.extract_strided_slice %17 {offsets = [144, 0], sizes = [32, 16], strides = [1, 1]} : vector<576x16xbf16> to vector<32x16xbf16>
    %cst_35 = arith.constant dense<0.000000e+00> : vector<32x16xf32>
    %78 = tpu.matmul %77, %76, %cst_35 {dimension_numbers = #tpu.dot_dimension_numbers<[1], [0], [0], [1], [0, 0, 1, 1], [], []>} : vector<32x16xbf16>, vector<16x16xbf16>, vector<32x16xf32> -> vector<32x16xf32>
    %79 = arith.addf %72, %78 : vector<32x16xf32>
    %80 = vector.extract_strided_slice %17 {offsets = [240, 0], sizes = [32, 16], strides = [1, 1]} : vector<576x16xbf16> to vector<32x16xbf16>
    %cst_36 = arith.constant dense<0.000000e+00> : vector<32x16xf32>
    %81 = tpu.matmul %80, %76, %cst_36 {dimension_numbers = #tpu.dot_dimension_numbers<[1], [0], [0], [1], [0, 0, 1, 1], [], []>} : vector<32x16xbf16>, vector<16x16xbf16>, vector<32x16xf32> -> vector<32x16xf32>
    %82 = arith.addf %75, %81 : vector<32x16xf32>
    %c144 = arith.constant 144 : index
    %c0_37 = arith.constant 0 : index
    %83 = vector.load %arg4[%c144, %c0_37] : memref<400x16xbf16, #tpu.memory_space<vmem>>, vector<16x16xbf16>
    %84 = vector.extract_strided_slice %17 {offsets = [160, 0], sizes = [32, 16], strides = [1, 1]} : vector<576x16xbf16> to vector<32x16xbf16>
    %cst_38 = arith.constant dense<0.000000e+00> : vector<32x16xf32>
    %85 = tpu.matmul %84, %83, %cst_38 {dimension_numbers = #tpu.dot_dimension_numbers<[1], [0], [0], [1], [0, 0, 1, 1], [], []>} : vector<32x16xbf16>, vector<16x16xbf16>, vector<32x16xf32> -> vector<32x16xf32>
    %86 = arith.addf %79, %85 : vector<32x16xf32>
    %87 = vector.extract_strided_slice %17 {offsets = [256, 0], sizes = [32, 16], strides = [1, 1]} : vector<576x16xbf16> to vector<32x16xbf16>
    %cst_39 = arith.constant dense<0.000000e+00> : vector<32x16xf32>
    %88 = tpu.matmul %87, %83, %cst_39 {dimension_numbers = #tpu.dot_dimension_numbers<[1], [0], [0], [1], [0, 0, 1, 1], [], []>} : vector<32x16xbf16>, vector<16x16xbf16>, vector<32x16xf32> -> vector<32x16xf32>
    %89 = arith.addf %82, %88 : vector<32x16xf32>
    %c160 = arith.constant 160 : index
    %c0_40 = arith.constant 0 : index
    %90 = vector.load %arg4[%c160, %c0_40] : memref<400x16xbf16, #tpu.memory_space<vmem>>, vector<16x16xbf16>
    %91 = vector.extract_strided_slice %17 {offsets = [192, 0], sizes = [32, 16], strides = [1, 1]} : vector<576x16xbf16> to vector<32x16xbf16>
    %cst_41 = arith.constant dense<0.000000e+00> : vector<32x16xf32>
    %92 = tpu.matmul %91, %90, %cst_41 {dimension_numbers = #tpu.dot_dimension_numbers<[1], [0], [0], [1], [0, 0, 1, 1], [], []>} : vector<32x16xbf16>, vector<16x16xbf16>, vector<32x16xf32> -> vector<32x16xf32>
    %93 = arith.addf %86, %92 : vector<32x16xf32>
    %94 = vector.extract_strided_slice %17 {offsets = [288, 0], sizes = [32, 16], strides = [1, 1]} : vector<576x16xbf16> to vector<32x16xbf16>
    %cst_42 = arith.constant dense<0.000000e+00> : vector<32x16xf32>
    %95 = tpu.matmul %94, %90, %cst_42 {dimension_numbers = #tpu.dot_dimension_numbers<[1], [0], [0], [1], [0, 0, 1, 1], [], []>} : vector<32x16xbf16>, vector<16x16xbf16>, vector<32x16xf32> -> vector<32x16xf32>
    %96 = arith.addf %89, %95 : vector<32x16xf32>
    %c176 = arith.constant 176 : index
    %c0_43 = arith.constant 0 : index
    %97 = vector.load %arg4[%c176, %c0_43] : memref<400x16xbf16, #tpu.memory_space<vmem>>, vector<16x16xbf16>
    %98 = vector.extract_strided_slice %17 {offsets = [208, 0], sizes = [32, 16], strides = [1, 1]} : vector<576x16xbf16> to vector<32x16xbf16>
    %cst_44 = arith.constant dense<0.000000e+00> : vector<32x16xf32>
    %99 = tpu.matmul %98, %97, %cst_44 {dimension_numbers = #tpu.dot_dimension_numbers<[1], [0], [0], [1], [0, 0, 1, 1], [], []>} : vector<32x16xbf16>, vector<16x16xbf16>, vector<32x16xf32> -> vector<32x16xf32>
    %100 = arith.addf %93, %99 : vector<32x16xf32>
    %101 = vector.extract_strided_slice %17 {offsets = [304, 0], sizes = [32, 16], strides = [1, 1]} : vector<576x16xbf16> to vector<32x16xbf16>
    %cst_45 = arith.constant dense<0.000000e+00> : vector<32x16xf32>
    %102 = tpu.matmul %101, %97, %cst_45 {dimension_numbers = #tpu.dot_dimension_numbers<[1], [0], [0], [1], [0, 0, 1, 1], [], []>} : vector<32x16xbf16>, vector<16x16xbf16>, vector<32x16xf32> -> vector<32x16xf32>
    %103 = arith.addf %96, %102 : vector<32x16xf32>
    %c192 = arith.constant 192 : index
    %c0_46 = arith.constant 0 : index
    %104 = vector.load %arg4[%c192, %c0_46] : memref<400x16xbf16, #tpu.memory_space<vmem>>, vector<16x16xbf16>
    %105 = vector.extract_strided_slice %17 {offsets = [224, 0], sizes = [32, 16], strides = [1, 1]} : vector<576x16xbf16> to vector<32x16xbf16>
    %cst_47 = arith.constant dense<0.000000e+00> : vector<32x16xf32>
    %106 = tpu.matmul %105, %104, %cst_47 {dimension_numbers = #tpu.dot_dimension_numbers<[1], [0], [0], [1], [0, 0, 1, 1], [], []>} : vector<32x16xbf16>, vector<16x16xbf16>, vector<32x16xf32> -> vector<32x16xf32>
    %107 = arith.addf %100, %106 : vector<32x16xf32>
    %108 = vector.extract_strided_slice %17 {offsets = [320, 0], sizes = [32, 16], strides = [1, 1]} : vector<576x16xbf16> to vector<32x16xbf16>
    %cst_48 = arith.constant dense<0.000000e+00> : vector<32x16xf32>
    %109 = tpu.matmul %108, %104, %cst_48 {dimension_numbers = #tpu.dot_dimension_numbers<[1], [0], [0], [1], [0, 0, 1, 1], [], []>} : vector<32x16xbf16>, vector<16x16xbf16>, vector<32x16xf32> -> vector<32x16xf32>
    %110 = arith.addf %103, %109 : vector<32x16xf32>
    %c208 = arith.constant 208 : index
    %c0_49 = arith.constant 0 : index
    %111 = vector.load %arg4[%c208, %c0_49] : memref<400x16xbf16, #tpu.memory_space<vmem>>, vector<16x16xbf16>
    %112 = vector.extract_strided_slice %17 {offsets = [240, 0], sizes = [32, 16], strides = [1, 1]} : vector<576x16xbf16> to vector<32x16xbf16>
    %cst_50 = arith.constant dense<0.000000e+00> : vector<32x16xf32>
    %113 = tpu.matmul %112, %111, %cst_50 {dimension_numbers = #tpu.dot_dimension_numbers<[1], [0], [0], [1], [0, 0, 1, 1], [], []>} : vector<32x16xbf16>, vector<16x16xbf16>, vector<32x16xf32> -> vector<32x16xf32>
    %114 = arith.addf %107, %113 : vector<32x16xf32>
    %115 = vector.extract_strided_slice %17 {offsets = [336, 0], sizes = [32, 16], strides = [1, 1]} : vector<576x16xbf16> to vector<32x16xbf16>
    %cst_51 = arith.constant dense<0.000000e+00> : vector<32x16xf32>
    %116 = tpu.matmul %115, %111, %cst_51 {dimension_numbers = #tpu.dot_dimension_numbers<[1], [0], [0], [1], [0, 0, 1, 1], [], []>} : vector<32x16xbf16>, vector<16x16xbf16>, vector<32x16xf32> -> vector<32x16xf32>
    %117 = arith.addf %110, %116 : vector<32x16xf32>
    %c224 = arith.constant 224 : index
    %c0_52 = arith.constant 0 : index
    %118 = vector.load %arg4[%c224, %c0_52] : memref<400x16xbf16, #tpu.memory_space<vmem>>, vector<16x16xbf16>
    %119 = vector.extract_strided_slice %17 {offsets = [256, 0], sizes = [32, 16], strides = [1, 1]} : vector<576x16xbf16> to vector<32x16xbf16>
    %cst_53 = arith.constant dense<0.000000e+00> : vector<32x16xf32>
    %120 = tpu.matmul %119, %118, %cst_53 {dimension_numbers = #tpu.dot_dimension_numbers<[1], [0], [0], [1], [0, 0, 1, 1], [], []>} : vector<32x16xbf16>, vector<16x16xbf16>, vector<32x16xf32> -> vector<32x16xf32>
    %121 = arith.addf %114, %120 : vector<32x16xf32>
    %122 = vector.extract_strided_slice %17 {offsets = [352, 0], sizes = [32, 16], strides = [1, 1]} : vector<576x16xbf16> to vector<32x16xbf16>
    %cst_54 = arith.constant dense<0.000000e+00> : vector<32x16xf32>
    %123 = tpu.matmul %122, %118, %cst_54 {dimension_numbers = #tpu.dot_dimension_numbers<[1], [0], [0], [1], [0, 0, 1, 1], [], []>} : vector<32x16xbf16>, vector<16x16xbf16>, vector<32x16xf32> -> vector<32x16xf32>
    %124 = arith.addf %117, %123 : vector<32x16xf32>
    %c240 = arith.constant 240 : index
    %c0_55 = arith.constant 0 : index
    %125 = vector.load %arg4[%c240, %c0_55] : memref<400x16xbf16, #tpu.memory_space<vmem>>, vector<16x16xbf16>
    %126 = vector.extract_strided_slice %17 {offsets = [288, 0], sizes = [32, 16], strides = [1, 1]} : vector<576x16xbf16> to vector<32x16xbf16>
    %cst_56 = arith.constant dense<0.000000e+00> : vector<32x16xf32>
    %127 = tpu.matmul %126, %125, %cst_56 {dimension_numbers = #tpu.dot_dimension_numbers<[1], [0], [0], [1], [0, 0, 1, 1], [], []>} : vector<32x16xbf16>, vector<16x16xbf16>, vector<32x16xf32> -> vector<32x16xf32>
    %128 = arith.addf %121, %127 : vector<32x16xf32>
    %129 = vector.extract_strided_slice %17 {offsets = [384, 0], sizes = [32, 16], strides = [1, 1]} : vector<576x16xbf16> to vector<32x16xbf16>
    %cst_57 = arith.constant dense<0.000000e+00> : vector<32x16xf32>
    %130 = tpu.matmul %129, %125, %cst_57 {dimension_numbers = #tpu.dot_dimension_numbers<[1], [0], [0], [1], [0, 0, 1, 1], [], []>} : vector<32x16xbf16>, vector<16x16xbf16>, vector<32x16xf32> -> vector<32x16xf32>
    %131 = arith.addf %124, %130 : vector<32x16xf32>
    %c256 = arith.constant 256 : index
    %c0_58 = arith.constant 0 : index
    %132 = vector.load %arg4[%c256, %c0_58] : memref<400x16xbf16, #tpu.memory_space<vmem>>, vector<16x16xbf16>
    %133 = vector.extract_strided_slice %17 {offsets = [304, 0], sizes = [32, 16], strides = [1, 1]} : vector<576x16xbf16> to vector<32x16xbf16>
    %cst_59 = arith.constant dense<0.000000e+00> : vector<32x16xf32>
    %134 = tpu.matmul %133, %132, %cst_59 {dimension_numbers = #tpu.dot_dimension_numbers<[1], [0], [0], [1], [0, 0, 1, 1], [], []>} : vector<32x16xbf16>, vector<16x16xbf16>, vector<32x16xf32> -> vector<32x16xf32>
    %135 = arith.addf %128, %134 : vector<32x16xf32>
    %136 = vector.extract_strided_slice %17 {offsets = [400, 0], sizes = [32, 16], strides = [1, 1]} : vector<576x16xbf16> to vector<32x16xbf16>
    %cst_60 = arith.constant dense<0.000000e+00> : vector<32x16xf32>
    %137 = tpu.matmul %136, %132, %cst_60 {dimension_numbers = #tpu.dot_dimension_numbers<[1], [0], [0], [1], [0, 0, 1, 1], [], []>} : vector<32x16xbf16>, vector<16x16xbf16>, vector<32x16xf32> -> vector<32x16xf32>
    %138 = arith.addf %131, %137 : vector<32x16xf32>
    %c272 = arith.constant 272 : index
    %c0_61 = arith.constant 0 : index
    %139 = vector.load %arg4[%c272, %c0_61] : memref<400x16xbf16, #tpu.memory_space<vmem>>, vector<16x16xbf16>
    %140 = vector.extract_strided_slice %17 {offsets = [320, 0], sizes = [32, 16], strides = [1, 1]} : vector<576x16xbf16> to vector<32x16xbf16>
    %cst_62 = arith.constant dense<0.000000e+00> : vector<32x16xf32>
    %141 = tpu.matmul %140, %139, %cst_62 {dimension_numbers = #tpu.dot_dimension_numbers<[1], [0], [0], [1], [0, 0, 1, 1], [], []>} : vector<32x16xbf16>, vector<16x16xbf16>, vector<32x16xf32> -> vector<32x16xf32>
    %142 = arith.addf %135, %141 : vector<32x16xf32>
    %143 = vector.extract_strided_slice %17 {offsets = [416, 0], sizes = [32, 16], strides = [1, 1]} : vector<576x16xbf16> to vector<32x16xbf16>
    %cst_63 = arith.constant dense<0.000000e+00> : vector<32x16xf32>
    %144 = tpu.matmul %143, %139, %cst_63 {dimension_numbers = #tpu.dot_dimension_numbers<[1], [0], [0], [1], [0, 0, 1, 1], [], []>} : vector<32x16xbf16>, vector<16x16xbf16>, vector<32x16xf32> -> vector<32x16xf32>
    %145 = arith.addf %138, %144 : vector<32x16xf32>
    %c288 = arith.constant 288 : index
    %c0_64 = arith.constant 0 : index
    %146 = vector.load %arg4[%c288, %c0_64] : memref<400x16xbf16, #tpu.memory_space<vmem>>, vector<16x16xbf16>
    %147 = vector.extract_strided_slice %17 {offsets = [336, 0], sizes = [32, 16], strides = [1, 1]} : vector<576x16xbf16> to vector<32x16xbf16>
    %cst_65 = arith.constant dense<0.000000e+00> : vector<32x16xf32>
    %148 = tpu.matmul %147, %146, %cst_65 {dimension_numbers = #tpu.dot_dimension_numbers<[1], [0], [0], [1], [0, 0, 1, 1], [], []>} : vector<32x16xbf16>, vector<16x16xbf16>, vector<32x16xf32> -> vector<32x16xf32>
    %149 = arith.addf %142, %148 : vector<32x16xf32>
    %150 = vector.extract_strided_slice %17 {offsets = [432, 0], sizes = [32, 16], strides = [1, 1]} : vector<576x16xbf16> to vector<32x16xbf16>
    %cst_66 = arith.constant dense<0.000000e+00> : vector<32x16xf32>
    %151 = tpu.matmul %150, %146, %cst_66 {dimension_numbers = #tpu.dot_dimension_numbers<[1], [0], [0], [1], [0, 0, 1, 1], [], []>} : vector<32x16xbf16>, vector<16x16xbf16>, vector<32x16xf32> -> vector<32x16xf32>
    %152 = arith.addf %145, %151 : vector<32x16xf32>
    %c304 = arith.constant 304 : index
    %c0_67 = arith.constant 0 : index
    %153 = vector.load %arg4[%c304, %c0_67] : memref<400x16xbf16, #tpu.memory_space<vmem>>, vector<16x16xbf16>
    %154 = vector.extract_strided_slice %17 {offsets = [352, 0], sizes = [32, 16], strides = [1, 1]} : vector<576x16xbf16> to vector<32x16xbf16>
    %cst_68 = arith.constant dense<0.000000e+00> : vector<32x16xf32>
    %155 = tpu.matmul %154, %153, %cst_68 {dimension_numbers = #tpu.dot_dimension_numbers<[1], [0], [0], [1], [0, 0, 1, 1], [], []>} : vector<32x16xbf16>, vector<16x16xbf16>, vector<32x16xf32> -> vector<32x16xf32>
    %156 = arith.addf %149, %155 : vector<32x16xf32>
    %157 = vector.extract_strided_slice %17 {offsets = [448, 0], sizes = [32, 16], strides = [1, 1]} : vector<576x16xbf16> to vector<32x16xbf16>
    %cst_69 = arith.constant dense<0.000000e+00> : vector<32x16xf32>
    %158 = tpu.matmul %157, %153, %cst_69 {dimension_numbers = #tpu.dot_dimension_numbers<[1], [0], [0], [1], [0, 0, 1, 1], [], []>} : vector<32x16xbf16>, vector<16x16xbf16>, vector<32x16xf32> -> vector<32x16xf32>
    %159 = arith.addf %152, %158 : vector<32x16xf32>
    %c320 = arith.constant 320 : index
    %c0_70 = arith.constant 0 : index
    %160 = vector.load %arg4[%c320, %c0_70] : memref<400x16xbf16, #tpu.memory_space<vmem>>, vector<16x16xbf16>
    %161 = vector.extract_strided_slice %17 {offsets = [384, 0], sizes = [32, 16], strides = [1, 1]} : vector<576x16xbf16> to vector<32x16xbf16>
    %cst_71 = arith.constant dense<0.000000e+00> : vector<32x16xf32>
    %162 = tpu.matmul %161, %160, %cst_71 {dimension_numbers = #tpu.dot_dimension_numbers<[1], [0], [0], [1], [0, 0, 1, 1], [], []>} : vector<32x16xbf16>, vector<16x16xbf16>, vector<32x16xf32> -> vector<32x16xf32>
    %163 = arith.addf %156, %162 : vector<32x16xf32>
    %164 = vector.extract_strided_slice %17 {offsets = [480, 0], sizes = [32, 16], strides = [1, 1]} : vector<576x16xbf16> to vector<32x16xbf16>
    %cst_72 = arith.constant dense<0.000000e+00> : vector<32x16xf32>
    %165 = tpu.matmul %164, %160, %cst_72 {dimension_numbers = #tpu.dot_dimension_numbers<[1], [0], [0], [1], [0, 0, 1, 1], [], []>} : vector<32x16xbf16>, vector<16x16xbf16>, vector<32x16xf32> -> vector<32x16xf32>
    %166 = arith.addf %159, %165 : vector<32x16xf32>
    %c336 = arith.constant 336 : index
    %c0_73 = arith.constant 0 : index
    %167 = vector.load %arg4[%c336, %c0_73] : memref<400x16xbf16, #tpu.memory_space<vmem>>, vector<16x16xbf16>
    %168 = vector.extract_strided_slice %17 {offsets = [400, 0], sizes = [32, 16], strides = [1, 1]} : vector<576x16xbf16> to vector<32x16xbf16>
    %cst_74 = arith.constant dense<0.000000e+00> : vector<32x16xf32>
    %169 = tpu.matmul %168, %167, %cst_74 {dimension_numbers = #tpu.dot_dimension_numbers<[1], [0], [0], [1], [0, 0, 1, 1], [], []>} : vector<32x16xbf16>, vector<16x16xbf16>, vector<32x16xf32> -> vector<32x16xf32>
    %170 = arith.addf %163, %169 : vector<32x16xf32>
    %171 = vector.extract_strided_slice %17 {offsets = [496, 0], sizes = [32, 16], strides = [1, 1]} : vector<576x16xbf16> to vector<32x16xbf16>
    %cst_75 = arith.constant dense<0.000000e+00> : vector<32x16xf32>
    %172 = tpu.matmul %171, %167, %cst_75 {dimension_numbers = #tpu.dot_dimension_numbers<[1], [0], [0], [1], [0, 0, 1, 1], [], []>} : vector<32x16xbf16>, vector<16x16xbf16>, vector<32x16xf32> -> vector<32x16xf32>
    %173 = arith.addf %166, %172 : vector<32x16xf32>
    %c352 = arith.constant 352 : index
    %c0_76 = arith.constant 0 : index
    %174 = vector.load %arg4[%c352, %c0_76] : memref<400x16xbf16, #tpu.memory_space<vmem>>, vector<16x16xbf16>
    %175 = vector.extract_strided_slice %17 {offsets = [416, 0], sizes = [32, 16], strides = [1, 1]} : vector<576x16xbf16> to vector<32x16xbf16>
    %cst_77 = arith.constant dense<0.000000e+00> : vector<32x16xf32>
    %176 = tpu.matmul %175, %174, %cst_77 {dimension_numbers = #tpu.dot_dimension_numbers<[1], [0], [0], [1], [0, 0, 1, 1], [], []>} : vector<32x16xbf16>, vector<16x16xbf16>, vector<32x16xf32> -> vector<32x16xf32>
    %177 = arith.addf %170, %176 : vector<32x16xf32>
    %178 = vector.extract_strided_slice %17 {offsets = [512, 0], sizes = [32, 16], strides = [1, 1]} : vector<576x16xbf16> to vector<32x16xbf16>
    %cst_78 = arith.constant dense<0.000000e+00> : vector<32x16xf32>
    %179 = tpu.matmul %178, %174, %cst_78 {dimension_numbers = #tpu.dot_dimension_numbers<[1], [0], [0], [1], [0, 0, 1, 1], [], []>} : vector<32x16xbf16>, vector<16x16xbf16>, vector<32x16xf32> -> vector<32x16xf32>
    %180 = arith.addf %173, %179 : vector<32x16xf32>
    %c368 = arith.constant 368 : index
    %c0_79 = arith.constant 0 : index
    %181 = vector.load %arg4[%c368, %c0_79] : memref<400x16xbf16, #tpu.memory_space<vmem>>, vector<16x16xbf16>
    %182 = vector.extract_strided_slice %17 {offsets = [432, 0], sizes = [32, 16], strides = [1, 1]} : vector<576x16xbf16> to vector<32x16xbf16>
    %cst_80 = arith.constant dense<0.000000e+00> : vector<32x16xf32>
    %183 = tpu.matmul %182, %181, %cst_80 {dimension_numbers = #tpu.dot_dimension_numbers<[1], [0], [0], [1], [0, 0, 1, 1], [], []>} : vector<32x16xbf16>, vector<16x16xbf16>, vector<32x16xf32> -> vector<32x16xf32>
    %184 = arith.addf %177, %183 : vector<32x16xf32>
    %185 = vector.extract_strided_slice %17 {offsets = [528, 0], sizes = [32, 16], strides = [1, 1]} : vector<576x16xbf16> to vector<32x16xbf16>
    %cst_81 = arith.constant dense<0.000000e+00> : vector<32x16xf32>
    %186 = tpu.matmul %185, %181, %cst_81 {dimension_numbers = #tpu.dot_dimension_numbers<[1], [0], [0], [1], [0, 0, 1, 1], [], []>} : vector<32x16xbf16>, vector<16x16xbf16>, vector<32x16xf32> -> vector<32x16xf32>
    %187 = arith.addf %180, %186 : vector<32x16xf32>
    %c384 = arith.constant 384 : index
    %c0_82 = arith.constant 0 : index
    %188 = vector.load %arg4[%c384, %c0_82] : memref<400x16xbf16, #tpu.memory_space<vmem>>, vector<16x16xbf16>
    %189 = vector.extract_strided_slice %17 {offsets = [448, 0], sizes = [32, 16], strides = [1, 1]} : vector<576x16xbf16> to vector<32x16xbf16>
    %cst_83 = arith.constant dense<0.000000e+00> : vector<32x16xf32>
    %190 = tpu.matmul %189, %188, %cst_83 {dimension_numbers = #tpu.dot_dimension_numbers<[1], [0], [0], [1], [0, 0, 1, 1], [], []>} : vector<32x16xbf16>, vector<16x16xbf16>, vector<32x16xf32> -> vector<32x16xf32>
    %191 = arith.addf %184, %190 : vector<32x16xf32>
    %192 = vector.extract_strided_slice %17 {offsets = [544, 0], sizes = [32, 16], strides = [1, 1]} : vector<576x16xbf16> to vector<32x16xbf16>
    %cst_84 = arith.constant dense<0.000000e+00> : vector<32x16xf32>
    %193 = tpu.matmul %192, %188, %cst_84 {dimension_numbers = #tpu.dot_dimension_numbers<[1], [0], [0], [1], [0, 0, 1, 1], [], []>} : vector<32x16xbf16>, vector<16x16xbf16>, vector<32x16xf32> -> vector<32x16xf32>
    %194 = arith.addf %187, %193 : vector<32x16xf32>
    %c0_85 = arith.constant 0 : index
    %c0_86 = arith.constant 0 : index
    %195 = vector.load %arg5[%c0_85, %c0_86] : memref<1x16xf32, #tpu.memory_space<vmem>>, vector<1x16xf32>
    %196 = vector.broadcast %195 : vector<1x16xf32> to vector<32x16xf32>
    %197 = arith.addf %191, %196 : vector<32x16xf32>
    %198 = math.tanh %197 : vector<32x16xf32>
    %c0_87 = arith.constant 0 : index
    %c0_88 = arith.constant 0 : index
    %199 = vector.load %arg5[%c0_87, %c0_88] : memref<1x16xf32, #tpu.memory_space<vmem>>, vector<1x16xf32>
    %200 = vector.broadcast %199 : vector<1x16xf32> to vector<32x16xf32>
    %201 = arith.addf %194, %200 : vector<32x16xf32>
    %202 = math.tanh %201 : vector<32x16xf32>
    %203 = vector.extract_strided_slice %198 {offsets = [0, 0], sizes = [16, 16], strides = [1, 1]} : vector<32x16xf32> to vector<16x16xf32>
    %204 = vector.extract_strided_slice %198 {offsets = [16, 0], sizes = [16, 16], strides = [1, 1]} : vector<32x16xf32> to vector<16x16xf32>
    %205 = arith.addf %203, %204 : vector<16x16xf32>
    %206 = vector.extract_strided_slice %202 {offsets = [0, 0], sizes = [16, 16], strides = [1, 1]} : vector<32x16xf32> to vector<16x16xf32>
    %207 = arith.addf %205, %206 : vector<16x16xf32>
    %208 = vector.extract_strided_slice %202 {offsets = [16, 0], sizes = [16, 16], strides = [1, 1]} : vector<32x16xf32> to vector<16x16xf32>
    %209 = arith.addf %207, %208 : vector<16x16xf32>
    %cst_89 = arith.constant 2.500000e-01 : f32
    %210 = vector.broadcast %cst_89 : f32 to vector<16x16xf32>
    %211 = arith.mulf %210, %209 : vector<16x16xf32>
    %c0_90 = arith.constant 0 : index
    %c0_91 = arith.constant 0 : index
    %212 = vector.load %arg7[%c0_90, %c0_91] : memref<1x128xf32, #tpu.memory_space<vmem>>, vector<1x128xf32>
    %213 = vector.extract_strided_slice %211 {offsets = [0, 0], sizes = [1, 16], strides = [1, 1]} : vector<16x16xf32> to vector<1x16xf32>
    %214 = arith.truncf %213 : vector<1x16xf32> to vector<1x16xbf16>
    %c0_92 = arith.constant 0 : index
    %c0_93 = arith.constant 0 : index
    %215 = vector.load %arg6[%c0_92, %c0_93] : memref<256x128xbf16, #tpu.memory_space<vmem>>, vector<16x128xbf16>
    %cst_94 = arith.constant dense<0.000000e+00> : vector<1x128xf32>
    %216 = tpu.matmul %214, %215, %cst_94 {dimension_numbers = #tpu.dot_dimension_numbers<[1], [0], [0], [1], [0, 0, 1, 1], [], []>} : vector<1x16xbf16>, vector<16x128xbf16>, vector<1x128xf32> -> vector<1x128xf32>
    %217 = arith.addf %212, %216 : vector<1x128xf32>
    %218 = vector.extract_strided_slice %211 {offsets = [1, 0], sizes = [1, 16], strides = [1, 1]} : vector<16x16xf32> to vector<1x16xf32>
    %219 = arith.truncf %218 : vector<1x16xf32> to vector<1x16xbf16>
    %c16_95 = arith.constant 16 : index
    %c0_96 = arith.constant 0 : index
    %220 = vector.load %arg6[%c16_95, %c0_96] : memref<256x128xbf16, #tpu.memory_space<vmem>>, vector<16x128xbf16>
    %cst_97 = arith.constant dense<0.000000e+00> : vector<1x128xf32>
    %221 = tpu.matmul %219, %220, %cst_97 {dimension_numbers = #tpu.dot_dimension_numbers<[1], [0], [0], [1], [0, 0, 1, 1], [], []>} : vector<1x16xbf16>, vector<16x128xbf16>, vector<1x128xf32> -> vector<1x128xf32>
    %222 = arith.addf %217, %221 : vector<1x128xf32>
    %223 = vector.extract_strided_slice %211 {offsets = [2, 0], sizes = [1, 16], strides = [1, 1]} : vector<16x16xf32> to vector<1x16xf32>
    %224 = arith.truncf %223 : vector<1x16xf32> to vector<1x16xbf16>
    %c32_98 = arith.constant 32 : index
    %c0_99 = arith.constant 0 : index
    %225 = vector.load %arg6[%c32_98, %c0_99] : memref<256x128xbf16, #tpu.memory_space<vmem>>, vector<16x128xbf16>
    %cst_100 = arith.constant dense<0.000000e+00> : vector<1x128xf32>
    %226 = tpu.matmul %224, %225, %cst_100 {dimension_numbers = #tpu.dot_dimension_numbers<[1], [0], [0], [1], [0, 0, 1, 1], [], []>} : vector<1x16xbf16>, vector<16x128xbf16>, vector<1x128xf32> -> vector<1x128xf32>
    %227 = arith.addf %222, %226 : vector<1x128xf32>
    %228 = vector.extract_strided_slice %211 {offsets = [3, 0], sizes = [1, 16], strides = [1, 1]} : vector<16x16xf32> to vector<1x16xf32>
    %229 = arith.truncf %228 : vector<1x16xf32> to vector<1x16xbf16>
    %c48_101 = arith.constant 48 : index
    %c0_102 = arith.constant 0 : index
    %230 = vector.load %arg6[%c48_101, %c0_102] : memref<256x128xbf16, #tpu.memory_space<vmem>>, vector<16x128xbf16>
    %cst_103 = arith.constant dense<0.000000e+00> : vector<1x128xf32>
    %231 = tpu.matmul %229, %230, %cst_103 {dimension_numbers = #tpu.dot_dimension_numbers<[1], [0], [0], [1], [0, 0, 1, 1], [], []>} : vector<1x16xbf16>, vector<16x128xbf16>, vector<1x128xf32> -> vector<1x128xf32>
    %232 = arith.addf %227, %231 : vector<1x128xf32>
    %233 = vector.extract_strided_slice %211 {offsets = [4, 0], sizes = [1, 16], strides = [1, 1]} : vector<16x16xf32> to vector<1x16xf32>
    %234 = arith.truncf %233 : vector<1x16xf32> to vector<1x16xbf16>
    %c64_104 = arith.constant 64 : index
    %c0_105 = arith.constant 0 : index
    %235 = vector.load %arg6[%c64_104, %c0_105] : memref<256x128xbf16, #tpu.memory_space<vmem>>, vector<16x128xbf16>
    %cst_106 = arith.constant dense<0.000000e+00> : vector<1x128xf32>
    %236 = tpu.matmul %234, %235, %cst_106 {dimension_numbers = #tpu.dot_dimension_numbers<[1], [0], [0], [1], [0, 0, 1, 1], [], []>} : vector<1x16xbf16>, vector<16x128xbf16>, vector<1x128xf32> -> vector<1x128xf32>
    %237 = arith.addf %232, %236 : vector<1x128xf32>
    %238 = vector.extract_strided_slice %211 {offsets = [5, 0], sizes = [1, 16], strides = [1, 1]} : vector<16x16xf32> to vector<1x16xf32>
    %239 = arith.truncf %238 : vector<1x16xf32> to vector<1x16xbf16>
    %c80_107 = arith.constant 80 : index
    %c0_108 = arith.constant 0 : index
    %240 = vector.load %arg6[%c80_107, %c0_108] : memref<256x128xbf16, #tpu.memory_space<vmem>>, vector<16x128xbf16>
    %cst_109 = arith.constant dense<0.000000e+00> : vector<1x128xf32>
    %241 = tpu.matmul %239, %240, %cst_109 {dimension_numbers = #tpu.dot_dimension_numbers<[1], [0], [0], [1], [0, 0, 1, 1], [], []>} : vector<1x16xbf16>, vector<16x128xbf16>, vector<1x128xf32> -> vector<1x128xf32>
    %242 = arith.addf %237, %241 : vector<1x128xf32>
    %243 = vector.extract_strided_slice %211 {offsets = [6, 0], sizes = [1, 16], strides = [1, 1]} : vector<16x16xf32> to vector<1x16xf32>
    %244 = arith.truncf %243 : vector<1x16xf32> to vector<1x16xbf16>
    %c96_110 = arith.constant 96 : index
    %c0_111 = arith.constant 0 : index
    %245 = vector.load %arg6[%c96_110, %c0_111] : memref<256x128xbf16, #tpu.memory_space<vmem>>, vector<16x128xbf16>
    %cst_112 = arith.constant dense<0.000000e+00> : vector<1x128xf32>
    %246 = tpu.matmul %244, %245, %cst_112 {dimension_numbers = #tpu.dot_dimension_numbers<[1], [0], [0], [1], [0, 0, 1, 1], [], []>} : vector<1x16xbf16>, vector<16x128xbf16>, vector<1x128xf32> -> vector<1x128xf32>
    %247 = arith.addf %242, %246 : vector<1x128xf32>
    %248 = vector.extract_strided_slice %211 {offsets = [7, 0], sizes = [1, 16], strides = [1, 1]} : vector<16x16xf32> to vector<1x16xf32>
    %249 = arith.truncf %248 : vector<1x16xf32> to vector<1x16xbf16>
    %c112_113 = arith.constant 112 : index
    %c0_114 = arith.constant 0 : index
    %250 = vector.load %arg6[%c112_113, %c0_114] : memref<256x128xbf16, #tpu.memory_space<vmem>>, vector<16x128xbf16>
    %cst_115 = arith.constant dense<0.000000e+00> : vector<1x128xf32>
    %251 = tpu.matmul %249, %250, %cst_115 {dimension_numbers = #tpu.dot_dimension_numbers<[1], [0], [0], [1], [0, 0, 1, 1], [], []>} : vector<1x16xbf16>, vector<16x128xbf16>, vector<1x128xf32> -> vector<1x128xf32>
    %252 = arith.addf %247, %251 : vector<1x128xf32>
    %253 = vector.extract_strided_slice %211 {offsets = [8, 0], sizes = [1, 16], strides = [1, 1]} : vector<16x16xf32> to vector<1x16xf32>
    %254 = arith.truncf %253 : vector<1x16xf32> to vector<1x16xbf16>
    %c128_116 = arith.constant 128 : index
    %c0_117 = arith.constant 0 : index
    %255 = vector.load %arg6[%c128_116, %c0_117] : memref<256x128xbf16, #tpu.memory_space<vmem>>, vector<16x128xbf16>
    %cst_118 = arith.constant dense<0.000000e+00> : vector<1x128xf32>
    %256 = tpu.matmul %254, %255, %cst_118 {dimension_numbers = #tpu.dot_dimension_numbers<[1], [0], [0], [1], [0, 0, 1, 1], [], []>} : vector<1x16xbf16>, vector<16x128xbf16>, vector<1x128xf32> -> vector<1x128xf32>
    %257 = arith.addf %252, %256 : vector<1x128xf32>
    %258 = vector.extract_strided_slice %211 {offsets = [9, 0], sizes = [1, 16], strides = [1, 1]} : vector<16x16xf32> to vector<1x16xf32>
    %259 = arith.truncf %258 : vector<1x16xf32> to vector<1x16xbf16>
    %c144_119 = arith.constant 144 : index
    %c0_120 = arith.constant 0 : index
    %260 = vector.load %arg6[%c144_119, %c0_120] : memref<256x128xbf16, #tpu.memory_space<vmem>>, vector<16x128xbf16>
    %cst_121 = arith.constant dense<0.000000e+00> : vector<1x128xf32>
    %261 = tpu.matmul %259, %260, %cst_121 {dimension_numbers = #tpu.dot_dimension_numbers<[1], [0], [0], [1], [0, 0, 1, 1], [], []>} : vector<1x16xbf16>, vector<16x128xbf16>, vector<1x128xf32> -> vector<1x128xf32>
    %262 = arith.addf %257, %261 : vector<1x128xf32>
    %263 = vector.extract_strided_slice %211 {offsets = [10, 0], sizes = [1, 16], strides = [1, 1]} : vector<16x16xf32> to vector<1x16xf32>
    %264 = arith.truncf %263 : vector<1x16xf32> to vector<1x16xbf16>
    %c160_122 = arith.constant 160 : index
    %c0_123 = arith.constant 0 : index
    %265 = vector.load %arg6[%c160_122, %c0_123] : memref<256x128xbf16, #tpu.memory_space<vmem>>, vector<16x128xbf16>
    %cst_124 = arith.constant dense<0.000000e+00> : vector<1x128xf32>
    %266 = tpu.matmul %264, %265, %cst_124 {dimension_numbers = #tpu.dot_dimension_numbers<[1], [0], [0], [1], [0, 0, 1, 1], [], []>} : vector<1x16xbf16>, vector<16x128xbf16>, vector<1x128xf32> -> vector<1x128xf32>
    %267 = arith.addf %262, %266 : vector<1x128xf32>
    %268 = vector.extract_strided_slice %211 {offsets = [11, 0], sizes = [1, 16], strides = [1, 1]} : vector<16x16xf32> to vector<1x16xf32>
    %269 = arith.truncf %268 : vector<1x16xf32> to vector<1x16xbf16>
    %c176_125 = arith.constant 176 : index
    %c0_126 = arith.constant 0 : index
    %270 = vector.load %arg6[%c176_125, %c0_126] : memref<256x128xbf16, #tpu.memory_space<vmem>>, vector<16x128xbf16>
    %cst_127 = arith.constant dense<0.000000e+00> : vector<1x128xf32>
    %271 = tpu.matmul %269, %270, %cst_127 {dimension_numbers = #tpu.dot_dimension_numbers<[1], [0], [0], [1], [0, 0, 1, 1], [], []>} : vector<1x16xbf16>, vector<16x128xbf16>, vector<1x128xf32> -> vector<1x128xf32>
    %272 = arith.addf %267, %271 : vector<1x128xf32>
    %273 = vector.extract_strided_slice %211 {offsets = [12, 0], sizes = [1, 16], strides = [1, 1]} : vector<16x16xf32> to vector<1x16xf32>
    %274 = arith.truncf %273 : vector<1x16xf32> to vector<1x16xbf16>
    %c192_128 = arith.constant 192 : index
    %c0_129 = arith.constant 0 : index
    %275 = vector.load %arg6[%c192_128, %c0_129] : memref<256x128xbf16, #tpu.memory_space<vmem>>, vector<16x128xbf16>
    %cst_130 = arith.constant dense<0.000000e+00> : vector<1x128xf32>
    %276 = tpu.matmul %274, %275, %cst_130 {dimension_numbers = #tpu.dot_dimension_numbers<[1], [0], [0], [1], [0, 0, 1, 1], [], []>} : vector<1x16xbf16>, vector<16x128xbf16>, vector<1x128xf32> -> vector<1x128xf32>
    %277 = arith.addf %272, %276 : vector<1x128xf32>
    %278 = vector.extract_strided_slice %211 {offsets = [13, 0], sizes = [1, 16], strides = [1, 1]} : vector<16x16xf32> to vector<1x16xf32>
    %279 = arith.truncf %278 : vector<1x16xf32> to vector<1x16xbf16>
    %c208_131 = arith.constant 208 : index
    %c0_132 = arith.constant 0 : index
    %280 = vector.load %arg6[%c208_131, %c0_132] : memref<256x128xbf16, #tpu.memory_space<vmem>>, vector<16x128xbf16>
    %cst_133 = arith.constant dense<0.000000e+00> : vector<1x128xf32>
    %281 = tpu.matmul %279, %280, %cst_133 {dimension_numbers = #tpu.dot_dimension_numbers<[1], [0], [0], [1], [0, 0, 1, 1], [], []>} : vector<1x16xbf16>, vector<16x128xbf16>, vector<1x128xf32> -> vector<1x128xf32>
    %282 = arith.addf %277, %281 : vector<1x128xf32>
    %283 = vector.extract_strided_slice %211 {offsets = [14, 0], sizes = [1, 16], strides = [1, 1]} : vector<16x16xf32> to vector<1x16xf32>
    %284 = arith.truncf %283 : vector<1x16xf32> to vector<1x16xbf16>
    %c224_134 = arith.constant 224 : index
    %c0_135 = arith.constant 0 : index
    %285 = vector.load %arg6[%c224_134, %c0_135] : memref<256x128xbf16, #tpu.memory_space<vmem>>, vector<16x128xbf16>
    %cst_136 = arith.constant dense<0.000000e+00> : vector<1x128xf32>
    %286 = tpu.matmul %284, %285, %cst_136 {dimension_numbers = #tpu.dot_dimension_numbers<[1], [0], [0], [1], [0, 0, 1, 1], [], []>} : vector<1x16xbf16>, vector<16x128xbf16>, vector<1x128xf32> -> vector<1x128xf32>
    %287 = arith.addf %282, %286 : vector<1x128xf32>
    %288 = vector.extract_strided_slice %211 {offsets = [15, 0], sizes = [1, 16], strides = [1, 1]} : vector<16x16xf32> to vector<1x16xf32>
    %289 = arith.truncf %288 : vector<1x16xf32> to vector<1x16xbf16>
    %c240_137 = arith.constant 240 : index
    %c0_138 = arith.constant 0 : index
    %290 = vector.load %arg6[%c240_137, %c0_138] : memref<256x128xbf16, #tpu.memory_space<vmem>>, vector<16x128xbf16>
    %cst_139 = arith.constant dense<0.000000e+00> : vector<1x128xf32>
    %291 = tpu.matmul %289, %290, %cst_139 {dimension_numbers = #tpu.dot_dimension_numbers<[1], [0], [0], [1], [0, 0, 1, 1], [], []>} : vector<1x16xbf16>, vector<16x128xbf16>, vector<1x128xf32> -> vector<1x128xf32>
    %292 = arith.addf %287, %291 : vector<1x128xf32>
    %293 = math.tanh %292 : vector<1x128xf32>
    %294 = arith.truncf %293 : vector<1x128xf32> to vector<1x128xbf16>
    %c0_140 = arith.constant 0 : index
    %c0_141 = arith.constant 0 : index
    %295 = vector.load %arg8[%c0_140, %c0_141] : memref<128x128xbf16, #tpu.memory_space<vmem>>, vector<128x128xbf16>
    %cst_142 = arith.constant dense<0.000000e+00> : vector<1x128xf32>
    %296 = tpu.matmul %294, %295, %cst_142 {dimension_numbers = #tpu.dot_dimension_numbers<[1], [0], [0], [1], [0, 0, 1, 1], [], []>} : vector<1x128xbf16>, vector<128x128xbf16>, vector<1x128xf32> -> vector<1x128xf32>
    %c0_143 = arith.constant 0 : index
    %c0_144 = arith.constant 0 : index
    %297 = vector.load %arg9[%c0_143, %c0_144] : memref<1x128xf32, #tpu.memory_space<vmem>>, vector<1x128xf32>
    %298 = arith.addf %296, %297 : vector<1x128xf32>
    %299 = math.tanh %298 : vector<1x128xf32>
    %c0_145 = arith.constant 0 : index
    %c0_146 = arith.constant 0 : index
    %300 = vector.load %arg10[%c0_145, %c0_146] : memref<128x1xf32, #tpu.memory_space<vmem>>, vector<128x1xf32>
    %cst_147 = arith.constant dense<0.000000e+00> : vector<1x1xf32>
    %301 = tpu.matmul %299, %300, %cst_147 {dimension_numbers = #tpu.dot_dimension_numbers<[1], [0], [0], [1], [0, 0, 1, 1], [], []>} : vector<1x128xf32>, vector<128x1xf32>, vector<1x1xf32> -> vector<1x1xf32>
    %c0_148 = arith.constant 0 : index
    %c0_149 = arith.constant 0 : index
    %302 = vector.load %arg11[%c0_148, %c0_149] : memref<1x1xf32, #tpu.memory_space<vmem>>, vector<1x1xf32>
    %303 = arith.addf %301, %302 : vector<1x1xf32>
    %304 = arith.negf %303 : vector<1x1xf32>
    %305 = math.exp %304 : vector<1x1xf32>
    %cst_150 = arith.constant 1.000000e+00 : f32
    %306 = vector.broadcast %cst_150 : f32 to vector<1x1xf32>
    %307 = arith.addf %306, %305 : vector<1x1xf32>
    %308 = arith.divf %306, %307 : vector<1x1xf32>
    %309 = vector.shape_cast %308 : vector<1x1xf32> to vector<1x1xf32>
    %310 = vector.broadcast %309 : vector<1x1xf32> to vector<1x128xf32>
    %c0_151 = arith.constant 0 : index
    %c0_152 = arith.constant 0 : index
    %c0_153 = arith.constant 0 : index
    %311 = vector.load %arg12[%c0_151, %c0_152, %c0_153] : memref<1x1x128xf32, #tpu.memory_space<vmem>>, vector<1x1x128xf32>
    %312 = vector.shape_cast %311 : vector<1x1x128xf32> to vector<1x128xf32>
    %313 = vector.shape_cast %310 : vector<1x128xf32> to vector<1x1x128xf32>
    tpu.vector_store %arg12[%c0_151, %c0_152, %c0_153], %313 {strides = array<i32>} : memref<1x1x128xf32, #tpu.memory_space<vmem>>, vector<1x1x128xf32>,
    return
  }
  func.func @transform_0(%arg0: i32) -> (i32, i32, i32) {
    %c0_i32 = arith.constant 0 : i32
    %c0_i32_0 = arith.constant 0 : i32
    %c0_i32_1 = arith.constant 0 : i32
    return %arg0, %c0_i32, %c0_i32_0 : i32, i32, i32
  }
  func.func @transform_1(%arg0: i32) -> (i32, i32) {
    %c0_i32 = arith.constant 0 : i32
    %c0_i32_0 = arith.constant 0 : i32
    %c0_i32_1 = arith.constant 0 : i32
    return %c0_i32, %c0_i32_0 : i32, i32
  }
  func.func @transform_2(%arg0: i32) -> (i32, i32) {
    %c0_i32 = arith.constant 0 : i32
    %c0_i32_0 = arith.constant 0 : i32
    %c0_i32_1 = arith.constant 0 : i32
    return %c0_i32, %c0_i32_0 : i32, i32
  }
  func.func @transform_3(%arg0: i32) -> (i32, i32) {
    %c0_i32 = arith.constant 0 : i32
    %c0_i32_0 = arith.constant 0 : i32
    %c0_i32_1 = arith.constant 0 : i32
    return %c0_i32, %c0_i32_0 : i32, i32
  }
  func.func @transform_4(%arg0: i32) -> (i32, i32) {
    %c0_i32 = arith.constant 0 : i32
    %c0_i32_0 = arith.constant 0 : i32
    %c0_i32_1 = arith.constant 0 : i32
    return %c0_i32, %c0_i32_0 : i32, i32
  }
  func.func @transform_5(%arg0: i32) -> (i32, i32) {
    %c0_i32 = arith.constant 0 : i32
    %c0_i32_0 = arith.constant 0 : i32
    %c0_i32_1 = arith.constant 0 : i32
    return %c0_i32, %c0_i32_0 : i32, i32
  }
  func.func @transform_6(%arg0: i32) -> (i32, i32) {
    %c0_i32 = arith.constant 0 : i32
    %c0_i32_0 = arith.constant 0 : i32
    %c0_i32_1 = arith.constant 0 : i32
    return %c0_i32, %c0_i32_0 : i32, i32
  }
  func.func @transform_7(%arg0: i32) -> (i32, i32) {
    %c0_i32 = arith.constant 0 : i32
    %c0_i32_0 = arith.constant 0 : i32
    %c0_i32_1 = arith.constant 0 : i32
    return %c0_i32, %c0_i32_0 : i32, i32
  }
  func.func @transform_8(%arg0: i32) -> (i32, i32) {
    %c0_i32 = arith.constant 0 : i32
    %c0_i32_0 = arith.constant 0 : i32
    %c0_i32_1 = arith.constant 0 : i32
    return %c0_i32, %c0_i32_0 : i32, i32
  }
  func.func @transform_9(%arg0: i32) -> (i32, i32) {
    %c0_i32 = arith.constant 0 : i32
    %c0_i32_0 = arith.constant 0 : i32
    %c0_i32_1 = arith.constant 0 : i32
    return %c0_i32, %c0_i32_0 : i32, i32
  }
  func.func @transform_10(%arg0: i32) -> (i32, i32) {
    %c0_i32 = arith.constant 0 : i32
    %c0_i32_0 = arith.constant 0 : i32
    %c0_i32_1 = arith.constant 0 : i32
    return %c0_i32, %c0_i32_0 : i32, i32
  }
  func.func @transform_11(%arg0: i32) -> (i32, i32, i32) {
    %c0_i32 = arith.constant 0 : i32
    %c0_i32_0 = arith.constant 0 : i32
    %c0_i32_1 = arith.constant 0 : i32
    return %arg0, %c0_i32, %c0_i32_0 : i32, i32, i32
  }
}

</mosaic_0001>

<bundles_post_ra>
// kernel: cnn_forward.1
= control target key start
LH: loop header
LB: loop body
LE: loop exit
PB: predicated region body
PF: predicated region fallthrough
CT: control target
= control target key end

     0   :  { %s10215_s19 = smov 0   ;;  %s12169_s0 = inlined_call_operand.vmem [shape: bf16[2,2304,80], index: 0, kind: input, shape index: {}]   ;;  %s12170_s1 = inlined_call_operand.vmem [shape: bf16[80,16], index: 1, kind: input, shape index: {}]   ;;  %s12171_s2 = inlined_call_operand.vmem [shape: f32[1,16], index: 2, kind: input, shape index: {}]   ;;  %s12172_s3 = inlined_call_operand.vmem [shape: bf16[400,16], index: 3, kind: input, shape index: {}]   ;;  %s12173_s4 = inlined_call_operand.vmem [shape: f32[1,16], index: 4, kind: input, shape index: {}]   ;;  %s12174_s5 = inlined_call_operand.vmem [shape: bf16[256,128], index: 5, kind: input, shape index: {}]   ;;  %s12175_s6 = inlined_call_operand.vmem [shape: f32[1,128], index: 6, kind: input, shape index: {}]   ;;  %s12176_s7 = inlined_call_operand.vmem [shape: bf16[128,128], index: 7, kind: input, shape index: {}]   ;;  %s12177_s8 = inlined_call_operand.vmem [shape: f32[1,128], index: 8, kind: input, shape index: {}]   ;;  %s12178_s9 = inlined_call_operand.vmem [shape: f32[128,1], index: 9, kind: input, shape index: {}]   ;;  %s12179_s10 = inlined_call_operand.<no memory space> [shape: f32[1,1], index: 10, kind: input, shape index: {}]   ;;  %s12180_s11 = inlined_call_operand.vmem [shape: f32[2,1,128], index: 11, kind: output, shape index: {}]  }
   0x1   :  { %v16_v0 = vstv %s12179_s10 }
   0x2   :  { %17 = vst [vmem:[#allocation2] sm:$0x1] %v16_v0 }
   0x3 LB: > { %s7752_s20 = sadd.s32 4294967295, %s10147_s19   ;;  %p7756_p0 = scmp.ge.s32.totalorder %s10147_s19, 1  ;;  %s10147_s19 = sphi %s10215_s19, %s23_s19  }
   0x4   : > { %p339_p1 = scmp.lt.s32.totalorder %s10147_s19, 3 }
   0x6   : > { %p340_p2 = pnand %p7756_p0, %p339_p1 }
   0x8   : > { %343 = sbr.rel (%p340_p2) target bundleno = 2208 (0x8a0), region = 64 }
   0xd   : > { %v9340_v1 = vld [vmem:[%s12170_s1 + $0x20] sm:$0xff]   ;;  %p377_p3 = scmp.lt.s32.totalorder %s7752_s20, 1  ;;  %v9341_v2 = vld [vmem:[%s12170_s1 + $0x18] sm:$0xff]   ;;  %vm1441_vm0 = vcmask 654336   ;;  %v9342_v3 = vld [vmem:[%s12170_s1 + $0x10] sm:$0xff]   ;;  %vm3681_vm1 = vcmask 130048  }
   0xe   : > { %8578 = vmatprep.subr.bf16.mxu0 %v9340_v1  ;;  %v9343_v5 = vld [vmem:[%s12170_s1 + $0x8] sm:$0xff]   ;;  %v9344_v6 = vld [vmem:[%s12170_s1] sm:$0xff]   ;;  %vm10150_vm2 = vmmov 0  }
   0xf   : > { %s12320_s20 = smov (!%p377_p3, %s7752_s20), 1  ;;  %8579 = vmatpush3.bf16.msra.mxu0 %v9340_v1 }
  0x10   : > { %8580 = vmatprep.subr.bf16.mxu0 %v9341_v2  ;;  %s9327_s26 = smul.u32 1152, %s12320_s20  ;;  %s384_s17 = scalar_lea.vmem %s12180_s11, %s12320_s20 }
  0x12   : > { %s10238_s29 = scalar_lea.vmem %s12169_s0, %s9327_s26 }
  0x13   : > { %8581 = vmatpush3.bf16.msra.mxu0 %v9341_v2  ;;  %v9345_v4 = vld [vmem:[%s10238_s29] sm:$0xff]   ;;  %v9346_v7 = vld [vmem:[%s10238_s29 + $0x8] sm:$0xff]   ;;  %v9347_v8 = vld [vmem:[%s10238_s29 + $0x10] sm:$0xff]  }
  0x14   : > { %8582 = vmatprep.subr.bf16.mxu0 %v9342_v3  ;;  %8588 = vmatprep.mubr.msk.bf16.mxu0 %vm1441_vm0, %v9345_v4  ;;  %v9348_v9 = vld [vmem:[%s10238_s29 + $0x18] sm:$0xff]   ;;  %v9349_v10 = vld [vmem:[%s10238_s29 + $0x20] sm:$0xff]   ;;  %v9350_v11 = vld [vmem:[%s10238_s29 + $0x28] sm:$0xff]  }
  0x15   : > { %v9351_v12 = vld [vmem:[%s10238_s29 + $0x30] sm:$0xff]   ;;  %v9352_v13 = vld [vmem:[%s10238_s29 + $0x38] sm:$0xff]   ;;  %v9353_v14 = vld [vmem:[%s10238_s29 + $0x40] sm:$0xff]  }
  0x16   : > { %v9354_v15 = vld [vmem:[%s10238_s29 + $0x48] sm:$0xff]   ;;  %v9355_v16 = vld [vmem:[%s10238_s29 + $0x50] sm:$0xff]   ;;  %v9356_v17 = vld [vmem:[%s10238_s29 + $0x58] sm:$0xff]  }
  0x17   : > { %8583 = vmatpush3.bf16.msra.mxu0 %v9342_v3  ;;  %v9357_v18 = vld [vmem:[%s10238_s29 + $0x60] sm:$0xff]   ;;  %v9358_v19 = vld [vmem:[%s10238_s29 + $0x68] sm:$0xff]   ;;  %v9359_v20 = vld [vmem:[%s10238_s29 + $0x70] sm:$0xff]  }
  0x18   : > { %8584 = vmatprep.subr.bf16.mxu0 %v9343_v5  ;;  %v9360_v21 = vld [vmem:[%s10238_s29 + $0x78] sm:$0xff]   ;;  %v9361_v22 = vld [vmem:[%s10238_s29 + $0x80] sm:$0xff]   ;;  %v9362_v23 = vld [vmem:[%s10238_s29 + $0x88] sm:$0xff]  }
  0x19   : > { %v9363_v24 = vld [vmem:[%s10238_s29 + $0x90] sm:$0xff]   ;;  %v9364_v25 = vld [vmem:[%s10238_s29 + $0x98] sm:$0xff]   ;;  %v9365_v26 = vld [vmem:[%s10238_s29 + $0xa0] sm:$0xff]  }
  0x1a   : > { %v9366_v27 = vld [vmem:[%s10238_s29 + $0xa8] sm:$0xff]   ;;  %v9367_v28 = vld [vmem:[%s10238_s29 + $0xb0] sm:$0xff]   ;;  %v9368_v29 = vld [vmem:[%s10238_s29 + $0xb8] sm:$0xff]  }
  0x1b   : > { %8585 = vmatpush3.bf16.msra.mxu0 %v9343_v5  ;;  %v9369_v30 = vld [vmem:[%s10238_s29 + $0xc0] sm:$0xff]   ;;  %v9370_v31 = vld [vmem:[%s10238_s29 + $0xc8] sm:$0xff]   ;;  %v9371_v32 = vld [vmem:[%s10238_s29 + $0xd0] sm:$0xff]  }
  0x1c   : > { %8586 = vmatprep.subr.bf16.mxu0 %v9344_v6  ;;  %v9372_v33 = vld [vmem:[%s10238_s29 + $0xd8] sm:$0xff]   ;;  %v9373_v34 = vld [vmem:[%s10238_s29 + $0xe0] sm:$0xff]   ;;  %v9374_v35 = vld [vmem:[%s10238_s29 + $0xe8] sm:$0xff]  }
  0x1d   : > { %v9375_v36 = vld [vmem:[%s10238_s29 + $0xf0] sm:$0xff]   ;;  %v9376_v37 = vld [vmem:[%s10238_s29 + $0xf8] sm:$0xff]   ;;  %v9377_v38 = vld [vmem:[%s10238_s29 + $0x100] sm:$0xff]  }
  0x1e   : > { %v9378_v39 = vld [vmem:[%s10238_s29 + $0x108] sm:$0xff]   ;;  %v9379_v40 = vld [vmem:[%s10238_s29 + $0x110] sm:$0xff]   ;;  %v9380_v41 = vld [vmem:[%s10238_s29 + $0x118] sm:$0xff]  }
  0x1f   : > { %8587 = vmatpush3.bf16.msra.mxu0 %v9344_v6  ;;  %v9381_v42 = vld [vmem:[%s10238_s29 + $0x120] sm:$0xff]   ;;  %v9382_v43 = vld [vmem:[%s10238_s29 + $0x128] sm:$0xff]   ;;  %v9383_v44 = vld [vmem:[%s10238_s29 + $0x130] sm:$0xff]  }
  0x20   : > { %v9384_v45 = vld [vmem:[%s10238_s29 + $0x138] sm:$0xff]   ;;  %v9385_v46 = vld [vmem:[%s10238_s29 + $0x140] sm:$0xff]   ;;  %v9386_v47 = vld [vmem:[%s10238_s29 + $0x148] sm:$0xff]  }
  0x21   : > { %v9387_v48 = vld [vmem:[%s10238_s29 + $0x150] sm:$0xff]   ;;  %v9388_v49 = vld [vmem:[%s10238_s29 + $0x158] sm:$0xff]   ;;  %v9389_v50 = vld [vmem:[%s10238_s29 + $0x160] sm:$0xff]  }
  0x22   : > { %8589 = vmatmul.mubr.msk.bf16.vlgmr.msra.gmra.mxu0 %vm1441_vm0, %v9346_v7  ;;  %v9390_v51 = vld [vmem:[%s10238_s29 + $0x168] sm:$0xff]   ;;  %v9391_v52 = vld [vmem:[%s10238_s29 + $0x170] sm:$0xff]   ;;  %v9392_v53 = vld [vmem:[%s10238_s29 + $0x178] sm:$0xff]  }
  0x23   : > { %8592 = vmatprep.mubr.msk.bf16.mxu0 %vm1441_vm0, %v9347_v8  ;;  %v9393_v54 = vld [vmem:[%s10238_s29 + $0x180] sm:$0xff]   ;;  %v9394_v55 = vld [vmem:[%s10238_s29 + $0x188] sm:$0xff]   ;;  %v9395_v56 = vld [vmem:[%s10238_s29 + $0x190] sm:$0xff]  }
  0x24   : > { %v9396_v60 = vld [vmem:[%s10238_s29 + $0x198] sm:$0xff]   ;;  %v9397_v61 = vld [vmem:[%s10238_s29 + $0x1a0] sm:$0xff]   ;;  %v9398_v2 = vld [vmem:[%s10238_s29 + $0x1a8] sm:$0xff]  }
  0x25   : > { %v9399_v3 = vld [vmem:[%s10238_s29 + $0x1b0] sm:$0xff]   ;;  %v9400_v8 = vld [vmem:[%s10238_s29 + $0x1b8] sm:$0xff]  }
  0x2a   : > { %8593 = vmatmul.mubr.msk.bf16.gmra.mxu0 %vm1441_vm0, %v9348_v9  ;;  %v9401_v9 = vld [vmem:[%s10238_s29 + $0x1c0] sm:$0xff]  }
  0x2b   : > { %8596 = vmatprep.mubr.msk.bf16.mxu0 %vm1441_vm0, %v9349_v10 }
  0x32   : > { %8597 = vmatmul.mubr.msk.bf16.gmra.mxu0 %vm1441_vm0, %v9350_v11 }
  0x33   : > { %8600 = vmatprep.mubr.msk.bf16.mxu0 %vm1441_vm0, %v9351_v12 }
  0x3a   : > { %8601 = vmatmul.mubr.msk.bf16.gmra.mxu0 %vm1441_vm0, %v9352_v13 }
  0x3b   : > { %8604 = vmatprep.mubr.msk.bf16.mxu0 %vm1441_vm0, %v9353_v14  ;;  %v9402_v14 = vld [vmem:[%s10238_s29 + $0x1c8] sm:$0xff]  }
  0x42   : > { %8605 = vmatmul.mubr.msk.bf16.gmra.mxu0 %vm1441_vm0, %v9354_v15  ;;  %v9403_v15 = vld [vmem:[%s10238_s29 + $0x1d0] sm:$0xff]  }
  0x43   : > { %8608 = vmatprep.mubr.msk.bf16.mxu0 %vm1441_vm0, %v9355_v16 }
  0x4a   : > { %8609 = vmatmul.mubr.msk.bf16.gmra.mxu0 %vm1441_vm0, %v9356_v17 }
  0x4b   : > { %8612 = vmatprep.mubr.msk.bf16.mxu0 %vm1441_vm0, %v9357_v18 }
  0x52   : > { %8613 = vmatmul.mubr.msk.bf16.gmra.mxu0 %vm1441_vm0, %v9358_v19 }
  0x53   : > { %8616 = vmatprep.mubr.msk.bf16.mxu0 %vm1441_vm0, %v9359_v20  ;;  %v9404_v20 = vld [vmem:[%s10238_s29 + $0x1d8] sm:$0xff]  }
  0x5a   : > { %8617 = vmatmul.mubr.msk.bf16.gmra.mxu0 %vm1441_vm0, %v9360_v21  ;;  %v9405_v21 = vld [vmem:[%s10238_s29 + $0x1e0] sm:$0xff]  }
  0x5b   : > { %8620 = vmatprep.mubr.msk.bf16.mxu0 %vm1441_vm0, %v9361_v22 }
  0x62   : > { %8621 = vmatmul.mubr.msk.bf16.gmra.mxu0 %vm1441_vm0, %v9362_v23 }
  0x63   : > { %8624 = vmatprep.mubr.msk.bf16.mxu0 %vm1441_vm0, %v9363_v24 }
  0x6a   : > { %8625 = vmatmul.mubr.msk.bf16.gmra.mxu0 %vm1441_vm0, %v9364_v25 }
  0x6b   : > { %8628 = vmatprep.mubr.msk.bf16.mxu0 %vm1441_vm0, %v9365_v26  ;;  %v9406_v26 = vld [vmem:[%s10238_s29 + $0x1e8] sm:$0xff]  }
  0x72   : > { %8629 = vmatmul.mubr.msk.bf16.gmra.mxu0 %vm1441_vm0, %v9366_v27  ;;  %v9407_v27 = vld [vmem:[%s10238_s29 + $0x1f0] sm:$0xff]  }
  0x73   : > { %8632 = vmatprep.mubr.msk.bf16.mxu0 %vm1441_vm0, %v9367_v28 }
  0x7a   : > { %8633 = vmatmul.mubr.msk.bf16.gmra.mxu0 %vm1441_vm0, %v9368_v29 }
  0x7b   : > { %8636 = vmatprep.mubr.msk.bf16.mxu0 %vm1441_vm0, %v9369_v30 }
  0x82   : > { %8637 = vmatmul.mubr.msk.bf16.gmra.mxu0 %vm1441_vm0, %v9370_v31 }
  0x83   : > { %8640 = vmatprep.mubr.msk.bf16.mxu0 %vm1441_vm0, %v9371_v32  ;;  %v9408_v32 = vld [vmem:[%s10238_s29 + $0x1f8] sm:$0xff]  }
  0x8a   : > { %8641 = vmatmul.mubr.msk.bf16.gmra.mxu0 %vm1441_vm0, %v9372_v33  ;;  %v9409_v33 = vld [vmem:[%s10238_s29 + $0x200] sm:$0xff]  }
  0x8b   : > { %8644 = vmatprep.mubr.msk.bf16.mxu0 %vm1441_vm0, %v9373_v34 }
  0x92   : > { %8645 = vmatmul.mubr.msk.bf16.gmra.mxu0 %vm1441_vm0, %v9374_v35 }
  0x93   : > { %8648 = vmatprep.mubr.msk.bf16.mxu0 %vm1441_vm0, %v9375_v36 }
  0x9a   : > { %8649 = vmatmul.mubr.msk.bf16.gmra.mxu0 %vm1441_vm0, %v9376_v37 }
  0x9b   : > { %8652 = vmatprep.mubr.msk.bf16.mxu0 %vm1441_vm0, %v9377_v38  ;;  %v9410_v38 = vld [vmem:[%s10238_s29 + $0x208] sm:$0xff]  }
  0xa2   : > { %8653 = vmatmul.mubr.msk.bf16.gmra.mxu0 %vm1441_vm0, %v9378_v39  ;;  %v9411_v39 = vld [vmem:[%s10238_s29 + $0x210] sm:$0xff]  }
  0xa3   : > { %8656 = vmatprep.mubr.msk.bf16.mxu0 %vm1441_vm0, %v9379_v40 }
  0xaa   : > { %8657 = vmatmul.mubr.msk.bf16.gmra.mxu0 %vm1441_vm0, %v9380_v41 }
  0xab   : > { %8660 = vmatprep.mubr.msk.bf16.mxu0 %vm1441_vm0, %v9381_v42 }
  0xb2   : > { %8661 = vmatmul.mubr.msk.bf16.gmra.mxu0 %vm1441_vm0, %v9382_v43 }
  0xb3   : > { %8664 = vmatprep.mubr.msk.bf16.mxu0 %vm1441_vm0, %v9383_v44  ;;  %v9412_v44 = vld [vmem:[%s10238_s29 + $0x218] sm:$0xff]  }
  0xba   : > { %8665 = vmatmul.mubr.msk.bf16.gmra.mxu0 %vm1441_vm0, %v9384_v45  ;;  %v9413_v45 = vld [vmem:[%s10238_s29 + $0x220] sm:$0xff]  }
  0xbb   : > { %8668 = vmatprep.mubr.msk.bf16.mxu0 %vm1441_vm0, %v9385_v46 }
  0xc2   : > { %8669 = vmatmul.mubr.msk.bf16.gmra.mxu0 %vm1441_vm0, %v9386_v47 }
  0xc3   : > { %8672 = vmatprep.mubr.msk.bf16.mxu0 %vm1441_vm0, %v9387_v48 }
  0xca   : > { %8673 = vmatmul.mubr.msk.bf16.gmra.mxu0 %vm1441_vm0, %v9388_v49 }
  0xcb   : > { %8676 = vmatprep.mubr.msk.bf16.mxu0 %vm1441_vm0, %v9389_v50  ;;  %v9414_v50 = vld [vmem:[%s10238_s29 + $0x228] sm:$0xff]  }
  0xd2   : > { %8677 = vmatmul.mubr.msk.bf16.gmra.mxu0 %vm1441_vm0, %v9390_v51  ;;  %v9415_v51 = vld [vmem:[%s10238_s29 + $0x230] sm:$0xff]  }
  0xd3   : > { %8680 = vmatprep.mubr.msk.bf16.mxu0 %vm1441_vm0, %v9391_v52 }
  0xda   : > { %8681 = vmatmul.mubr.msk.bf16.gmra.mxu0 %vm1441_vm0, %v9392_v53 }
  0xdb   : > { %8684 = vmatprep.mubr.msk.bf16.mxu0 %vm1441_vm0, %v9393_v54 }
  0xe2   : > { %v10346_v57 = vpop.f32.mrf.mxu0  ;;  %8685 = vmatmul.mubr.msk.bf16.gmra.mxu0 %vm1441_vm0, %v9394_v55 }
  0xe3   : > { %8688 = vmatprep.mubr.msk.bf16.mxu0 %vm1441_vm0, %v9395_v56  ;;  %v9416_v56 = vld [vmem:[%s10238_s29 + $0x238] sm:$0xff]  }
  0xe4   : > { %v10350_v58 = vpop.f32.mrf.mxu0 }
  0xe6   : > { %v10352_v59 = vpop.f32.mrf.mxu0 }
  0xe8   : > { %v10356_v62 = vpop.f32.mrf.mxu0 }
  0xea   : > { %v10358_v63 = vpop.f32.mrf.mxu0  ;;  %8689 = vmatmul.mubr.msk.bf16.gmra.mxu0 %vm1441_vm0, %v9396_v60  ;;  %v9417_v60 = vld [vmem:[%s10238_s29 + $0x240] sm:$0xff]  }
  0xeb   : > { %8692 = vmatprep.mubr.msk.bf16.mxu0 %vm1441_vm0, %v9397_v61 }
  0xec   : > { %v10362_v0 = vpop.f32.mrf.mxu0 }
  0xee   : > { %v10364_v1 = vpop.f32.mrf.mxu0 }
  0xf0   : > { %v10368_v4 = vpop.f32.mrf.mxu0 }
  0xf2   : > { %v10370_v5 = vpop.f32.mrf.mxu0  ;;  %8693 = vmatmul.mubr.msk.bf16.gmra.mxu0 %vm1441_vm0, %v9398_v2 }
  0xf3   : > { %8696 = vmatprep.mubr.msk.bf16.mxu0 %vm1441_vm0, %v9399_v3 }
  0xf4   : > { %v10374_v6 = vpop.f32.mrf.mxu0 }
  0xf6   : > { %v10376_v7 = vpop.f32.mrf.mxu0 }
  0xf8   : > { %v10380_v10 = vpop.f32.mrf.mxu0 }
  0xfa   : > { %v10382_v11 = vpop.f32.mrf.mxu0  ;;  %8697 = vmatmul.mubr.msk.bf16.gmra.mxu0 %vm1441_vm0, %v9400_v8 }
  0xfb   : > { %8700 = vmatprep.mubr.msk.bf16.mxu0 %vm1441_vm0, %v9401_v9  ;;  %v9418_v9 = vld [vmem:[%s10238_s29 + $0x248] sm:$0xff]  }
  0xfc   : > { %v10386_v12 = vpop.f32.mrf.mxu0 }
  0xfe   : > { %v10388_v13 = vpop.f32.mrf.mxu0 }
 0x100   : > { %v10392_v16 = vpop.f32.mrf.mxu0 }
 0x102   : > { %v10394_v17 = vpop.f32.mrf.mxu0  ;;  %8701 = vmatmul.mubr.msk.bf16.gmra.mxu0 %vm1441_vm0, %v9402_v14  ;;  %v9419_v14 = vld [vmem:[%s10238_s29 + $0x250] sm:$0xff]  }
 0x103   : > { %8704 = vmatprep.mubr.msk.bf16.mxu0 %vm1441_vm0, %v9403_v15 }
 0x104   : > { %v10398_v18 = vpop.f32.mrf.mxu0 }
 0x106   : > { %v10400_v19 = vpop.f32.mrf.mxu0 }
 0x108   : > { %v10404_v22 = vpop.f32.mrf.mxu0 }
 0x10a   : > { %v10406_v23 = vpop.f32.mrf.mxu0  ;;  %8705 = vmatmul.mubr.msk.bf16.gmra.mxu0 %vm1441_vm0, %v9404_v20 }
 0x10b   : > { %8708 = vmatprep.mubr.msk.bf16.mxu0 %vm1441_vm0, %v9405_v21 }
 0x10c   : > { %v10410_v24 = vpop.f32.mrf.mxu0 }
 0x10e   : > { %v10412_v25 = vpop.f32.mrf.mxu0 }
 0x110   : > { %v10416_v28 = vpop.f32.mrf.mxu0 }
 0x112   : > { %v10418_v29 = vpop.f32.mrf.mxu0  ;;  %8709 = vmatmul.mubr.msk.bf16.gmra.mxu0 %vm1441_vm0, %v9406_v26 }
 0x113   : > { %8712 = vmatprep.mubr.msk.bf16.mxu0 %vm1441_vm0, %v9407_v27  ;;  %v9420_v27 = vld [vmem:[%s10238_s29 + $0x258] sm:$0xff]  }
 0x114   : > { %v10422_v30 = vpop.f32.mrf.mxu0 }
 0x116   : > { %v10424_v31 = vpop.f32.mrf.mxu0 }
 0x118   : > { %v10428_v34 = vpop.f32.mrf.mxu0 }
 0x11a   : > { %v10430_v35 = vpop.f32.mrf.mxu0  ;;  %8713 = vmatmul.mubr.msk.bf16.gmra.mxu0 %vm1441_vm0, %v9408_v32  ;;  %v9421_v32 = vld [vmem:[%s10238_s29 + $0x260] sm:$0xff]  }
 0x11b   : > { %8716 = vmatprep.mubr.msk.bf16.mxu0 %vm1441_vm0, %v9409_v33 }
 0x11c   : > { %v10434_v36 = vpop.f32.mrf.mxu0 }
 0x11e   : > { %v10436_v37 = vpop.f32.mrf.mxu0 }
 0x120   : > { %v10440_v40 = vpop.f32.mrf.mxu0 }
 0x122   : > { %v10442_v41 = vpop.f32.mrf.mxu0  ;;  %8717 = vmatmul.mubr.msk.bf16.gmra.mxu0 %vm1441_vm0, %v9410_v38 }
 0x123   : > { %8720 = vmatprep.mubr.msk.bf16.mxu0 %vm1441_vm0, %v9411_v39 }
 0x124   : > { %v10446_v42 = vpop.f32.mrf.mxu0 }
 0x126   : > { %v10448_v43 = vpop.f32.mrf.mxu0 }
 0x128   : > { %v10452_v46 = vpop.f32.mrf.mxu0 }
 0x12a   : > { %v10454_v47 = vpop.f32.mrf.mxu0  ;;  %8721 = vmatmul.mubr.msk.bf16.gmra.mxu0 %vm1441_vm0, %v9412_v44 }
 0x12b   : > { %8724 = vmatprep.mubr.msk.bf16.mxu0 %vm1441_vm0, %v9413_v45  ;;  %v9422_v45 = vld [vmem:[%s10238_s29 + $0x268] sm:$0xff]  }
 0x12c   : > { %v10458_v48 = vpop.f32.mrf.mxu0 }
 0x12e   : > { %v10460_v49 = vpop.f32.mrf.mxu0 }
 0x130   : > { %v10464_v52 = vpop.f32.mrf.mxu0 }
 0x132   : > { %v10466_v53 = vpop.f32.mrf.mxu0  ;;  %8725 = vmatmul.mubr.msk.bf16.gmra.mxu0 %vm1441_vm0, %v9414_v50  ;;  %v9423_v50 = vld [vmem:[%s10238_s29 + $0x270] sm:$0xff]  }
 0x133   : > { %8728 = vmatprep.mubr.msk.bf16.mxu0 %vm1441_vm0, %v9415_v51 }
 0x134   : > { %v10470_v54 = vpop.f32.mrf.mxu0 }
 0x136   : > { %v10472_v55 = vpop.f32.mrf.mxu0 }
 0x138   : > { %v10476_v61 = vpop.f32.mrf.mxu0 }
 0x13a   : > { %v10478_v2 = vpop.f32.mrf.mxu0  ;;  %8729 = vmatmul.mubr.msk.bf16.gmra.mxu0 %vm1441_vm0, %v9416_v56 }
 0x13b   : > { %8732 = vmatprep.mubr.msk.bf16.mxu0 %vm1441_vm0, %v9417_v60 }
 0x13c   : > { %v10482_v3 = vpop.f32.mrf.mxu0 }
 0x13e   : > { %v10484_v8 = vpop.f32.mrf.mxu0 }
 0x140   : > { %v10488_v15 = vpop.f32.mrf.mxu0 }
 0x142   : > { %v10490_v20 = vpop.f32.mrf.mxu0  ;;  %8733 = vmatmul.mubr.msk.bf16.gmra.mxu0 %vm1441_vm0, %v9418_v9 }
 0x143   : > { %8736 = vmatprep.mubr.msk.bf16.mxu0 %vm1441_vm0, %v9419_v14  ;;  %v9424_v14 = vld [vmem:[%s10238_s29 + $0x278] sm:$0xff]  }
 0x144   : > { %v10494_v21 = vpop.f32.mrf.mxu0 }
 0x146   : > { %v10496_v26 = vpop.f32.mrf.mxu0 }
 0x148   : > { %v10500_v33 = vpop.f32.mrf.mxu0 }
 0x14a   : > { %v10502_v38 = vpop.f32.mrf.mxu0  ;;  %8737 = vmatmul.mubr.msk.bf16.gmra.mxu0 %vm1441_vm0, %v9420_v27  ;;  %v9425_v27 = vld [vmem:[%s10238_s29 + $0x280] sm:$0xff]  }
 0x14b   : > { %8740 = vmatprep.mubr.msk.bf16.mxu0 %vm1441_vm0, %v9421_v32 }
 0x14c   : > { %v10506_v39 = vpop.f32.mrf.mxu0 }
 0x14d   : > { %12181 = vst [vmem:[#allocation3_spill] sm:$0xff] %v10506_v39  ;;  %v9432_v39 = vld [vmem:[%s10238_s29 + $0x2b8] sm:$0xff]  }
 0x14e   : > { %v10508_v44 = vpop.f32.mrf.mxu0 }
 0x14f   : > { %12182 = vst [vmem:[#allocation4_spill] sm:$0xff] %v10508_v44 }
 0x150   : > { %v10512_v51 = vpop.f32.mrf.mxu0 }
 0x151   : > { %12183 = vst [vmem:[#allocation5_spill] sm:$0xff] %v10512_v51 }
 0x152   : > { %v10514_v56 = vpop.f32.mrf.mxu0  ;;  %8741 = vmatmul.mubr.msk.bf16.gmra.mxu0 %vm1441_vm0, %v9422_v45 }
 0x153   : > { %12184 = vst [vmem:[#allocation6_spill] sm:$0xff] %v10514_v56  ;;  %8744 = vmatprep.mubr.msk.bf16.mxu0 %vm1441_vm0, %v9423_v50  ;;  %v9426_v50 = vld [vmem:[%s10238_s29 + $0x288] sm:$0xff]  }
 0x154   : > { %v10518_v60 = vpop.f32.mrf.mxu0 }
 0x155   : > { %12185 = vst [vmem:[#allocation7_spill] sm:$0xff] %v10518_v60  ;;  %v9427_v60 = vld [vmem:[%s10238_s29 + $0x290] sm:$0xff]  }
 0x156   : > { %v10520_v9 = vpop.f32.mrf.mxu0 }
 0x157   : > { %12186 = vst [vmem:[#allocation8_spill] sm:$0xff] %v10520_v9 }
 0x158   : > { %v10524_v32 = vpop.f32.mrf.mxu0 }
 0x159   : > { %12187 = vst [vmem:[#allocation9_spill] sm:$0xff] %v10524_v32 }
 0x15a   : > { %v10526_v44 = vpop.f32.mrf.mxu0  ;;  %8745 = vmatmul.mubr.msk.bf16.gmra.mxu0 %vm1441_vm0, %v9424_v14 }
 0x15b   : > { %12188 = vst [vmem:[#allocation10_spill] sm:$0xff] %v10526_v44  ;;  %8748 = vmatprep.mubr.msk.bf16.mxu0 %vm1441_vm0, %v9425_v27  ;;  %v9428_v27 = vld [vmem:[%s10238_s29 + $0x298] sm:$0xff]  }
 0x15c   : > { %v10530_v56 = vpop.f32.mrf.mxu0 }
 0x15d   : > { %12189 = vst [vmem:[#allocation11_spill] sm:$0xff] %v10530_v56  ;;  %v9429_v56 = vld [vmem:[%s10238_s29 + $0x2a0] sm:$0xff]  }
 0x15e   : > { %v10532_v45 = vpop.f32.mrf.mxu0 }
 0x15f   : > { %12190 = vst [vmem:[#allocation12_spill] sm:$0xff] %v10532_v45 }
 0x160   : > { %v10536_v9 = vpop.f32.mrf.mxu0 }
 0x161   : > { %12191 = vst [vmem:[#allocation13_spill] sm:$0xff] %v10536_v9 }
 0x162   : > { %v10538_v51 = vpop.f32.mrf.mxu0  ;;  %8749 = vmatmul.mubr.msk.bf16.gmra.mxu0 %vm1441_vm0, %v9426_v50 }
 0x163   : > { %12192 = vst [vmem:[#allocation14_spill] sm:$0xff] %v10538_v51  ;;  %8752 = vmatprep.mubr.msk.bf16.mxu0 %vm1441_vm0, %v9427_v60  ;;  %v10559_v60 = vld [vmem:[%s12171_s2] ss:$0 sm:$0xff] }
 0x164   : > { %v10542_v44 = vpop.f32.mrf.mxu0 }
 0x165   : > { %12193 = vst [vmem:[#allocation15_spill] sm:$0xff] %v10542_v44  ;;  %v9431_v44 = vld [vmem:[%s10238_s29 + $0x2b0] sm:$0xff]  }
 0x166   : > { %v10544_v14 = vpop.f32.mrf.mxu0 }
 0x167   : > { %12194 = vst [vmem:[#allocation16_spill] sm:$0xff] %v10544_v14  ;;  %v9430_v14 = vld [vmem:[%s10238_s29 + $0x2a8] sm:$0xff]  }
 0x168   : > { %v10548_v32 = vpop.f32.mrf.mxu0 }
 0x169   : > { %12195 = vst [vmem:[#allocation17_spill] sm:$0xff] %v10548_v32  ;;  %v1917_v32 = vadd.f32 %v10346_v57, %v10559_v60 }
 0x16a   : > { %v10550_v45 = vpop.f32.mrf.mxu0  ;;  %8753 = vmatmul.mubr.msk.bf16.gmra.mxu0 %vm1441_vm0, %v9428_v27 }
 0x16b   : > { %12196 = vst [vmem:[#allocation18_spill] sm:$0xff] %v10550_v45  ;;  %8756 = vmatprep.mubr.msk.bf16.mxu0 %vm1441_vm0, %v9429_v56  ;;  %v1909_v56 = vadd.f32 %v10559_v60, %v10350_v58  ;;  %9538 = vtanh.f32 %v1917_v32  ;;  %v1912_v58 = vadd.f32 %v10559_v60, %v10356_v62 }
 0x16c   : > { %v10554_v9 = vpop.f32.mrf.mxu0 }
 0x16d   : > { %12197 = vst [vmem:[#allocation19_spill] sm:$0xff] %v10554_v9 }
 0x16e   : > { %v10561_v50 = vpop.f32.mrf.mxu0 }
 0x16f   : > { %12198 = vst [vmem:[#allocation20_spill] sm:$0xff] %v10561_v50  ;;  %v1920_v50 = vadd.f32 %v10352_v59, %v10559_v60 }
 0x170   : > { %v10567_v45 = vpop.f32.mrf.mxu0 }
 0x171   : > { %12199 = vst [vmem:[#allocation21_spill] sm:$0xff] %v10567_v45 }
 0x172   : > { %v8662_v27 = vpop.f32.mrf.mxu0  ;;  %8757 = vmatmul.mubr.msk.bf16.gmra.mxu0 %vm1441_vm0, %v9430_v14 }
 0x173   : > { %v2205_v9 = vadd.f32 %v8662_v27, %v10559_v60  ;;  %8760 = vmatprep.mubr.msk.bf16.mxu0 %vm1441_vm0, %v9431_v44  ;;  %v9433_v27 = vld [vmem:[%s10238_s29 + $0x2c0] sm:$0xff]   ;;  %v1933_v44 = vadd.f32 %v10358_v63, %v10559_v60  ;;  %v1936_v63 = vadd.f32 %v10364_v1, %v10559_v60 }
 0x174   : > { %v2196_v51 = vpop.f32.mrf.mxu0 }
 0x175   : > { %9540 = vtanh.f32 %v2205_v9  ;;  %v2197_v57 = vadd.f32 %v10559_v60, %v2196_v51  ;;  %v1925_v51 = vadd.f32 %v10559_v60, %v10362_v0  ;;  %v1928_v0 = vadd.f32 %v10559_v60, %v10368_v4 }
 0x176   : > { %9542 = vtanh.f32 %v1909_v56  ;;  %v8663_v45 = vpop.f32.mrf.mxu0  ;;  %v1941_v4 = vadd.f32 %v10559_v60, %v10374_v6 }
 0x177   : > { %9544 = vtanh.f32 %v2197_v57  ;;  %v2208_v14 = vadd.f32 %v8663_v45, %v10559_v60  ;;  %v9434_v57 = vld [vmem:[%s10238_s29 + $0x2c8] sm:$0xff]  }
 0x178   : > { %9546 = vtanh.f32 %v1920_v50  ;;  %v2199_v32 = vpop.f32.mrf.mxu0  ;;  %v9539_v1 = vpop.eup %9538 }
 0x179   : > { %9548 = vtanh.f32 %v2208_v14  ;;  %v2200_v59 = vadd.f32 %v10559_v60, %v2199_v32  ;;  %v1949_v14 = vadd.f32 %v10370_v5, %v10559_v60 }
 0x17a   : > { %9550 = vtanh.f32 %v1912_v58  ;;  %v8666_v62 = vpop.f32.mrf.mxu0  ;;  %8761 = vmatmul.mubr.msk.bf16.gmra.mxu0 %vm1441_vm0, %v9432_v39  ;;  %v9435_v58 = vld [vmem:[%s10238_s29 + $0x2d0] sm:$0xff]  }
 0x17b   : > { %9552 = vtanh.f32 %v2200_v59  ;;  %v2221_v9 = vadd.f32 %v8666_v62, %v10559_v60  ;;  %8764 = vmatprep.mubr.msk.bf16.mxu0 %vm1441_vm0, %v9433_v27 }
 0x17c   : > { %9554 = vtanh.f32 %v1933_v44  ;;  %v2212_v45 = vpop.f32.mrf.mxu0 }
 0x17d   : > { %9556 = vtanh.f32 %v2221_v9  ;;  %v2213_v50 = vadd.f32 %v10559_v60, %v2212_v45 }
 0x17e   : > { %9558 = vtanh.f32 %v1925_v51  ;;  %v8667_v56 = vpop.f32.mrf.mxu0 }
 0x17f   : > { %9560 = vtanh.f32 %v2213_v50  ;;  %v2224_v39 = vadd.f32 %v8667_v56, %v10559_v60 }
 0x180   : > { %9562 = vtanh.f32 %v1936_v63  ;;  %v2215_v27 = vpop.f32.mrf.mxu0  ;;  %v1952_v63 = vadd.f32 %v10376_v7, %v10559_v60 }
 0x181   : > { %9564 = vtanh.f32 %v2224_v39  ;;  %v2216_v44 = vadd.f32 %v10559_v60, %v2215_v27 }
 0x182   : > { %v9541_v32 = vpop.eup %9540  ;;  %9566 = vtanh.f32 %v1928_v0  ;;  %v8670_v59 = vpop.f32.mrf.mxu0  ;;  %8765 = vmatmul.mubr.msk.bf16.gmra.mxu0 %vm1441_vm0, %v9434_v57  ;;  %v1944_v57 = vadd.f32 %v10559_v60, %v10380_v10 }
 0x183   : > { %v9543_v51 = vpop.eup %9542  ;;  %9568 = vtanh.f32 %v2216_v44  ;;  %v2237_v62 = vadd.f32 %v8670_v59, %v10559_v60  ;;  %8768 = vmatprep.mubr.msk.bf16.mxu0 %vm1441_vm0, %v9435_v58  ;;  %v10606_v5 = vadd.f32 %v9541_v32, %v9539_v1  ;;  %v9436_v58 = vld [vmem:[%s10238_s29 + $0x2d8] sm:$0xff]   ;;  %v9437_v1 = vld [vmem:[%s10238_s29 + $0x2e0] sm:$0xff]   ;;  %v1965_v32 = vadd.f32 %v10382_v11, %v10559_v60 }
 0x184   : > { %v9545_v9 = vpop.eup %9544  ;;  %9570 = vtanh.f32 %v1949_v14  ;;  %v2228_v45 = vpop.f32.mrf.mxu0 }
 0x185   : > { %v9547_v6 = vpop.eup %9546  ;;  %9572 = vtanh.f32 %v2237_v62  ;;  %v2229_v50 = vadd.f32 %v10559_v60, %v2228_v45  ;;  %v10611_v0 = vadd.f32 %v9545_v9, %v9543_v51  ;;  %v1957_v9 = vadd.f32 %v10559_v60, %v10386_v12 }
 0x186   : > { %v9549_v56 = vpop.eup %9548  ;;  %9574 = vtanh.f32 %v1941_v4  ;;  %v8671_v39 = vpop.f32.mrf.mxu0 }
 0x187   : > { %v9551_v27 = vpop.eup %9550  ;;  %9576 = vtanh.f32 %v2229_v50  ;;  %v2240_v14 = vadd.f32 %v8671_v39, %v10559_v60  ;;  %v10618_v7 = vadd.f32 %v9549_v56, %v9547_v6  ;;  %v1968_v56 = vadd.f32 %v10388_v13, %v10559_v60 }
 0x188   : > { %v9553_v44 = vpop.eup %9552  ;;  %9578 = vtanh.f32 %v1952_v63  ;;  %v2231_v59 = vpop.f32.mrf.mxu0 }
 0x189   : > { %v9555_v51 = vpop.eup %9554  ;;  %9580 = vtanh.f32 %v2240_v14  ;;  %v2232_v4 = vadd.f32 %v10559_v60, %v2231_v59  ;;  %v10623_v10 = vadd.f32 %v9553_v44, %v9551_v27  ;;  %v1960_v14 = vadd.f32 %v10559_v60, %v10392_v16 }
 0x18a   : > { %v9557_v62 = vpop.eup %9556  ;;  %9582 = vtanh.f32 %v1944_v57  ;;  %v8674_v45 = vpop.f32.mrf.mxu0  ;;  %8769 = vmatmul.mubr.msk.bf16.gmra.mxu0 %vm1441_vm0, %v9436_v58 }
 0x18b   : > { %v9559_v6 = vpop.eup %9558  ;;  %v10628_v63 = vadd.f32 %v9557_v62, %v9555_v51  ;;  %9584 = vtanh.f32 %v2232_v4  ;;  %v2253_v11 = vadd.f32 %v8674_v45, %v10559_v60  ;;  %8772 = vmatprep.mubr.msk.bf16.mxu0 %vm1441_vm0, %v9437_v1  ;;  %v9438_v1 = vld [vmem:[%s10238_s29 + $0x2e8] sm:$0xff]   ;;  %v9439_v51 = vld [vmem:[%s10238_s29 + $0x2f0] sm:$0xff]   ;;  %v1981_v62 = vadd.f32 %v10394_v17, %v10559_v60 }
 0x18c   : > { %v9561_v50 = vpop.eup %9560  ;;  %9586 = vtanh.f32 %v1965_v32  ;;  %v2244_v57 = vpop.f32.mrf.mxu0 }
 0x18d   : > { %v9563_v12 = vpop.eup %9562  ;;  %9588 = vtanh.f32 %v2253_v11  ;;  %v2245_v39 = vadd.f32 %v10559_v60, %v2244_v57  ;;  %v10635_v58 = vadd.f32 %v9561_v50, %v9559_v6  ;;  %v1973_v50 = vadd.f32 %v10559_v60, %v10398_v18 }
 0x18e   : > { %v9565_v27 = vpop.eup %9564  ;;  %9590 = vtanh.f32 %v1957_v9  ;;  %v8675_v44 = vpop.f32.mrf.mxu0 }
 0x18f   : > { %v9567_v59 = vpop.eup %9566  ;;  %v10640_v32 = vadd.f32 %v9565_v27, %v9563_v12  ;;  %9592 = vtanh.f32 %v2245_v39  ;;  %v2256_v13 = vadd.f32 %v8675_v44, %v10559_v60  ;;  %v1984_v27 = vadd.f32 %v10400_v19, %v10559_v60 }
 0x190   : > { %v9569_v4 = vpop.eup %9568  ;;  %9594 = vtanh.f32 %v1968_v56  ;;  %v2247_v45 = vpop.f32.mrf.mxu0 }
 0x191   : > { %v9571_v6 = vpop.eup %9570  ;;  %9596 = vtanh.f32 %v2256_v13  ;;  %v2248_v9 = vadd.f32 %v10559_v60, %v2247_v45  ;;  %v10647_v16 = vadd.f32 %v9569_v4, %v9567_v59  ;;  %v1976_v13 = vadd.f32 %v10559_v60, %v10404_v22 }
 0x192   : > { %v9573_v11 = vpop.eup %9572  ;;  %9598 = vtanh.f32 %v1960_v14  ;;  %v8678_v57 = vpop.f32.mrf.mxu0  ;;  %8773 = vmatmul.mubr.msk.bf16.gmra.mxu0 %vm1441_vm0, %v9438_v1 }
 0x193   : > { %v9575_v12 = vpop.eup %9574  ;;  %v10652_v56 = vadd.f32 %v9573_v11, %v9571_v6  ;;  %9600 = vtanh.f32 %v2248_v9  ;;  %v2269_v17 = vadd.f32 %v8678_v57, %v10559_v60  ;;  %8776 = vmatprep.mubr.msk.bf16.mxu0 %vm1441_vm0, %v9439_v51  ;;  %v9440_v51 = vld [vmem:[%s10238_s29 + $0x2f8] sm:$0xff]   ;;  %v9441_v6 = vld [vmem:[%s10238_s29 + $0x300] sm:$0xff]   ;;  %v1997_v11 = vadd.f32 %v10406_v23, %v10559_v60 }
 0x194   : > { %v9577_v39 = vpop.eup %9576  ;;  %9602 = vtanh.f32 %v1981_v62  ;;  %v2260_v14 = vpop.f32.mrf.mxu0 }
 0x195   : > { %v9579_v18 = vpop.eup %9578  ;;  %v10658_v44 = vadd.f32 %v9577_v39, %v9575_v12  ;;  %9604 = vtanh.f32 %v2269_v17  ;;  %v2261_v1 = vadd.f32 %v10559_v60, %v2260_v14  ;;  %v1989_v39 = vadd.f32 %v10559_v60, %v10410_v24 }
 0x196   : > { %v9581_v59 = vpop.eup %9580  ;;  %9606 = vtanh.f32 %v1973_v50  ;;  %v8679_v4 = vpop.f32.mrf.mxu0 }
 0x197   : > { %v9583_v45 = vpop.eup %9582  ;;  %v10664_v62 = vadd.f32 %v9581_v59, %v9579_v18  ;;  %9608 = vtanh.f32 %v2261_v1  ;;  %v2272_v19 = vadd.f32 %v8679_v4, %v10559_v60  ;;  %v2000_v59 = vadd.f32 %v10412_v25, %v10559_v60 }
 0x198   : > { %v9585_v9 = vpop.eup %9584  ;;  %9610 = vtanh.f32 %v1984_v27  ;;  %v2263_v57 = vpop.f32.mrf.mxu0 }
 0x199   : > { %v9587_v12 = vpop.eup %9586  ;;  %v10670_v50 = vadd.f32 %v9585_v9, %v9583_v45  ;;  %9612 = vtanh.f32 %v2272_v19  ;;  %v2264_v22 = vadd.f32 %v10559_v60, %v2263_v57  ;;  %v1992_v19 = vadd.f32 %v10559_v60, %v10416_v28  ;;  %v9442_v9 = vld [vmem:[%s10238_s29 + $0x308] sm:$0xff]  }
 0x19a   : > { %v9589_v17 = vpop.eup %9588  ;;  %9614 = vtanh.f32 %v1976_v13  ;;  %v8682_v14 = vpop.f32.mrf.mxu0  ;;  %8777 = vmatmul.mubr.msk.bf16.gmra.mxu0 %vm1441_vm0, %v9440_v51 }
 0x19b   : > { %v9591_v18 = vpop.eup %9590  ;;  %9616 = vtanh.f32 %v2264_v22  ;;  %v2285_v23 = vadd.f32 %v8682_v14, %v10559_v60  ;;  %8780 = vmatprep.mubr.msk.bf16.mxu0 %vm1441_vm0, %v9441_v6  ;;  %v10678_v27 = vadd.f32 %v9589_v17, %v9587_v12  ;;  %v9443_v12 = vld [vmem:[%s10238_s29 + $0x310] sm:$0xff]   ;;  %v2013_v17 = vadd.f32 %v10418_v29, %v10559_v60 }
 0x19c   : > { %v9593_v1 = vpop.eup %9592  ;;  %9618 = vtanh.f32 %v1997_v11  ;;  %v2276_v13 = vpop.f32.mrf.mxu0 }
 0x19d   : > { %v9595_v24 = vpop.eup %9594  ;;  %9620 = vtanh.f32 %v2285_v23  ;;  %v2277_v4 = vadd.f32 %v10559_v60, %v2276_v13  ;;  %v10683_v51 = vadd.f32 %v9593_v1, %v9591_v18  ;;  %v2005_v1 = vadd.f32 %v10559_v60, %v10422_v30 }
 0x19e   : > { %v9597_v45 = vpop.eup %9596  ;;  %9622 = vtanh.f32 %v1989_v39  ;;  %v8683_v6 = vpop.f32.mrf.mxu0 }
 0x19f   : > { %v9599_v57 = vpop.eup %9598  ;;  %9624 = vtanh.f32 %v2277_v4  ;;  %v2288_v11 = vadd.f32 %v8683_v6, %v10559_v60  ;;  %v10690_v25 = vadd.f32 %v9597_v45, %v9595_v24  ;;  %v2016_v45 = vadd.f32 %v10424_v31, %v10559_v60 }
 0x1a0   : > { %v9601_v22 = vpop.eup %9600  ;;  %9626 = vtanh.f32 %v2000_v59  ;;  %v2279_v14 = vpop.f32.mrf.mxu0 }
 0x1a1   : > { %v9603_v18 = vpop.eup %9602  ;;  %9628 = vtanh.f32 %v2288_v11  ;;  %v2280_v39 = vadd.f32 %v10559_v60, %v2279_v14  ;;  %v10695_v28 = vadd.f32 %v9601_v22, %v9599_v57  ;;  %v2008_v11 = vadd.f32 %v10559_v60, %v10428_v34 }
 0x1a2   : > { %v9605_v23 = vpop.eup %9604  ;;  %9630 = vtanh.f32 %v1992_v19  ;;  %v8686_v13 = vpop.f32.mrf.mxu0  ;;  %8781 = vmatmul.mubr.msk.bf16.gmra.mxu0 %vm1441_vm0, %v9442_v9 }
 0x1a3   : > { %v9607_v24 = vpop.eup %9606  ;;  %v10700_v59 = vadd.f32 %v9605_v23, %v9603_v18  ;;  %9632 = vtanh.f32 %v2280_v39  ;;  %v2301_v29 = vadd.f32 %v8686_v13, %v10559_v60  ;;  %8784 = vmatprep.mubr.msk.bf16.mxu0 %vm1441_vm0, %v9443_v12  ;;  %v9444_v12 = vld [vmem:[%s10238_s29 + $0x318] sm:$0xff]   ;;  %v9445_v18 = vld [vmem:[%s10238_s29 + $0x320] sm:$0xff]   ;;  %v2029_v23 = vadd.f32 %v10430_v35, %v10559_v60 }
 0x1a4   : > { %v9609_v4 = vpop.eup %9608  ;;  %9634 = vtanh.f32 %v2013_v17  ;;  %v2292_v19 = vpop.f32.mrf.mxu0 }
 0x1a5   : > { %v9611_v30 = vpop.eup %9610  ;;  %v10706_v6 = vadd.f32 %v9609_v4, %v9607_v24  ;;  %9636 = vtanh.f32 %v2301_v29  ;;  %v2293_v9 = vadd.f32 %v10559_v60, %v2292_v19  ;;  %v2021_v4 = vadd.f32 %v10559_v60, %v10434_v36 }
 0x1a6   : > { %v9613_v57 = vpop.eup %9612  ;;  %9638 = vtanh.f32 %v2005_v1  ;;  %v8687_v22 = vpop.f32.mrf.mxu0 }
 0x1a7   : > { %v9615_v14 = vpop.eup %9614  ;;  %v10712_v17 = vadd.f32 %v9613_v57, %v9611_v30  ;;  %9640 = vtanh.f32 %v2293_v9  ;;  %v2304_v31 = vadd.f32 %v8687_v22, %v10559_v60  ;;  %v2032_v57 = vadd.f32 %v10436_v37, %v10559_v60 }
 0x1a8   : > { %v9617_v39 = vpop.eup %9616  ;;  %9642 = vtanh.f32 %v2016_v45  ;;  %v2295_v13 = vpop.f32.mrf.mxu0 }
 0x1a9   : > { %v9619_v24 = vpop.eup %9618  ;;  %v10718_v1 = vadd.f32 %v9617_v39, %v9615_v14  ;;  %9644 = vtanh.f32 %v2304_v31  ;;  %v2296_v34 = vadd.f32 %v10559_v60, %v2295_v13  ;;  %v2024_v31 = vadd.f32 %v10559_v60, %v10440_v40 }
 0x1aa   : > { %v9621_v29 = vpop.eup %9620  ;;  %9646 = vtanh.f32 %v2008_v11  ;;  %v8690_v19 = vpop.f32.mrf.mxu0  ;;  %8785 = vmatmul.mubr.msk.bf16.gmra.mxu0 %vm1441_vm0, %v9444_v12 }
 0x1ab   : > { %v9623_v30 = vpop.eup %9622  ;;  %v10724_v45 = vadd.f32 %v9621_v29, %v9619_v24  ;;  %9648 = vtanh.f32 %v2296_v34  ;;  %v2317_v35 = vadd.f32 %v8690_v19, %v10559_v60  ;;  %8788 = vmatprep.mubr.msk.bf16.mxu0 %vm1441_vm0, %v9445_v18  ;;  %v9446_v18 = vld [vmem:[%s10238_s29 + $0x328] sm:$0xff]   ;;  %v9447_v24 = vld [vmem:[%s10238_s29 + $0x330] sm:$0xff]   ;;  %v2045_v29 = vadd.f32 %v10442_v41, %v10559_v60 }
 0x1ac   : > { %v9625_v9 = vpop.eup %9624  ;;  %9650 = vtanh.f32 %v2029_v23  ;;  %v2308_v11 = vpop.f32.mrf.mxu0 }
 0x1ad   : > { %v9627_v36 = vpop.eup %9626  ;;  %v10730_v22 = vadd.f32 %v9625_v9, %v9623_v30  ;;  %9652 = vtanh.f32 %v2317_v35  ;;  %v2309_v12 = vadd.f32 %v10559_v60, %v2308_v11  ;;  %v2037_v9 = vadd.f32 %v10559_v60, %v10446_v42 }
 0x1ae   : > { %v9629_v14 = vpop.eup %9628  ;;  %9654 = vtanh.f32 %v2021_v4  ;;  %v8691_v39 = vpop.f32.mrf.mxu0 }
 0x1af   : > { %v9631_v13 = vpop.eup %9630  ;;  %v10736_v23 = vadd.f32 %v9629_v14, %v9627_v36  ;;  %9656 = vtanh.f32 %v2309_v12  ;;  %v2320_v37 = vadd.f32 %v8691_v39, %v10559_v60  ;;  %v2048_v14 = vadd.f32 %v10448_v43, %v10559_v60 }
 0x1b0   : > { %v9633_v34 = vpop.eup %9632  ;;  %9658 = vtanh.f32 %v2032_v57  ;;  %v2311_v19 = vpop.f32.mrf.mxu0 }
 0x1b1   : > { %v9635_v30 = vpop.eup %9634  ;;  %v10742_v4 = vadd.f32 %v9633_v34, %v9631_v13  ;;  %9660 = vtanh.f32 %v2320_v37  ;;  %v2312_v40 = vadd.f32 %v10559_v60, %v2311_v19  ;;  %v2040_v37 = vadd.f32 %v10559_v60, %v10452_v46 }
 0x1b2   : > { %v9637_v35 = vpop.eup %9636  ;;  %9662 = vtanh.f32 %v2024_v31  ;;  %v8694_v11 = vpop.f32.mrf.mxu0  ;;  %8789 = vmatmul.mubr.msk.bf16.gmra.mxu0 %vm1441_vm0, %v9446_v18 }
 0x1b3   : > { %v9639_v36 = vpop.eup %9638  ;;  %v10748_v57 = vadd.f32 %v9637_v35, %v9635_v30  ;;  %9664 = vtanh.f32 %v2312_v40  ;;  %v2333_v41 = vadd.f32 %v8694_v11, %v10559_v60  ;;  %8792 = vmatprep.mubr.msk.bf16.mxu0 %vm1441_vm0, %v9447_v24  ;;  %v9448_v24 = vld [vmem:[%s10238_s29 + $0x338] sm:$0xff]   ;;  %v9449_v30 = vld [vmem:[%s10238_s29 + $0x340] sm:$0xff]   ;;  %v2061_v35 = vadd.f32 %v10454_v47, %v10559_v60 }
 0x1b4   : > { %v9641_v12 = vpop.eup %9640  ;;  %9666 = vtanh.f32 %v2045_v29  ;;  %v2324_v31 = vpop.f32.mrf.mxu0 }
 0x1b5   : > { %v9643_v42 = vpop.eup %9642  ;;  %9668 = vtanh.f32 %v2333_v41  ;;  %v2325_v39 = vadd.f32 %v10559_v60, %v2324_v31  ;;  %v10755_v18 = vadd.f32 %v9641_v12, %v9639_v36  ;;  %v2053_v12 = vadd.f32 %v10559_v60, %v10458_v48 }
 0x1b6   : > { %v9645_v13 = vpop.eup %9644  ;;  %9670 = vtanh.f32 %v2037_v9  ;;  %v8695_v34 = vpop.f32.mrf.mxu0 }
 0x1b7   : > { %v9647_v19 = vpop.eup %9646  ;;  %v10760_v29 = vadd.f32 %v9645_v13, %v9643_v42  ;;  %9672 = vtanh.f32 %v2325_v39  ;;  %v2336_v43 = vadd.f32 %v8695_v34, %v10559_v60  ;;  %v2064_v13 = vadd.f32 %v10460_v49, %v10559_v60 }
 0x1b8   : > { %v9649_v40 = vpop.eup %9648  ;;  %9674 = vtanh.f32 %v2048_v14  ;;  %v2327_v11 = vpop.f32.mrf.mxu0 }
 0x1b9   : > { %v9651_v36 = vpop.eup %9650  ;;  %9676 = vtanh.f32 %v2336_v43  ;;  %v2328_v9 = vadd.f32 %v10559_v60, %v2327_v11  ;;  %v10767_v46 = vadd.f32 %v9649_v40, %v9647_v19  ;;  %v2056_v43 = vadd.f32 %v10559_v60, %v10464_v52 }
 0x1ba   : > { %v9653_v41 = vpop.eup %9652  ;;  %9678 = vtanh.f32 %v2040_v37  ;;  %v8698_v31 = vpop.f32.mrf.mxu0  ;;  %8793 = vmatmul.mubr.msk.bf16.gmra.mxu0 %vm1441_vm0, %v9448_v24 }
 0x1bb   : > { %v9655_v42 = vpop.eup %9654  ;;  %v10772_v14 = vadd.f32 %v9653_v41, %v9651_v36  ;;  %9680 = vtanh.f32 %v2328_v9  ;;  %v2349_v47 = vadd.f32 %v8698_v31, %v10559_v60  ;;  %8796 = vmatprep.mubr.msk.bf16.mxu0 %vm1441_vm0, %v9449_v30  ;;  %v9450_v30 = vld [vmem:[%s10238_s29 + $0x348] sm:$0xff]   ;;  %v9451_v36 = vld [vmem:[%s10238_s29 + $0x350] sm:$0xff]   ;;  %v2077_v41 = vadd.f32 %v10466_v53, %v10559_v60 }
 0x1bc   : > { %v9657_v39 = vpop.eup %9656  ;;  %9682 = vtanh.f32 %v2061_v35  ;;  %v2340_v37 = vpop.f32.mrf.mxu0 }
 0x1bd   : > { %v9659_v48 = vpop.eup %9658  ;;  %v10778_v34 = vadd.f32 %v9657_v39, %v9655_v42  ;;  %9684 = vtanh.f32 %v2349_v47  ;;  %v2341_v24 = vadd.f32 %v10559_v60, %v2340_v37  ;;  %v2069_v39 = vadd.f32 %v10559_v60, %v10470_v54 }
 0x1be   : > { %v9661_v19 = vpop.eup %9660  ;;  %9686 = vtanh.f32 %v2053_v12  ;;  %v8699_v40 = vpop.f32.mrf.mxu0 }
 0x1bf   : > { %v9663_v11 = vpop.eup %9662  ;;  %v10784_v35 = vadd.f32 %v9661_v19, %v9659_v48  ;;  %9688 = vtanh.f32 %v2341_v24  ;;  %v2352_v49 = vadd.f32 %v8699_v40, %v10559_v60  ;;  %v2080_v19 = vadd.f32 %v10472_v55, %v10559_v60 }
 0x1c0   : > { %v9665_v9 = vpop.eup %9664  ;;  %9690 = vtanh.f32 %v2064_v13  ;;  %v2343_v31 = vpop.f32.mrf.mxu0 }
 0x1c1   : > { %v9667_v42 = vpop.eup %9666  ;;  %v10790_v12 = vadd.f32 %v9665_v9, %v9663_v11  ;;  %9692 = vtanh.f32 %v2352_v49  ;;  %v2344_v52 = vadd.f32 %v10559_v60, %v2343_v31  ;;  %v2072_v49 = vadd.f32 %v10559_v60, %v10476_v61 }
 0x1c2   : > { %v9669_v47 = vpop.eup %9668  ;;  %9694 = vtanh.f32 %v2056_v43  ;;  %v8702_v37 = vpop.f32.mrf.mxu0  ;;  %8797 = vmatmul.mubr.msk.bf16.gmra.mxu0 %vm1441_vm0, %v9450_v30 }
 0x1c3   : > { %v9671_v48 = vpop.eup %9670  ;;  %v10796_v13 = vadd.f32 %v9669_v47, %v9667_v42  ;;  %9696 = vtanh.f32 %v2344_v52  ;;  %v2365_v53 = vadd.f32 %v8702_v37, %v10559_v60  ;;  %8800 = vmatprep.mubr.msk.bf16.mxu0 %vm1441_vm0, %v9451_v36  ;;  %v9452_v36 = vld [vmem:[%s10238_s29 + $0x358] sm:$0xff]   ;;  %v9453_v42 = vld [vmem:[%s10238_s29 + $0x360] sm:$0xff]   ;;  %v2093_v47 = vadd.f32 %v10478_v2, %v10559_v60 }
 0x1c4   : > { %v9673_v24 = vpop.eup %9672  ;;  %9698 = vtanh.f32 %v2077_v41  ;;  %v2356_v43 = vpop.f32.mrf.mxu0 }
 0x1c5   : > { %v9675_v54 = vpop.eup %9674  ;;  %v10802_v40 = vadd.f32 %v9673_v24, %v9671_v48  ;;  %9700 = vtanh.f32 %v2365_v53  ;;  %v2357_v30 = vadd.f32 %v10559_v60, %v2356_v43  ;;  %v2085_v24 = vadd.f32 %v10559_v60, %v10482_v3 }
 0x1c6   : > { %v9677_v11 = vpop.eup %9676  ;;  %9702 = vtanh.f32 %v2069_v39  ;;  %v8703_v9 = vpop.f32.mrf.mxu0 }
 0x1c7   : > { %v9679_v31 = vpop.eup %9678  ;;  %v10808_v41 = vadd.f32 %v9677_v11, %v9675_v54  ;;  %9704 = vtanh.f32 %v2357_v30  ;;  %v2368_v55 = vadd.f32 %v8703_v9, %v10559_v60  ;;  %v2096_v11 = vadd.f32 %v10484_v8, %v10559_v60 }
 0x1c8   : > { %v9681_v52 = vpop.eup %9680  ;;  %9706 = vtanh.f32 %v2080_v19  ;;  %v2359_v37 = vpop.f32.mrf.mxu0 }
 0x1c9   : > { %v9683_v48 = vpop.eup %9682  ;;  %v10814_v39 = vadd.f32 %v9681_v52, %v9679_v31  ;;  %9708 = vtanh.f32 %v2368_v55  ;;  %v2360_v61 = vadd.f32 %v10559_v60, %v2359_v37  ;;  %v2088_v55 = vadd.f32 %v10559_v60, %v10488_v15 }
 0x1ca   : > { %v9685_v53 = vpop.eup %9684  ;;  %9710 = vtanh.f32 %v2072_v49  ;;  %v8706_v43 = vpop.f32.mrf.mxu0  ;;  %8801 = vmatmul.mubr.msk.bf16.gmra.mxu0 %vm1441_vm0, %v9452_v36 }
 0x1cb   : > { %v9687_v54 = vpop.eup %9686  ;;  %v10820_v19 = vadd.f32 %v9685_v53, %v9683_v48  ;;  %9712 = vtanh.f32 %v2360_v61  ;;  %v2381_v2 = vadd.f32 %v8706_v43, %v10559_v60  ;;  %8804 = vmatprep.mubr.msk.bf16.mxu0 %vm1441_vm0, %v9453_v42  ;;  %v9454_v42 = vld [vmem:[%s10238_s29 + $0x368] sm:$0xff]   ;;  %v9455_v48 = vld [vmem:[%s10238_s29 + $0x370] sm:$0xff]   ;;  %v2109_v53 = vadd.f32 %v10490_v20, %v10559_v60 }
 0x1cc   : > { %v9689_v30 = vpop.eup %9688  ;;  %9714 = vtanh.f32 %v2093_v47  ;;  %v2372_v49 = vpop.f32.mrf.mxu0 }
 0x1cd   : > { %v9691_v3 = vpop.eup %9690  ;;  %9716 = vtanh.f32 %v2381_v2  ;;  %v2373_v9 = vadd.f32 %v10559_v60, %v2372_v49  ;;  %v10827_v36 = vadd.f32 %v9689_v30, %v9687_v54  ;;  %v2101_v30 = vadd.f32 %v10559_v60, %v10494_v21 }
 0x1ce   : > { %v9693_v31 = vpop.eup %9692  ;;  %9718 = vtanh.f32 %v2085_v24  ;;  %v8707_v52 = vpop.f32.mrf.mxu0 }
 0x1cf   : > { %v9695_v37 = vpop.eup %9694  ;;  %v10832_v47 = vadd.f32 %v9693_v31, %v9691_v3  ;;  %9720 = vtanh.f32 %v2373_v9  ;;  %v2384_v8 = vadd.f32 %v8707_v52, %v10559_v60  ;;  %v2112_v31 = vadd.f32 %v10496_v26, %v10559_v60 }
 0x1d0   : > { %v9697_v61 = vpop.eup %9696  ;;  %9722 = vtanh.f32 %v2096_v11  ;;  %v2375_v43 = vpop.f32.mrf.mxu0 }
 0x1d1   : > { %v9699_v54 = vpop.eup %9698  ;;  %9724 = vtanh.f32 %v2384_v8  ;;  %v2376_v24 = vadd.f32 %v10559_v60, %v2375_v43  ;;  %v10839_v15 = vadd.f32 %v9697_v61, %v9695_v37  ;;  %v2104_v8 = vadd.f32 %v10559_v60, %v10500_v33 }
 0x1d2   : > { %v9701_v2 = vpop.eup %9700  ;;  %9726 = vtanh.f32 %v2088_v55  ;;  %v8710_v49 = vpop.f32.mrf.mxu0  ;;  %8805 = vmatmul.mubr.msk.bf16.gmra.mxu0 %vm1441_vm0, %v9454_v42 }
 0x1d3   : > { %v9703_v3 = vpop.eup %9702  ;;  %v10844_v11 = vadd.f32 %v9701_v2, %v9699_v54  ;;  %9728 = vtanh.f32 %v2376_v24  ;;  %v2397_v20 = vadd.f32 %v8710_v49, %v10559_v60  ;;  %8808 = vmatprep.mubr.msk.bf16.mxu0 %vm1441_vm0, %v9455_v48  ;;  %v9456_v48 = vld [vmem:[%s10238_s29 + $0x378] sm:$0xff]   ;;  %v9457_v54 = vld [vmem:[%s10238_s29 + $0x380] sm:$0xff]   ;;  %v2125_v2 = vadd.f32 %v10502_v38, %v10559_v60 }
 0x1d4   : > { %v9705_v9 = vpop.eup %9704  ;;  %9730 = vtanh.f32 %v2109_v53  ;;  %v2388_v55 = vpop.f32.mrf.mxu0 }
 0x1d5   : > { %v9707_v21 = vpop.eup %9706  ;;  %v10850_v52 = vadd.f32 %v9705_v9, %v9703_v3  ;;  %9732 = vtanh.f32 %v2397_v20  ;;  %v2389_v42 = vadd.f32 %v10559_v60, %v2388_v55  ;;  %v12200_v9 = vld [vmem:[#allocation3_spill] sm:$0xff] }
 0x1d6   : > { %v9709_v37 = vpop.eup %9708  ;;  %9734 = vtanh.f32 %v2101_v30  ;;  %v8711_v61 = vpop.f32.mrf.mxu0  ;;  %v2117_v55 = vadd.f32 %v10559_v60, %v12200_v9 }
 0x1d7   : > { %v9711_v43 = vpop.eup %9710  ;;  %v10856_v53 = vadd.f32 %v9709_v37, %v9707_v21  ;;  %9736 = vtanh.f32 %v2389_v42  ;;  %v2400_v26 = vadd.f32 %v8711_v61, %v10559_v60  ;;  %v12202_v61 = vld [vmem:[#allocation4_spill] sm:$0xff] }
 0x1d8   : > { %v9713_v24 = vpop.eup %9712  ;;  %9738 = vtanh.f32 %v2112_v31  ;;  %v2391_v49 = vpop.f32.mrf.mxu0 }
 0x1d9   : > { %v9715_v3 = vpop.eup %9714  ;;  %v10862_v30 = vadd.f32 %v9713_v24, %v9711_v43  ;;  %9740 = vtanh.f32 %v2400_v26  ;;  %v2392_v33 = vadd.f32 %v10559_v60, %v2391_v49 }
 0x1da   : > { %v9717_v20 = vpop.eup %9716  ;;  %9742 = vtanh.f32 %v2104_v8  ;;  %v8714_v21 = vpop.f32.mrf.mxu0  ;;  %8809 = vmatmul.mubr.msk.bf16.gmra.mxu0 %vm1441_vm0, %v9456_v48  ;;  %v2128_v8 = vadd.f32 %v12202_v61, %v10559_v60  ;;  %v9459_v61 = vld [vmem:[%s10238_s29 + $0x390] sm:$0xff]  }
 0x1db   : > { %v9719_v42 = vpop.eup %9718  ;;  %v10868_v31 = vadd.f32 %v9717_v20, %v9715_v3  ;;  %9744 = vtanh.f32 %v2392_v33  ;;  %v2413_v38 = vadd.f32 %v8714_v21, %v10559_v60  ;;  %8812 = vmatprep.mubr.msk.bf16.mxu0 %vm1441_vm0, %v9457_v54  ;;  %v12204_v3 = vld [vmem:[#allocation5_spill] sm:$0xff]  ;;  %v9458_v54 = vld [vmem:[%s10238_s29 + $0x388] sm:$0xff]  }
 0x1dc   : > { %v9721_v37 = vpop.eup %9720  ;;  %9746 = vtanh.f32 %v2125_v2  ;;  %v2404_v43 = vpop.f32.mrf.mxu0  ;;  %v2120_v33 = vadd.f32 %v10559_v60, %v12204_v3 }
 0x1dd   : > { %12201 = vst [vmem:[#allocation3_spill] sm:$0xff] %v10868_v31  ;;  %v9723_v26 = vpop.eup %9722  ;;  %v10874_v24 = vadd.f32 %v9721_v37, %v9719_v42  ;;  %9748 = vtanh.f32 %v2413_v38  ;;  %v2405_v48 = vadd.f32 %v10559_v60, %v2404_v43  ;;  %v12206_v42 = vld [vmem:[#allocation6_spill] sm:$0xff] }
 0x1de   : > { %v9725_v49 = vpop.eup %9724  ;;  %9750 = vtanh.f32 %v2117_v55  ;;  %v8715_v20 = vpop.f32.mrf.mxu0  ;;  %v2141_v38 = vadd.f32 %v12206_v42, %v10559_v60 }
 0x1df   : > { %12203 = vst [vmem:[#allocation4_spill] sm:$0xff] %v10874_v24  ;;  %v9727_v9 = vpop.eup %9726  ;;  %v10880_v2 = vadd.f32 %v9725_v49, %v9723_v26  ;;  %9752 = vtanh.f32 %v2405_v48  ;;  %v2416_v21 = vadd.f32 %v8715_v20, %v10559_v60  ;;  %v12208_v26 = vld [vmem:[#allocation7_spill] sm:$0xff] }
 0x1e0   : > { %v9729_v31 = vpop.eup %9728  ;;  %9754 = vtanh.f32 %v2128_v8  ;;  %v2407_v37 = vpop.f32.mrf.mxu0  ;;  %v2133_v48 = vadd.f32 %v10559_v60, %v12208_v26 }
 0x1e1   : > { %12205 = vst [vmem:[#allocation5_spill] sm:$0xff] %v10880_v2  ;;  %v9731_v43 = vpop.eup %9730  ;;  %v10886_v55 = vadd.f32 %v9729_v31, %v9727_v9  ;;  %9756 = vtanh.f32 %v2416_v21  ;;  %v2408_v3 = vadd.f32 %v10559_v60, %v2407_v37  ;;  %v12210_v9 = vld [vmem:[#allocation8_spill] sm:$0xff] }
 0x1e2   : > { %v9733_v24 = vpop.eup %9732  ;;  %9758 = vtanh.f32 %v2120_v33  ;;  %v8718_v49 = vpop.f32.mrf.mxu0  ;;  %8813 = vmatmul.mubr.msk.bf16.gmra.mxu0 %vm1441_vm0, %v9458_v54  ;;  %v2144_v33 = vadd.f32 %v12210_v9, %v10559_v60 }
 0x1e3   : > { %12207 = vst [vmem:[#allocation6_spill] sm:$0xff] %v10886_v55  ;;  %v9735_v20 = vpop.eup %9734  ;;  %v10892_v8 = vadd.f32 %v9733_v24, %v9731_v43  ;;  %9760 = vtanh.f32 %v2408_v3  ;;  %v2429_v42 = vadd.f32 %v8718_v49, %v10559_v60  ;;  %8816 = vmatprep.mubr.msk.bf16.mxu0 %vm1441_vm0, %v9459_v61  ;;  %v12212_v43 = vld [vmem:[#allocation9_spill] sm:$0xff]  ;;  %v9461_v55 = vld [vmem:[%s10238_s29 + $0x3a0] sm:$0xff]  }
 0x1e4   : > { %v9737_v31 = vpop.eup %9736  ;;  %9762 = vtanh.f32 %v2141_v38  ;;  %v2420_v21 = vpop.f32.mrf.mxu0  ;;  %v2136_v3 = vadd.f32 %v10559_v60, %v12212_v43  ;;  %v9460_v61 = vld [vmem:[%s10238_s29 + $0x398] sm:$0xff]  }
 0x1e5   : > { %12209 = vst [vmem:[#allocation7_spill] sm:$0xff] %v10892_v8  ;;  %v9739_v37 = vpop.eup %9738  ;;  %9764 = vtanh.f32 %v2429_v42  ;;  %v2421_v54 = vadd.f32 %v10559_v60, %v2420_v21  ;;  %v10899_v26 = vadd.f32 %v9737_v31, %v9735_v20  ;;  %v10911_v20 = vld [vmem:[%s12171_s2] ss:$0 sm:$0xff] }
 0x1e6   : > { %v9741_v24 = vpop.eup %9740  ;;  %9766 = vtanh.f32 %v2133_v48  ;;  %v8719_v49 = vpop.f32.mrf.mxu0  ;;  %v12214_v48 = vld [vmem:[#allocation10_spill] sm:$0xff] }
 0x1e7   : > { %12211 = vst [vmem:[#allocation8_spill] sm:$0xff] %v10899_v26  ;;  %v9743_v8 = vpop.eup %9742  ;;  %v10904_v38 = vadd.f32 %v9741_v24, %v9739_v37  ;;  %9768 = vtanh.f32 %v2421_v54  ;;  %v2432_v9 = vadd.f32 %v8719_v49, %v10559_v60  ;;  %v2157_v42 = vadd.f32 %v10911_v20, %v12214_v48  ;;  %v12216_v60 = vld [vmem:[#allocation11_spill] sm:$0xff] }
 0x1e8   : > { %v9745_v2 = vpop.eup %9744  ;;  %9770 = vtanh.f32 %v2144_v33  ;;  %v2423_v31 = vpop.f32.mrf.mxu0  ;;  %v2149_v33 = vadd.f32 %v10911_v20, %v12216_v60 }
 0x1e9   : > { %12213 = vst [vmem:[#allocation9_spill] sm:$0xff] %v10904_v38  ;;  %v9747_v21 = vpop.eup %9746  ;;  %9772 = vtanh.f32 %v2432_v9  ;;  %v2424_v37 = vadd.f32 %v10911_v20, %v2423_v31  ;;  %v10916_v24 = vadd.f32 %v9745_v2, %v9743_v8  ;;  %v12218_v2 = vld [vmem:[#allocation12_spill] sm:$0xff] }
 0x1ea   : > { %v9749_v54 = vpop.eup %9748  ;;  %9774 = vtanh.f32 %v2136_v3  ;;  %v8722_v43 = vpop.f32.mrf.mxu0  ;;  %8817 = vmatmul.mubr.msk.bf16.gmra.mxu0 %vm1441_vm0, %v9460_v61  ;;  %v2160_v8 = vadd.f32 %v10911_v20, %v12218_v2 }
 0x1eb   : > { %12215 = vst [vmem:[#allocation10_spill] sm:$0xff] %v10916_v24  ;;  %v9751_v49 = vpop.eup %9750  ;;  %v10921_v38 = vadd.f32 %v9749_v54, %v9747_v21  ;;  %9776 = vtanh.f32 %v2424_v37  ;;  %v2445_v48 = vadd.f32 %v10911_v20, %v8722_v43  ;;  %8820 = vmatprep.mubr.msk.bf16.mxu0 %vm1441_vm0, %v9461_v55  ;;  %v12220_v37 = vld [vmem:[#allocation13_spill] sm:$0xff]  ;;  %v9462_v55 = vld [vmem:[%s10238_s29 + $0x3a8] sm:$0xff]  }
 0x1ec   : > { %v9753_v9 = vpop.eup %9752  ;;  %9778 = vtanh.f32 %v2157_v42  ;;  %v2436_v3 = vpop.f32.mrf.mxu0  ;;  %v2152_v54 = vadd.f32 %v10911_v20, %v12220_v37  ;;  %v9463_v24 = vld [vmem:[%s10238_s29 + $0x3b0] sm:$0xff]  }
 0x1ed   : > { %12217 = vst [vmem:[#allocation11_spill] sm:$0xff] %v10921_v38  ;;  %v9755_v31 = vpop.eup %9754  ;;  %v10927_v60 = vadd.f32 %v9753_v9, %v9751_v49  ;;  %9780 = vtanh.f32 %v2445_v48  ;;  %v2437_v61 = vadd.f32 %v10911_v20, %v2436_v3  ;;  %v12222_v49 = vld [vmem:[#allocation14_spill] sm:$0xff] }
 0x1ee   : > { %v9757_v21 = vpop.eup %9756  ;;  %9782 = vtanh.f32 %v2149_v33  ;;  %v8723_v43 = vpop.f32.mrf.mxu0  ;;  %v2173_v48 = vadd.f32 %v10911_v20, %v12222_v49 }
 0x1ef   : > { %12219 = vst [vmem:[#allocation12_spill] sm:$0xff] %v10927_v60  ;;  %v9759_v38 = vpop.eup %9758  ;;  %v10933_v42 = vadd.f32 %v9757_v21, %v9755_v31  ;;  %9784 = vtanh.f32 %v2437_v61  ;;  %v2448_v2 = vadd.f32 %v10911_v20, %v8723_v43  ;;  %v12224_v31 = vld [vmem:[#allocation15_spill] sm:$0xff] }
 0x1f0   : > { %v9761_v26 = vpop.eup %9760  ;;  %9786 = vtanh.f32 %v2160_v8  ;;  %v2439_v9 = vpop.f32.mrf.mxu0  ;;  %v2165_v61 = vadd.f32 %v10911_v20, %v12224_v31 }
 0x1f1   : > { %12221 = vst [vmem:[#allocation13_spill] sm:$0xff] %v10933_v42  ;;  %v9763_v3 = vpop.eup %9762  ;;  %v10939_v33 = vadd.f32 %v9761_v26, %v9759_v38  ;;  %9788 = vtanh.f32 %v2448_v2  ;;  %v2440_v37 = vadd.f32 %v10911_v20, %v2439_v9  ;;  %v12226_v38 = vld [vmem:[#allocation16_spill] sm:$0xff] }
 0x1f2   : > { %v9765_v60 = vpop.eup %9764  ;;  %9790 = vtanh.f32 %v2152_v54  ;;  %v8726_v21 = vpop.f32.mrf.mxu0  ;;  %8821 = vmatmul.mubr.msk.bf16.gmra.mxu0 %vm1441_vm0, %v9462_v55  ;;  %v2176_v54 = vadd.f32 %v10911_v20, %v12226_v38 }
 0x1f3   : > { %12223 = vst [vmem:[#allocation14_spill] sm:$0xff] %v10939_v33  ;;  %v9767_v43 = vpop.eup %9766  ;;  %v10945_v8 = vadd.f32 %v9765_v60, %v9763_v3  ;;  %9792 = vtanh.f32 %v2440_v37  ;;  %v2461_v49 = vadd.f32 %v10911_v20, %v8726_v21  ;;  %8824 = vmatprep.mubr.msk.bf16.mxu0 %vm1441_vm0, %v9463_v24  ;;  %v12228_v3 = vld [vmem:[#allocation17_spill] sm:$0xff]  ;;  %v9465_v33 = vld [vmem:[%s10238_s29 + $0x3c0] sm:$0xff]  }
 0x1f4   : > { %v9769_v26 = vpop.eup %9768  ;;  %9794 = vtanh.f32 %v2173_v48  ;;  %v2452_v2 = vpop.f32.mrf.mxu0  ;;  %v2168_v37 = vadd.f32 %v10911_v20, %v12228_v3  ;;  %v9464_v24 = vld [vmem:[%s10238_s29 + $0x3b8] sm:$0xff]  }
 0x1f5   : > { %12225 = vst [vmem:[#allocation15_spill] sm:$0xff] %v10945_v8  ;;  %v9771_v9 = vpop.eup %9770  ;;  %v10951_v31 = vadd.f32 %v9769_v26, %v9767_v43  ;;  %9796 = vtanh.f32 %v2461_v49  ;;  %v2453_v60 = vadd.f32 %v10911_v20, %v2452_v2  ;;  %v12230_v43 = vld [vmem:[#allocation18_spill] sm:$0xff] }
 0x1f6   : > { %v9773_v55 = vpop.eup %9772  ;;  %9798 = vtanh.f32 %v2165_v61  ;;  %v8727_v21 = vpop.f32.mrf.mxu0  ;;  %v2189_v49 = vadd.f32 %v10911_v20, %v12230_v43 }
 0x1f7   : > { %12227 = vst [vmem:[#allocation16_spill] sm:$0xff] %v10951_v31  ;;  %v9775_v8 = vpop.eup %9774  ;;  %v10957_v48 = vadd.f32 %v9773_v55, %v9771_v9  ;;  %9800 = vtanh.f32 %v2453_v60  ;;  %v2464_v38 = vadd.f32 %v10911_v20, %v8727_v21  ;;  %v12232_v9 = vld [vmem:[#allocation19_spill] sm:$0xff] }
 0x1f8   : > { %v9777_v42 = vpop.eup %9776  ;;  %9802 = vtanh.f32 %v2176_v54  ;;  %v2455_v26 = vpop.f32.mrf.mxu0  ;;  %v2181_v60 = vadd.f32 %v10911_v20, %v12232_v9 }
 0x1f9   : > { %12229 = vst [vmem:[#allocation17_spill] sm:$0xff] %v10957_v48  ;;  %v9779_v2 = vpop.eup %9778  ;;  %v10963_v61 = vadd.f32 %v9777_v42, %v9775_v8  ;;  %9804 = vtanh.f32 %v2464_v38  ;;  %v2456_v3 = vadd.f32 %v10911_v20, %v2455_v26  ;;  %v12234_v8 = vld [vmem:[#allocation20_spill] sm:$0xff] }
 0x1fa   : > { %v9781_v31 = vpop.eup %9780  ;;  %9806 = vtanh.f32 %v2168_v37  ;;  %v8730_v55 = vpop.f32.mrf.mxu0  ;;  %8825 = vmatmul.mubr.msk.bf16.gmra.mxu0 %vm1441_vm0, %v9464_v24  ;;  %v2192_v37 = vadd.f32 %v10911_v20, %v12234_v8 }
 0x1fb   : > { %12231 = vst [vmem:[#allocation18_spill] sm:$0xff] %v10963_v61  ;;  %v9783_v21 = vpop.eup %9782  ;;  %v10969_v54 = vadd.f32 %v9781_v31, %v9779_v2  ;;  %9808 = vtanh.f32 %v2456_v3  ;;  %v2477_v43 = vadd.f32 %v10911_v20, %v8730_v55  ;;  %8828 = vmatprep.mubr.msk.bf16.mxu0 %vm1441_vm0, %v9465_v33  ;;  %v12235_v2 = vld [vmem:[#allocation21_spill] sm:$0xff]  ;;  %v9466_v33 = vld [vmem:[%s10238_s29 + $0x3c8] sm:$0xff]  }
 0x1fc   : > { %v9785_v42 = vpop.eup %9784  ;;  %9810 = vtanh.f32 %v2189_v49  ;;  %v2468_v38 = vpop.f32.mrf.mxu0  ;;  %v2184_v3 = vadd.f32 %v10911_v20, %v12235_v2  ;;  %v9467_v61 = vld [vmem:[%s10238_s29 + $0x3d0] sm:$0xff]  }
 0x1fd   : > { %12233 = vst [vmem:[#allocation19_spill] sm:$0xff] %v10969_v54  ;;  %v9787_v26 = vpop.eup %9786  ;;  %9812 = vtanh.f32 %v2477_v43  ;;  %v2469_v24 = vadd.f32 %v10911_v20, %v2468_v38  ;;  %v10976_v9 = vadd.f32 %v9785_v42, %v9783_v21 }
 0x1fe   : > { %v9789_v31 = vpop.eup %9788  ;;  %9814 = vtanh.f32 %v2181_v60  ;;  %v8731_v55 = vpop.f32.mrf.mxu0 }
 0x1ff   : > { %v9791_v54 = vpop.eup %9790  ;;  %v10981_v49 = vadd.f32 %v9789_v31, %v9787_v26  ;;  %9816 = vtanh.f32 %v2469_v24  ;;  %v2480_v8 = vadd.f32 %v10911_v20, %v8731_v55 }
 0x200   : > { %v9793_v48 = vpop.eup %9792  ;;  %9818 = vtanh.f32 %v2192_v37  ;;  %v2471_v43 = vpop.f32.mrf.mxu0 }
 0x201   : > { %12236 = vst [vmem:[#allocation20_spill] sm:$0xff] %v10981_v49  ;;  %v9795_v38 = vpop.eup %9794  ;;  %9820 = vtanh.f32 %v2480_v8  ;;  %v2472_v21 = vadd.f32 %v10911_v20, %v2471_v43  ;;  %v10986_v60 = vadd.f32 %v9793_v48, %v9791_v54 }
 0x202   : > { %v9797_v42 = vpop.eup %9796  ;;  %9822 = vtanh.f32 %v2184_v3  ;;  %v8734_v2 = vpop.f32.mrf.mxu0  ;;  %8829 = vmatmul.mubr.msk.bf16.gmra.mxu0 %vm1441_vm0, %v9466_v33  ;;  %v9468_v33 = vld [vmem:[%s10238_s29 + $0x3d8] sm:$0xff]  }
 0x203   : > { %12237 = vst [vmem:[#allocation21_spill] sm:$0xff] %v10986_v60  ;;  %v9799_v26 = vpop.eup %9798  ;;  %v10989_v24 = vadd.f32 %v9797_v42, %v9795_v38  ;;  %9824 = vtanh.f32 %v2472_v21  ;;  %v2493_v37 = vadd.f32 %v10911_v20, %v8734_v2  ;;  %8832 = vmatprep.mubr.msk.bf16.mxu0 %vm1441_vm0, %v9467_v61  ;;  %v9469_v42 = vld [vmem:[%s10238_s29 + $0x3e0] sm:$0xff]  }
 0x204   : > { %v9801_v31 = vpop.eup %9800  ;;  %v2484_v55 = vpop.f32.mrf.mxu0 }
 0x205   : > { %12238 = vst [vmem:[#allocation22_spill] sm:$0xff] %v10989_v24  ;;  %v9803_v8 = vpop.eup %9802  ;;  %v10993_v48 = vadd.f32 %v9801_v31, %v9799_v26  ;;  %9826 = vtanh.f32 %v2493_v37  ;;  %v2485_v54 = vadd.f32 %v10911_v20, %v2484_v55 }
 0x206   : > { %v9805_v3 = vpop.eup %9804  ;;  %v8735_v43 = vpop.f32.mrf.mxu0 }
 0x207   : > { %v9807_v60 = vpop.eup %9806  ;;  %v10997_v38 = vadd.f32 %v9805_v3, %v9803_v8  ;;  %9828 = vtanh.f32 %v2485_v54  ;;  %v2496_v21 = vadd.f32 %v10911_v20, %v8735_v43 }
 0x208   : > { %v9809_v2 = vpop.eup %9808  ;;  %v2487_v61 = vpop.f32.mrf.mxu0 }
 0x209   : > { %12239 = vst [vmem:[#allocation23_spill] sm:$0xff] %v10997_v38  ;;  %v9811_v24 = vpop.eup %9810  ;;  %v11001_v49 = vadd.f32 %v9809_v2, %v9807_v60  ;;  %9830 = vtanh.f32 %v2496_v21  ;;  %v2488_v26 = vadd.f32 %v10911_v20, %v2487_v61 }
 0x20a   : > { %v9813_v37 = vpop.eup %9812  ;;  %v8738_v31 = vpop.f32.mrf.mxu0  ;;  %8833 = vmatmul.mubr.msk.bf16.gmra.mxu0 %vm1441_vm0, %v9468_v33  ;;  %v9470_v33 = vld [vmem:[%s10238_s29 + $0x3e8] sm:$0xff]  }
 0x20b   : > { %12240 = vst [vmem:[#allocation24_spill] sm:$0xff] %v11001_v49  ;;  %v9815_v55 = vpop.eup %9814  ;;  %v11005_v8 = vadd.f32 %v9813_v37, %v9811_v24  ;;  %9832 = vtanh.f32 %v2488_v26  ;;  %v2509_v54 = vadd.f32 %v10911_v20, %v8738_v31  ;;  %8836 = vmatprep.mubr.msk.bf16.mxu0 %vm1441_vm0, %v9469_v42  ;;  %v9471_v37 = vld [vmem:[%s10238_s29 + $0x3f0] sm:$0xff]  }
 0x20c   : > { %v9817_v3 = vpop.eup %9816  ;;  %v2500_v60 = vpop.f32.mrf.mxu0 }
 0x20d   : > { %12241 = vst [vmem:[#allocation25_spill] sm:$0xff] %v11005_v8  ;;  %v9819_v43 = vpop.eup %9818  ;;  %v11009_v21 = vadd.f32 %v9817_v3, %v9815_v55  ;;  %9834 = vtanh.f32 %v2509_v54  ;;  %v2501_v2 = vadd.f32 %v10911_v20, %v2500_v60 }
 0x20e   : > { %v9821_v61 = vpop.eup %9820  ;;  %v8739_v49 = vpop.f32.mrf.mxu0 }
 0x20f   : > { %v9823_v38 = vpop.eup %9822  ;;  %v11013_v24 = vadd.f32 %v9821_v61, %v9819_v43  ;;  %9836 = vtanh.f32 %v2501_v2  ;;  %v2512_v26 = vadd.f32 %v10911_v20, %v8739_v49 }
 0x210   : > { %v9825_v31 = vpop.eup %9824  ;;  %v2503_v42 = vpop.f32.mrf.mxu0 }
 0x211   : > { %v11017_v8 = vadd.f32 %v9825_v31, %v9823_v38  ;;  %9838 = vtanh.f32 %v2512_v26  ;;  %v2504_v55 = vadd.f32 %v10911_v20, %v2503_v42  ;;  %v9472_v42 = vld [vmem:[%s10238_s29 + $0x3f8] sm:$0xff]  }
 0x212   : > { %v9827_v54 = vpop.eup %9826  ;;  %v8742_v3 = vpop.f32.mrf.mxu0  ;;  %8837 = vmatmul.mubr.msk.bf16.gmra.mxu0 %vm1441_vm0, %v9470_v33 }
 0x213   : > { %9840 = vtanh.f32 %v2504_v55  ;;  %v2525_v60 = vadd.f32 %v10911_v20, %v8742_v3  ;;  %8840 = vmatprep.mubr.msk.bf16.mxu0 %vm1441_vm0, %v9471_v37  ;;  %v11024_v49 = vadd.f32 %v9827_v54, %v10606_v5  ;;  %v9473_v55 = vld [vmem:[%s10238_s29 + $0x400] sm:$0xff]  }
 0x214   : > { %v9829_v43 = vpop.eup %9828  ;;  %v2516_v38 = vpop.f32.mrf.mxu0 }
 0x215   : > { %9842 = vtanh.f32 %v2525_v60  ;;  %v2517_v2 = vadd.f32 %v10911_v20, %v2516_v38  ;;  %v11028_v61 = vadd.f32 %v9829_v43, %v10611_v0 }
 0x216   : > { %v9831_v26 = vpop.eup %9830  ;;  %v8743_v31 = vpop.f32.mrf.mxu0 }
 0x217   : > { %9844 = vtanh.f32 %v2517_v2  ;;  %v2528_v33 = vadd.f32 %v10911_v20, %v8743_v31  ;;  %v11034_v37 = vadd.f32 %v9831_v26, %v10618_v7 }
 0x218   : > { %v9833_v5 = vpop.eup %9832  ;;  %v2519_v54 = vpop.f32.mrf.mxu0 }
 0x219   : > { %9846 = vtanh.f32 %v2528_v33  ;;  %v2520_v3 = vadd.f32 %v10911_v20, %v2519_v54  ;;  %v11038_v60 = vadd.f32 %v9833_v5, %v10623_v10 }
 0x21a   : > { %v9835_v0 = vpop.eup %9834  ;;  %v8746_v43 = vpop.f32.mrf.mxu0  ;;  %8841 = vmatmul.mubr.msk.bf16.gmra.mxu0 %vm1441_vm0, %v9472_v42  ;;  %v9474_v42 = vld [vmem:[%s10238_s29 + $0x408] sm:$0xff]  }
 0x21b   : > { %v11042_v38 = vadd.f32 %v9835_v0, %v10628_v63  ;;  %9848 = vtanh.f32 %v2520_v3  ;;  %v2541_v7 = vadd.f32 %v10911_v20, %v8746_v43  ;;  %8844 = vmatprep.mubr.msk.bf16.mxu0 %vm1441_vm0, %v9473_v55  ;;  %v9475_v3 = vld [vmem:[%s10238_s29 + $0x410] sm:$0xff]  }
 0x21c   : > { %v9837_v2 = vpop.eup %9836  ;;  %v2532_v26 = vpop.f32.mrf.mxu0 }
 0x21d   : > { %9850 = vtanh.f32 %v2541_v7  ;;  %v2533_v31 = vadd.f32 %v10911_v20, %v2532_v26  ;;  %v11048_v10 = vadd.f32 %v9837_v2, %v10635_v58 }
 0x21e   : > { %v9839_v33 = vpop.eup %9838  ;;  %v8747_v5 = vpop.f32.mrf.mxu0 }
 0x21f   : > { %v11052_v54 = vadd.f32 %v9839_v33, %v10640_v32  ;;  %9852 = vtanh.f32 %v2533_v31  ;;  %v2544_v63 = vadd.f32 %v10911_v20, %v8747_v5 }
 0x220   : > { %v9841_v0 = vpop.eup %9840  ;;  %v2535_v55 = vpop.f32.mrf.mxu0 }
 0x221   : > { %9854 = vtanh.f32 %v2544_v63  ;;  %v2536_v43 = vadd.f32 %v10911_v20, %v2535_v55  ;;  %v11058_v7 = vadd.f32 %v9841_v0, %v10647_v16 }
 0x222   : > { %v9843_v58 = vpop.eup %9842  ;;  %v8750_v2 = vpop.f32.mrf.mxu0  ;;  %8845 = vmatmul.mubr.msk.bf16.gmra.mxu0 %vm1441_vm0, %v9474_v42  ;;  %v9476_v42 = vld [vmem:[%s10238_s29 + $0x418] sm:$0xff]  }
 0x223   : > { %v11062_v32 = vadd.f32 %v9843_v58, %v10652_v56  ;;  %9856 = vtanh.f32 %v2536_v43  ;;  %v2557_v26 = vadd.f32 %v10911_v20, %v8750_v2  ;;  %8848 = vmatprep.mubr.msk.bf16.mxu0 %vm1441_vm0, %v9475_v3  ;;  %v9477_v43 = vld [vmem:[%s10238_s29 + $0x420] sm:$0xff]  }
 0x224   : > { %v9845_v31 = vpop.eup %9844  ;;  %v2548_v33 = vpop.f32.mrf.mxu0 }
 0x225   : > { %v11067_v5 = vadd.f32 %v9845_v31, %v10658_v44  ;;  %9858 = vtanh.f32 %v2557_v26  ;;  %v2549_v16 = vadd.f32 %v10911_v20, %v2548_v33 }
 0x226   : > { %v9847_v63 = vpop.eup %9846  ;;  %v8751_v0 = vpop.f32.mrf.mxu0 }
 0x227   : > { %v11072_v55 = vadd.f32 %v9847_v63, %v10664_v62  ;;  %9860 = vtanh.f32 %v2549_v16  ;;  %v2560_v56 = vadd.f32 %v10911_v20, %v8751_v0 }
 0x228   : > { %v9849_v58 = vpop.eup %9848  ;;  %v2551_v3 = vpop.f32.mrf.mxu0 }
 0x229   : > { %v11077_v2 = vadd.f32 %v9849_v58, %v10670_v50  ;;  %9862 = vtanh.f32 %v2560_v56  ;;  %v2552_v44 = vadd.f32 %v10911_v20, %v2551_v3  ;;  %v9478_v3 = vld [vmem:[%s10238_s29 + $0x428] sm:$0xff]  }
 0x22a   : > { %v9851_v26 = vpop.eup %9850  ;;  %v8754_v31 = vpop.f32.mrf.mxu0  ;;  %8849 = vmatmul.mubr.msk.bf16.gmra.mxu0 %vm1441_vm0, %v9476_v42 }
 0x22b   : > { %9864 = vtanh.f32 %v2552_v44  ;;  %v2573_v62 = vadd.f32 %v10911_v20, %v8754_v31  ;;  %8852 = vmatprep.mubr.msk.bf16.mxu0 %vm1441_vm0, %v9477_v43  ;;  %v11084_v33 = vadd.f32 %v9851_v26, %v10678_v27  ;;  %v9479_v44 = vld [vmem:[%s10238_s29 + $0x430] sm:$0xff]  }
 0x22c   : > { %v9853_v16 = vpop.eup %9852  ;;  %v2564_v50 = vpop.f32.mrf.mxu0 }
 0x22d   : > { %9866 = vtanh.f32 %v2573_v62  ;;  %v2565_v63 = vadd.f32 %v10911_v20, %v2564_v50  ;;  %v11088_v0 = vadd.f32 %v9853_v16, %v10683_v51  ;;  %v11100_v51 = vld [vmem:[%s12172_s3 + $0x8] sm:$0xff]  }
 0x22e   : > { %v9855_v56 = vpop.eup %9854  ;;  %v8755_v58 = vpop.f32.mrf.mxu0  ;;  %8876 = vmatprep.subr.bf16.mxu1 %v11100_v51 }
 0x22f   : > { %9868 = vtanh.f32 %v2565_v63  ;;  %v2576_v42 = vadd.f32 %v10911_v20, %v8755_v58  ;;  %v11094_v43 = vadd.f32 %v9855_v56, %v10690_v25  ;;  %8877 = vmatpush3.bf16.msra.mxu1 %v11100_v51 }
 0x230   : > { %v9857_v27 = vpop.eup %9856  ;;  %v2567_v26 = vpop.f32.mrf.mxu0 }
 0x231   : > { %9870 = vtanh.f32 %v2576_v42  ;;  %v2568_v31 = vadd.f32 %v10911_v20, %v2567_v26  ;;  %v11103_v62 = vadd.f32 %v9857_v27, %v10695_v28  ;;  %v9480_v27 = vld [vmem:[%s10238_s29 + $0x438] sm:$0xff]  }
 0x232   : > { %v9859_v16 = vpop.eup %9858  ;;  %v8758_v50 = vpop.f32.mrf.mxu0  ;;  %8853 = vmatmul.mubr.msk.bf16.gmra.mxu0 %vm1441_vm0, %v9478_v3 }
 0x233   : > { %v11107_v25 = vadd.f32 %v9859_v16, %v10700_v59  ;;  %9872 = vtanh.f32 %v2568_v31  ;;  %v2589_v63 = vadd.f32 %v10911_v20, %v8758_v50  ;;  %8856 = vmatprep.mubr.msk.bf16.mxu0 %vm1441_vm0, %v9479_v44  ;;  %v9481_v31 = vld [vmem:[%s10238_s29 + $0x440] sm:$0xff]  }
 0x234   : > { %v9861_v56 = vpop.eup %9860  ;;  %v2580_v58 = vpop.f32.mrf.mxu0 }
 0x235   : > { %12242 = vst [vmem:[#allocation26_spill] sm:$0xff] %v11107_v25  ;;  %v11114_v28 = vadd.f32 %v9861_v56, %v10706_v6  ;;  %9874 = vtanh.f32 %v2589_v63  ;;  %v2581_v3 = vadd.f32 %v10911_v20, %v2580_v58  ;;  %v11130_v63 = vld [vmem:[%s12172_s3] sm:$0xff]  }
 0x236   : > { %v9863_v59 = vpop.eup %9862  ;;  %v8759_v42 = vpop.f32.mrf.mxu0  ;;  %8882 = vmatprep.subr.bf16.mxu1 %v11130_v63 }
 0x237   : > { %v11119_v26 = vadd.f32 %v9863_v59, %v10712_v17  ;;  %9876 = vtanh.f32 %v2581_v3  ;;  %v2592_v44 = vadd.f32 %v10911_v20, %v8759_v42 }
 0x238   : > { %v9865_v16 = vpop.eup %9864  ;;  %v2583_v50 = vpop.f32.mrf.mxu0 }
 0x239   : > { %v11124_v25 = vadd.f32 %v9865_v16, %v10718_v1  ;;  %9878 = vtanh.f32 %v2592_v44  ;;  %v2584_v6 = vadd.f32 %v10911_v20, %v2583_v50 }
 0x23a   : > { %v9867_v17 = vpop.eup %9866  ;;  %v8762_v56 = vpop.f32.mrf.mxu0  ;;  %8857 = vmatmul.mubr.msk.bf16.gmra.mxu0 %vm1441_vm0, %v9480_v27 }
 0x23b   : > { %v11134_v58 = vadd.f32 %v9867_v17, %v10724_v45  ;;  %9880 = vtanh.f32 %v2584_v6  ;;  %v2605_v1 = vadd.f32 %v10911_v20, %v8762_v56  ;;  %8860 = vmatprep.mubr.msk.bf16.mxu0 %vm1441_vm0, %v9481_v31  ;;  %v9482_v45 = vld [vmem:[%s10238_s29 + $0x448] sm:$0xff]   ;;  %v9483_v31 = vld [vmem:[%s10238_s29 + $0x450] sm:$0xff]  }
 0x23c   : > { %v9869_v3 = vpop.eup %9868  ;;  %v2596_v59 = vpop.f32.mrf.mxu0 }
 0x23d   : > { %12243 = vst [vmem:[#allocation27_spill] sm:$0xff] %v11134_v58  ;;  %v11140_v42 = vadd.f32 %v9869_v3, %v10730_v22  ;;  %9882 = vtanh.f32 %v2605_v1  ;;  %v2597_v44 = vadd.f32 %v10911_v20, %v2596_v59 }
 0x23e   : > { %v9871_v27 = vpop.eup %9870  ;;  %v8763_v16 = vpop.f32.mrf.mxu0 }
 0x23f   : > { %v11145_v50 = vadd.f32 %v9871_v27, %v10736_v23  ;;  %9884 = vtanh.f32 %v2597_v44  ;;  %v2608_v6 = vadd.f32 %v10911_v20, %v8763_v16 }
 0x240   : > { %v9873_v17 = vpop.eup %9872  ;;  %v2599_v56 = vpop.f32.mrf.mxu0 }
 0x241   : > { %v11150_v58 = vadd.f32 %v9873_v17, %v10742_v4  ;;  %9886 = vtanh.f32 %v2608_v6  ;;  %v2600_v22 = vadd.f32 %v10911_v20, %v2599_v56 }
 0x242   : > { %v9875_v1 = vpop.eup %9874  ;;  %v8766_v3 = vpop.f32.mrf.mxu0  ;;  %8861 = vmatmul.mubr.msk.bf16.gmra.mxu0 %vm1441_vm0, %v9482_v45  ;;  %v9484_v45 = vld [vmem:[%s10238_s29 + $0x458] sm:$0xff]  }
 0x243   : > { %v11155_v23 = vadd.f32 %v9875_v1, %v10748_v57  ;;  %9888 = vtanh.f32 %v2600_v22  ;;  %v2621_v59 = vadd.f32 %v10911_v20, %v8766_v3  ;;  %8864 = vmatprep.mubr.msk.bf16.mxu0 %vm1441_vm0, %v9483_v31  ;;  %v9485_v22 = vld [vmem:[%s10238_s29 + $0x460] sm:$0xff]  }
 0x244   : > { %v9877_v44 = vpop.eup %9876  ;;  %v2612_v4 = vpop.f32.mrf.mxu0 }
 0x245   : > { %9890 = vtanh.f32 %v2621_v59  ;;  %v2613_v27 = vadd.f32 %v10911_v20, %v2612_v4  ;;  %v11161_v16 = vadd.f32 %v9877_v44, %v10755_v18 }
 0x246   : > { %v9879_v6 = vpop.eup %9878  ;;  %v8767_v17 = vpop.f32.mrf.mxu0 }
 0x247   : > { %v11165_v56 = vadd.f32 %v9879_v6, %v10760_v29  ;;  %9892 = vtanh.f32 %v2613_v27  ;;  %v2624_v57 = vadd.f32 %v10911_v20, %v8767_v17 }
 0x248   : > { %v9881_v1 = vpop.eup %9880  ;;  %v2615_v31 = vpop.f32.mrf.mxu0 }
 0x249   : > { %9894 = vtanh.f32 %v2624_v57  ;;  %v2616_v3 = vadd.f32 %v10911_v20, %v2615_v31  ;;  %v11171_v59 = vadd.f32 %v9881_v1, %v10767_v46 }
 0x24a   : > { %v9883_v18 = vpop.eup %9882  ;;  %v8770_v44 = vpop.f32.mrf.mxu0  ;;  %8865 = vmatmul.mubr.msk.bf16.gmra.mxu0 %vm1441_vm0, %v9484_v45  ;;  %v9486_v45 = vld [vmem:[%s10238_s29 + $0x468] sm:$0xff]  }
 0x24b   : > { %v11175_v29 = vadd.f32 %v9883_v18, %v10772_v14  ;;  %9896 = vtanh.f32 %v2616_v3  ;;  %v2637_v4 = vadd.f32 %v10911_v20, %v8770_v44  ;;  %8868 = vmatprep.mubr.msk.bf16.mxu0 %vm1441_vm0, %v9485_v22  ;;  %v9487_v3 = vld [vmem:[%s10238_s29 + $0x470] sm:$0xff]  }
 0x24c   : > { %v9885_v27 = vpop.eup %9884  ;;  %v2628_v6 = vpop.f32.mrf.mxu0 }
 0x24d   : > { %v11180_v17 = vadd.f32 %v9885_v27, %v10778_v34  ;;  %9898 = vtanh.f32 %v2637_v4  ;;  %v2629_v46 = vadd.f32 %v10911_v20, %v2628_v6 }
 0x24e   : > { %v9887_v57 = vpop.eup %9886  ;;  %v8771_v1 = vpop.f32.mrf.mxu0 }
 0x24f   : > { %v11185_v31 = vadd.f32 %v9887_v57, %v10784_v35  ;;  %9900 = vtanh.f32 %v2629_v46  ;;  %v2640_v14 = vadd.f32 %v10911_v20, %v8771_v1 }
 0x250   : > { %v9889_v18 = vpop.eup %9888  ;;  %v2631_v22 = vpop.f32.mrf.mxu0 }
 0x251   : > { %v11190_v44 = vadd.f32 %v9889_v18, %v10790_v12  ;;  %9902 = vtanh.f32 %v2640_v14  ;;  %v2632_v34 = vadd.f32 %v10911_v20, %v2631_v22  ;;  %v9488_v22 = vld [vmem:[%s10238_s29 + $0x478] sm:$0xff]  }
 0x252   : > { %v9891_v4 = vpop.eup %9890  ;;  %v8774_v27 = vpop.f32.mrf.mxu0  ;;  %8869 = vmatmul.mubr.msk.bf16.gmra.mxu0 %vm1441_vm0, %v9486_v45 }
 0x253   : > { %v11195_v35 = vadd.f32 %v9891_v4, %v10796_v13  ;;  %9904 = vtanh.f32 %v2632_v34  ;;  %v2653_v6 = vadd.f32 %v10911_v20, %v8774_v27  ;;  %8872 = vmatprep.mubr.msk.bf16.mxu0 %vm1441_vm0, %v9487_v3 }
 0x254   : > { %v9893_v46 = vpop.eup %9892  ;;  %v2644_v57 = vpop.f32.mrf.mxu0 }
 0x255   : > { %v11200_v12 = vadd.f32 %v9893_v46, %v10802_v40  ;;  %9906 = vtanh.f32 %v2653_v6  ;;  %v2645_v1 = vadd.f32 %v10911_v20, %v2644_v57 }
 0x256   : > { %v9895_v14 = vpop.eup %9894  ;;  %v8775_v18 = vpop.f32.mrf.mxu0 }
 0x257   : > { %v11205_v45 = vadd.f32 %v9895_v14, %v10808_v41  ;;  %9908 = vtanh.f32 %v2645_v1  ;;  %v2656_v13 = vadd.f32 %v10911_v20, %v8775_v18 }
 0x258   : > { %v9897_v34 = vpop.eup %9896  ;;  %v2647_v4 = vpop.f32.mrf.mxu0 }
 0x259   : > { %v11209_v3 = vadd.f32 %v9897_v34, %v10814_v39  ;;  %9910 = vtanh.f32 %v2656_v13  ;;  %v2648_v40 = vadd.f32 %v10911_v20, %v2647_v4 }
 0x25a   : > { %v9899_v27 = vpop.eup %9898  ;;  %v8778_v6 = vpop.f32.mrf.mxu0  ;;  %8873 = vmatmul.mubr.msk.bf16.gmra.mxu0 %vm1441_vm0, %v9488_v22 }
 0x25b   : > { %v11214_v46 = vadd.f32 %v9899_v27, %v10820_v19  ;;  %9912 = vtanh.f32 %v2648_v40  ;;  %v2669_v41 = vadd.f32 %v10911_v20, %v8778_v6 }
 0x25c   : > { %v9901_v57 = vpop.eup %9900  ;;  %v2660_v1 = vpop.f32.mrf.mxu0 }
 0x25d   : > { %9914 = vtanh.f32 %v2669_v41  ;;  %v2661_v14 = vadd.f32 %v10911_v20, %v2660_v1  ;;  %v11219_v39 = vadd.f32 %v9901_v57, %v10827_v36 }
 0x25e   : > { %v9903_v18 = vpop.eup %9902  ;;  %v8779_v13 = vpop.f32.mrf.mxu0 }
 0x25f   : > { %v11222_v34 = vadd.f32 %v9903_v18, %v10832_v47  ;;  %9916 = vtanh.f32 %v2661_v14  ;;  %v2672_v19 = vadd.f32 %v10911_v20, %v8779_v13 }
 0x260   : > { %v9905_v22 = vpop.eup %9904  ;;  %v2663_v4 = vpop.f32.mrf.mxu0 }
 0x261   : > { %9918 = vtanh.f32 %v2672_v19  ;;  %v2664_v40 = vadd.f32 %v10911_v20, %v2663_v4  ;;  %v11227_v27 = vadd.f32 %v9905_v22, %v10839_v15 }
 0x262   : > { %v9907_v6 = vpop.eup %9906  ;;  %v8782_v41 = vpop.f32.mrf.mxu0 }
 0x263   : > { %v11230_v36 = vadd.f32 %v9907_v6, %v10844_v11  ;;  %9920 = vtanh.f32 %v2664_v40  ;;  %v2685_v47 = vadd.f32 %v10911_v20, %v8782_v41 }
 0x264   : > { %v9909_v57 = vpop.eup %9908  ;;  %v2676_v1 = vpop.f32.mrf.mxu0 }
 0x265   : > { %v11234_v14 = vadd.f32 %v9909_v57, %v10850_v52  ;;  %9922 = vtanh.f32 %v2685_v47  ;;  %v2677_v18 = vadd.f32 %v10911_v20, %v2676_v1  ;;  %v12246_v47 = vld [vmem:[#allocation3_spill] sm:$0xff] }
 0x266   : > { %v9911_v13 = vpop.eup %9910  ;;  %v8783_v19 = vpop.f32.mrf.mxu0 }
 0x267   : > { %v11238_v15 = vadd.f32 %v9911_v13, %v10856_v53  ;;  %9924 = vtanh.f32 %v2677_v18  ;;  %v2688_v11 = vadd.f32 %v10911_v20, %v8783_v19  ;;  %v12248_v13 = vld [vmem:[#allocation4_spill] sm:$0xff] }
 0x268   : > { %v9913_v22 = vpop.eup %9912  ;;  %v2679_v4 = vpop.f32.mrf.mxu0 }
 0x269   : > { %12244 = vst [vmem:[#allocation28_spill] sm:$0xff] %v11238_v15  ;;  %v11242_v40 = vadd.f32 %v9913_v22, %v10862_v30  ;;  %9926 = vtanh.f32 %v2688_v11  ;;  %v2680_v52 = vadd.f32 %v10911_v20, %v2679_v4 }
 0x26a   : > { %v9915_v6 = vpop.eup %9914  ;;  %v8786_v41 = vpop.f32.mrf.mxu0 }
 0x26b   : > { %12245 = vst [vmem:[#allocation29_spill] sm:$0xff] %v11242_v40  ;;  %v11246_v57 = vadd.f32 %v9915_v6, %v12246_v47  ;;  %9928 = vtanh.f32 %v2680_v52  ;;  %v2701_v53 = vadd.f32 %v10911_v20, %v8786_v41  ;;  %v12250_v40 = vld [vmem:[#allocation5_spill] sm:$0xff] }
 0x26c   : > { %v9917_v1 = vpop.eup %9916  ;;  %v2692_v18 = vpop.f32.mrf.mxu0 }
 0x26d   : > { %12247 = vst [vmem:[#allocation3_spill] sm:$0xff] %v11246_v57  ;;  %v11250_v19 = vadd.f32 %v9917_v1, %v12248_v13  ;;  %9930 = vtanh.f32 %v2701_v53  ;;  %v2693_v30 = vadd.f32 %v10911_v20, %v2692_v18  ;;  %v12252_v57 = vld [vmem:[#allocation6_spill] sm:$0xff] }
 0x26e   : > { %v9919_v22 = vpop.eup %9918  ;;  %v8787_v11 = vpop.f32.mrf.mxu0 }
 0x26f   : > { %12249 = vst [vmem:[#allocation4_spill] sm:$0xff] %v11250_v19  ;;  %v11254_v4 = vadd.f32 %v9919_v22, %v12250_v40  ;;  %9932 = vtanh.f32 %v2693_v30  ;;  %v2704_v6 = vadd.f32 %v10911_v20, %v8787_v11  ;;  %v12254_v19 = vld [vmem:[#allocation7_spill] sm:$0xff] }
 0x270   : > { %v9921_v47 = vpop.eup %9920  ;;  %v2695_v52 = vpop.f32.mrf.mxu0 }
 0x271   : > { %12251 = vst [vmem:[#allocation5_spill] sm:$0xff] %v11254_v4  ;;  %v11258_v41 = vadd.f32 %v9921_v47, %v12252_v57  ;;  %9934 = vtanh.f32 %v2704_v6  ;;  %v2696_v1 = vadd.f32 %v10911_v20, %v2695_v52  ;;  %v12256_v4 = vld [vmem:[#allocation8_spill] sm:$0xff]  ;;  %v12258_v47 = vld [vmem:[#allocation9_spill] sm:$0xff] }
 0x272   : > { %v9923_v13 = vpop.eup %9922  ;;  %v8790_v53 = vpop.f32.mrf.mxu0 }
 0x273   : > { %12253 = vst [vmem:[#allocation6_spill] sm:$0xff] %v11258_v41  ;;  %v11262_v18 = vadd.f32 %v9923_v13, %v12254_v19  ;;  %9936 = vtanh.f32 %v2696_v1  ;;  %v2717_v40 = vadd.f32 %v10911_v20, %v8790_v53 }
 0x274   : > { %v9925_v22 = vpop.eup %9924  ;;  %v2708_v30 = vpop.f32.mrf.mxu0 }
 0x275   : > { %12255 = vst [vmem:[#allocation7_spill] sm:$0xff] %v11262_v18  ;;  %9938 = vtanh.f32 %v2717_v40  ;;  %v2709_v11 = vadd.f32 %v10911_v20, %v2708_v30  ;;  %v11267_v15 = vadd.f32 %v9925_v22, %v12256_v4  ;;  %v12260_v18 = vld [vmem:[#allocation10_spill] sm:$0xff]  ;;  %v12261_v4 = vld [vmem:[#allocation11_spill] sm:$0xff] }
 0x276   : > { %v9927_v57 = vpop.eup %9926  ;;  %v8791_v6 = vpop.f32.mrf.mxu0 }
 0x277   : > { %12257 = vst [vmem:[#allocation8_spill] sm:$0xff] %v11267_v15  ;;  %v11270_v52 = vadd.f32 %v9927_v57, %v12258_v47  ;;  %9940 = vtanh.f32 %v2709_v11  ;;  %v2720_v19 = vadd.f32 %v10911_v20, %v8791_v6  ;;  %v12263_v15 = vld [vmem:[#allocation12_spill] sm:$0xff] }
 0x278   : > { %v9929_v13 = vpop.eup %9928  ;;  %v2711_v1 = vpop.f32.mrf.mxu0 }
 0x279   : > { %12259 = vst [vmem:[#allocation9_spill] sm:$0xff] %v11270_v52  ;;  %9942 = vtanh.f32 %v2720_v19  ;;  %v2712_v53 = vadd.f32 %v10911_v20, %v2711_v1  ;;  %v11275_v40 = vadd.f32 %v9929_v13, %v12260_v18  ;;  %v12265_v18 = vld [vmem:[#allocation13_spill] sm:$0xff] }
 0x27a   : > { %v9931_v30 = vpop.eup %9930  ;;  %v8794_v41 = vpop.f32.mrf.mxu0 }
 0x27b   : > { %v11278_v22 = vadd.f32 %v9931_v30, %v12261_v4  ;;  %9944 = vtanh.f32 %v2712_v53  ;;  %v2733_v57 = vadd.f32 %v10911_v20, %v8794_v41 }
 0x27c   : > { %v9933_v47 = vpop.eup %9932  ;;  %v2724_v11 = vpop.f32.mrf.mxu0 }
 0x27d   : > { %12262 = vst [vmem:[#allocation10_spill] sm:$0xff] %v11278_v22  ;;  %v11282_v6 = vadd.f32 %v9933_v47, %v12263_v15  ;;  %9946 = vtanh.f32 %v2733_v57  ;;  %v2725_v19 = vadd.f32 %v10911_v20, %v2724_v11  ;;  %v12267_v22 = vld [vmem:[#allocation14_spill] sm:$0xff] }
 0x27e   : > { %v9935_v1 = vpop.eup %9934  ;;  %v8795_v52 = vpop.f32.mrf.mxu0 }
 0x27f   : > { %12264 = vst [vmem:[#allocation11_spill] sm:$0xff] %v11282_v6  ;;  %v11286_v13 = vadd.f32 %v9935_v1, %v12265_v18  ;;  %9948 = vtanh.f32 %v2725_v19  ;;  %v2736_v30 = vadd.f32 %v10911_v20, %v8795_v52  ;;  %v12269_v6 = vld [vmem:[#allocation15_spill] sm:$0xff] }
 0x280   : > { %v9937_v4 = vpop.eup %9936  ;;  %v2727_v53 = vpop.f32.mrf.mxu0 }
 0x281   : > { %12266 = vst [vmem:[#allocation12_spill] sm:$0xff] %v11286_v13  ;;  %v11290_v41 = vadd.f32 %v9937_v4, %v12267_v22  ;;  %9950 = vtanh.f32 %v2736_v30  ;;  %v2728_v15 = vadd.f32 %v10911_v20, %v2727_v53  ;;  %v12271_v13 = vld [vmem:[#allocation16_spill] sm:$0xff] }
 0x282   : > { %v9939_v47 = vpop.eup %9938  ;;  %v8798_v57 = vpop.f32.mrf.mxu0 }
 0x283   : > { %12268 = vst [vmem:[#allocation13_spill] sm:$0xff] %v11290_v41  ;;  %v11294_v11 = vadd.f32 %v9939_v47, %v12269_v6  ;;  %9952 = vtanh.f32 %v2728_v15  ;;  %v2749_v1 = vadd.f32 %v10911_v20, %v8798_v57  ;;  %v12273_v41 = vld [vmem:[#allocation17_spill] sm:$0xff] }
 0x284   : > { %v9941_v18 = vpop.eup %9940  ;;  %v2740_v19 = vpop.f32.mrf.mxu0 }
 0x285   : > { %12270 = vst [vmem:[#allocation14_spill] sm:$0xff] %v11294_v11  ;;  %v11298_v52 = vadd.f32 %v9941_v18, %v12271_v13  ;;  %9954 = vtanh.f32 %v2749_v1  ;;  %v2741_v22 = vadd.f32 %v10911_v20, %v2740_v19  ;;  %v12275_v11 = vld [vmem:[#allocation18_spill] sm:$0xff] }
 0x286   : > { %v9943_v4 = vpop.eup %9942  ;;  %v8799_v30 = vpop.f32.mrf.mxu0 }
 0x287   : > { %12272 = vst [vmem:[#allocation15_spill] sm:$0xff] %v11298_v52  ;;  %v11302_v53 = vadd.f32 %v9943_v4, %v12273_v41  ;;  %9956 = vtanh.f32 %v2741_v22  ;;  %v2752_v6 = vadd.f32 %v10911_v20, %v8799_v30  ;;  %v12277_v52 = vld [vmem:[#allocation19_spill] sm:$0xff]  ;;  %v11315_v41 = vld [vmem:[%s12171_s2] ss:$0 sm:$0xff] }
 0x288   : > { %v9945_v47 = vpop.eup %9944  ;;  %v2743_v15 = vpop.f32.mrf.mxu0 }
 0x289   : > { %12274 = vst [vmem:[#allocation16_spill] sm:$0xff] %v11302_v53  ;;  %v11306_v57 = vadd.f32 %v9945_v47, %v12275_v11  ;;  %9958 = vtanh.f32 %v2752_v6  ;;  %v2744_v13 = vadd.f32 %v10911_v20, %v2743_v15 }
 0x28a   : > { %v9947_v18 = vpop.eup %9946  ;;  %v8802_v1 = vpop.f32.mrf.mxu0 }
 0x28b   : > { %12276 = vst [vmem:[#allocation17_spill] sm:$0xff] %v11306_v57  ;;  %v11310_v19 = vadd.f32 %v9947_v18, %v12277_v52  ;;  %9960 = vtanh.f32 %v2744_v13  ;;  %v2765_v22 = vadd.f32 %v11315_v41, %v8802_v1  ;;  %v12280_v52 = vld [vmem:[#allocation20_spill] sm:$0xff]  ;;  %v12281_v57 = vld [vmem:[#allocation21_spill] sm:$0xff] }
 0x28c   : > { %v9949_v4 = vpop.eup %9948  ;;  %v2756_v30 = vpop.f32.mrf.mxu0 }
 0x28d   : > { %12278 = vst [vmem:[#allocation18_spill] sm:$0xff] %v11310_v19  ;;  %9962 = vtanh.f32 %v2765_v22  ;;  %v2757_v11 = vadd.f32 %v11315_v41, %v2756_v30  ;;  %v11320_v20 = vadd.f32 %v9949_v4, %v10976_v9  ;;  %v12282_v9 = vld [vmem:[#allocation22_spill] sm:$0xff] }
 0x28e   : > { %v9951_v6 = vpop.eup %9950  ;;  %v8803_v47 = vpop.f32.mrf.mxu0 }
 0x28f   : > { %12279 = vst [vmem:[#allocation19_spill] sm:$0xff] %v11320_v20  ;;  %v11323_v15 = vadd.f32 %v9951_v6, %v12280_v52  ;;  %9964 = vtanh.f32 %v2757_v11  ;;  %v2768_v13 = vadd.f32 %v11315_v41, %v8803_v47 }
 0x290   : > { %v9953_v18 = vpop.eup %9952  ;;  %v2759_v19 = vpop.f32.mrf.mxu0 }
 0x291   : > { %9966 = vtanh.f32 %v2768_v13  ;;  %v2760_v1 = vadd.f32 %v11315_v41, %v2759_v19  ;;  %v11328_v22 = vadd.f32 %v9953_v18, %v12281_v57  ;;  %v12285_v57 = vld [vmem:[#allocation23_spill] sm:$0xff] }
 0x292   : > { %v9955_v30 = vpop.eup %9954  ;;  %v8806_v53 = vpop.f32.mrf.mxu0 }
 0x293   : > { %v11331_v4 = vadd.f32 %v9955_v30, %v12282_v9  ;;  %9968 = vtanh.f32 %v2760_v1  ;;  %v2781_v6 = vadd.f32 %v11315_v41, %v8806_v53 }
 0x294   : > { %v9957_v52 = vpop.eup %9956  ;;  %v2772_v11 = vpop.f32.mrf.mxu0 }
 0x295   : > { %12283 = vst [vmem:[#allocation20_spill] sm:$0xff] %v11331_v4  ;;  %v11335_v47 = vadd.f32 %v9957_v52, %v10993_v48  ;;  %9970 = vtanh.f32 %v2781_v6  ;;  %v2773_v13 = vadd.f32 %v11315_v41, %v2772_v11  ;;  %v12286_v4 = vld [vmem:[#allocation24_spill] sm:$0xff] }
 0x296   : > { %v9959_v19 = vpop.eup %9958  ;;  %v8807_v20 = vpop.f32.mrf.mxu0 }
 0x297   : > { %12284 = vst [vmem:[#allocation21_spill] sm:$0xff] %v11335_v47  ;;  %v11339_v18 = vadd.f32 %v9959_v19, %v12285_v57  ;;  %9972 = vtanh.f32 %v2773_v13  ;;  %v2784_v30 = vadd.f32 %v11315_v41, %v8807_v20  ;;  %v12287_v47 = vld [vmem:[#allocation25_spill] sm:$0xff] }
 0x298   : > { %v9961_v9 = vpop.eup %9960  ;;  %v2775_v1 = vpop.f32.mrf.mxu0 }
 0x299   : > { %v11343_v53 = vadd.f32 %v9961_v9, %v12286_v4  ;;  %9974 = vtanh.f32 %v2784_v30  ;;  %v2776_v48 = vadd.f32 %v11315_v41, %v2775_v1 }
 0x29a   : > { %v9963_v52 = vpop.eup %9962  ;;  %v8810_v6 = vpop.f32.mrf.mxu0 }
 0x29b   : > { %v11347_v11 = vadd.f32 %v9963_v52, %v12287_v47  ;;  %9976 = vtanh.f32 %v2776_v48  ;;  %v2797_v19 = vadd.f32 %v11315_v41, %v8810_v6 }
 0x29c   : > { %v9965_v57 = vpop.eup %9964  ;;  %v2788_v13 = vpop.f32.mrf.mxu0 }
 0x29d   : > { %12288 = vst [vmem:[#allocation22_spill] sm:$0xff] %v11347_v11  ;;  %v11351_v20 = vadd.f32 %v9965_v57, %v11009_v21  ;;  %9978 = vtanh.f32 %v2797_v19  ;;  %v2789_v4 = vadd.f32 %v11315_v41, %v2788_v13 }
 0x29e   : > { %v9967_v9 = vpop.eup %9966  ;;  %v8811_v30 = vpop.f32.mrf.mxu0 }
 0x29f   : > { %12289 = vst [vmem:[#allocation23_spill] sm:$0xff] %v11351_v20  ;;  %v11355_v1 = vadd.f32 %v9967_v9, %v11013_v24  ;;  %9980 = vtanh.f32 %v2789_v4  ;;  %v2800_v47 = vadd.f32 %v11315_v41, %v8811_v30 }
 0x2a0   : > { %v9969_v52 = vpop.eup %9968  ;;  %v2791_v48 = vpop.f32.mrf.mxu0 }
 0x2a1   : > { %12290 = vst [vmem:[#allocation24_spill] sm:$0xff] %v11355_v1  ;;  %v11359_v6 = vadd.f32 %v9969_v52, %v11017_v8  ;;  %9982 = vtanh.f32 %v2800_v47  ;;  %v2792_v21 = vadd.f32 %v11315_v41, %v2791_v48 }
 0x2a2   : > { %v9971_v57 = vpop.eup %9970  ;;  %v8814_v19 = vpop.f32.mrf.mxu0 }
 0x2a3   : > { %12291 = vst [vmem:[#allocation25_spill] sm:$0xff] %v11359_v6  ;;  %9984 = vtanh.f32 %v2792_v21  ;;  %v2813_v13 = vadd.f32 %v11315_v41, %v8814_v19  ;;  %v3493_v24 = vadd.f32 %v9971_v57, %v11024_v49 }
 0x2a4   : > { %v9973_v20 = vpop.eup %9972  ;;  %v2804_v11 = vpop.f32.mrf.mxu0 }
 0x2a5   : > { %9986 = vtanh.f32 %v2813_v13  ;;  %v2805_v4 = vadd.f32 %v11315_v41, %v2804_v11  ;;  %v3491_v8 = vadd.f32 %v9973_v20, %v11028_v61  ;;  %v3565_v6 = vmul.f32 0.25, %v3493_v24 }
 0x2a6   : > { %v9975_v9 = vpop.eup %9974  ;;  %v8815_v30 = vpop.f32.mrf.mxu0 }
 0x2a7   : > { %v2816_v47 = vadd.f32 %v11315_v41, %v8815_v30  ;;  %v3494_v52 = vadd.f32 %v9975_v9, %v11034_v37  ;;  %9988 = vtanh.f32 %v2805_v4  ;;  %v3563_v13 = vmul.f32 0.25, %v3491_v8 }
 0x2a8   : > { %v9977_v48 = vpop.eup %9976  ;;  %v2807_v21 = vpop.f32.mrf.mxu0 }
 0x2a9   : > { %9990 = vtanh.f32 %v2816_v47  ;;  %v2808_v19 = vadd.f32 %v11315_v41, %v2807_v21  ;;  %v3566_v1 = vmul.f32 0.25, %v3494_v52  ;;  %v3492_v49 = vadd.f32 %v9977_v48, %v11038_v60 }
 0x2aa   : > { %v9979_v57 = vpop.eup %9978  ;;  %v8818_v11 = vpop.f32.mrf.mxu0 }
 0x2ab   : > { %9992 = vtanh.f32 %v2808_v19  ;;  %v2829_v61 = vadd.f32 %v11315_v41, %v8818_v11  ;;  %v11371_v20 = vpack.c.bf16 %v3566_v1, %v3565_v6  ;;  %v3564_v37 = vmul.f32 0.25, %v3492_v49 }
 0x2ac   : > { %v9981_v9 = vpop.eup %9980  ;;  %v2820_v4 = vpop.f32.mrf.mxu0  ;;  %v3497_v24 = vadd.f32 %v9979_v57, %v11042_v38 }
 0x2ad   : > { %9994 = vtanh.f32 %v2829_v61  ;;  %v2821_v30 = vadd.f32 %v11315_v41, %v2820_v4  ;;  %8878 = vmatprep.mubr.msk.bf16.mxu1 %vm3681_vm1, %v11371_v20  ;;  %v3635_v60 = vpack.c.bf16 %v3564_v37, %v3563_v13  ;;  %v3495_v8 = vadd.f32 %v9981_v9, %v11048_v10 }
 0x2ae   : > { %v9983_v47 = vpop.eup %9982  ;;  %v8819_v52 = vpop.f32.mrf.mxu0  ;;  %v3569_v19 = vmul.f32 0.25, %v3497_v24 }
 0x2af   : > { %9996 = vtanh.f32 %v2821_v30  ;;  %v2832_v1 = vadd.f32 %v11315_v41, %v8819_v52  ;;  %v3498_v6 = vadd.f32 %v9983_v47, %v11052_v54  ;;  %v3567_v61 = vmul.f32 0.25, %v3495_v8 }
 0x2b0   : > { %v9985_v48 = vpop.eup %9984  ;;  %v2823_v21 = vpop.f32.mrf.mxu0 }
 0x2b1   : > { %9998 = vtanh.f32 %v2832_v1  ;;  %v2824_v38 = vadd.f32 %v11315_v41, %v2823_v21  ;;  %v3496_v49 = vadd.f32 %v9985_v48, %v11058_v7  ;;  %v3570_v57 = vmul.f32 0.25, %v3498_v6 }
 0x2b2   : > { %v9987_v11 = vpop.eup %9986  ;;  %v8822_v13 = vpop.f32.mrf.mxu0 }
 0x2b3   : > { %10000 = vtanh.f32 %v2824_v38  ;;  %v2845_v10 = vadd.f32 %v11315_v41, %v8822_v13  ;;  %v3568_v37 = vmul.f32 0.25, %v3496_v49  ;;  %v11383_v9 = vpack.c.bf16 %v3570_v57, %v3569_v19 }
 0x2b4   : > { %v2836_v4 = vpop.f32.mrf.mxu0  ;;  %v3501_v54 = vadd.f32 %v9987_v11, %v11062_v32  ;;  %v9989_v30 = vpop.eup %9988 }
 0x2b5   : > { %10002 = vtanh.f32 %v2845_v10  ;;  %v2837_v24 = vadd.f32 %v11315_v41, %v2836_v4  ;;  %v11387_v47 = vpack.c.bf16 %v3568_v37, %v3567_v61  ;;  %v3499_v32 = vadd.f32 %v9989_v30, %v11067_v5 }
 0x2b6   : > { %v9991_v7 = vpop.eup %9990  ;;  %v8823_v52 = vpop.f32.mrf.mxu0 }
 0x2b7   : > { %10004 = vtanh.f32 %v2837_v24  ;;  %v2848_v8 = vadd.f32 %v11315_v41, %v8823_v52  ;;  %8879 = vmatmul.mubr.msk.bf16.vlgmr.msra.gmra.mxu1 %vm3681_vm1, %v11387_v47  ;;  %v3502_v1 = vadd.f32 %v9991_v7, %v11072_v55  ;;  %v11401_v55 = vmul.f32 0.25, %v3501_v54 }
 0x2b8   : > { %v9993_v6 = vpop.eup %9992  ;;  %v2839_v48 = vpop.f32.mrf.mxu0  ;;  %8884 = vmatprep.mubr.msk.bf16.mxu1 %vm3681_vm1, %v3635_v60  ;;  %8883 = vmatpush3.bf16.msra.mxu1 %v11130_v63  ;;  %v3571_v10 = vmul.f32 0.25, %v3499_v32 }
 0x2b9   : > { %10006 = vtanh.f32 %v2848_v8  ;;  %v2840_v21 = vadd.f32 %v11315_v41, %v2839_v48  ;;  %8888 = vmatprep.subr.bf16.mxu1 %v11100_v51  ;;  %v3500_v19 = vadd.f32 %v9993_v6, %v11077_v2  ;;  %v11399_v38 = vmul.f32 0.25, %v3502_v1 }
 0x2ba   : > { %v9995_v49 = vpop.eup %9994  ;;  %v8826_v57 = vpop.f32.mrf.mxu0 }
 0x2bb   : > { %10008 = vtanh.f32 %v2840_v21  ;;  %v2861_v60 = vadd.f32 %v11315_v41, %v8826_v57  ;;  %v3572_v11 = vmul.f32 0.25, %v3500_v19  ;;  %v3505_v5 = vadd.f32 %v9995_v49, %v11084_v33 }
 0x2bc   : > { %v9997_v13 = vpop.eup %9996  ;;  %v2852_v61 = vpop.f32.mrf.mxu0  ;;  %v3640_v37 = vpack.c.bf16 %v11399_v38, %v11401_v55 }
 0x2bd   : > { %10010 = vtanh.f32 %v2861_v60  ;;  %v2853_v2 = vadd.f32 %v11315_v41, %v2852_v61  ;;  %v3503_v54 = vadd.f32 %v9997_v13, %v11088_v0  ;;  %v11409_v24 = vpack.c.bf16 %v3572_v11, %v3571_v10 }
 0x2be   : > { %v9999_v4 = vpop.eup %9998  ;;  %v8827_v30 = vpop.f32.mrf.mxu0  ;;  %v3577_v1 = vmul.f32 0.25, %v3505_v5 }
 0x2bf   : > { %10012 = vtanh.f32 %v2853_v2  ;;  %v2864_v7 = vadd.f32 %v11315_v41, %v8827_v30  ;;  %8885 = vmatmul.mubr.msk.bf16.vlgmr.msra.gmra.mxu1 %vm3681_vm1, %v11371_v20  ;;  %v3506_v33 = vadd.f32 %v9999_v4, %v11094_v43  ;;  %v3575_v19 = vmul.f32 0.25, %v3503_v54 }
 0x2c0   : > { %v10001_v52 = vpop.eup %10000  ;;  %v2855_v8 = vpop.f32.mrf.mxu0  ;;  %8889 = vmatpush3.bf16.msra.mxu1 %v11100_v51  ;;  %v12292_v51 = vld [vmem:[#allocation26_spill] sm:$0xff] }
 0x2c1   : > { %10014 = vtanh.f32 %v2864_v7  ;;  %v2856_v6 = vadd.f32 %v11315_v41, %v2855_v8  ;;  %v3578_v48 = vmul.f32 0.25, %v3506_v33  ;;  %8894 = vmatprep.subr.bf16.mxu1 %v11130_v63  ;;  %v3504_v0 = vadd.f32 %v10001_v52, %v11103_v62 }
 0x2c2   : > { %v10003_v32 = vpop.eup %10002  ;;  %v8830_v21 = vpop.f32.mrf.mxu0 }
 0x2c3   : > { %10016 = vtanh.f32 %v2856_v6  ;;  %v2877_v20 = vadd.f32 %v11315_v41, %v8830_v21  ;;  %v11420_v43 = vpack.c.bf16 %v3578_v48, %v3577_v1  ;;  %v3576_v49 = vmul.f32 0.25, %v3504_v0 }
 0x2c4   : > { %v10005_v57 = vpop.eup %10004  ;;  %v2868_v60 = vpop.f32.mrf.mxu0  ;;  %v3509_v11 = vadd.f32 %v10003_v32, %v12292_v51 }
 0x2c5   : > { %10018 = vtanh.f32 %v2877_v20  ;;  %v2869_v13 = vadd.f32 %v11315_v41, %v2868_v60  ;;  %8890 = vmatprep.mubr.msk.bf16.mxu1 %vm3681_vm1, %v11420_v43  ;;  %v11426_v62 = vpack.c.bf16 %v3576_v49, %v3575_v19  ;;  %v3507_v10 = vadd.f32 %v10005_v57, %v11114_v28  ;;  %v12293_v19 = vld [vmem:[#allocation27_spill] sm:$0xff] }
 0x2c6   : > { %v10007_v61 = vpop.eup %10006  ;;  %v8831_v5 = vpop.f32.mrf.mxu0  ;;  %v3581_v7 = vmul.f32 0.25, %v3509_v11 }
 0x2c7   : > { %10020 = vtanh.f32 %v2869_v13  ;;  %v2880_v2 = vadd.f32 %v11315_v41, %v8831_v5  ;;  %v3510_v4 = vadd.f32 %v10007_v61, %v11119_v26  ;;  %v3579_v48 = vmul.f32 0.25, %v3507_v10 }
 0x2c8   : > { %v10009_v30 = vpop.eup %10008  ;;  %v2871_v54 = vpop.f32.mrf.mxu0 }
 0x2c9   : > { %10022 = vtanh.f32 %v2880_v2  ;;  %v2872_v33 = vadd.f32 %v11315_v41, %v2871_v54  ;;  %v3508_v52 = vadd.f32 %v10009_v30, %v11124_v25  ;;  %v3582_v8 = vmul.f32 0.25, %v3510_v4  ;;  %v11443_v25 = vld [vmem:[%s12172_s3 + $0x10] sm:$0xff]  }
 0x2ca   : > { %v10011_v1 = vpop.eup %10010  ;;  %v8834_v6 = vpop.f32.mrf.mxu0 }
 0x2cb   : > { %10024 = vtanh.f32 %v2872_v33  ;;  %v2893_v28 = vadd.f32 %v11315_v41, %v8834_v6  ;;  %v3580_v0 = vmul.f32 0.25, %v3508_v52  ;;  %v11434_v32 = vpack.c.bf16 %v3582_v8, %v3581_v7 }
 0x2cc   : > { %v10013_v21 = vpop.eup %10012  ;;  %v2884_v26 = vpop.f32.mrf.mxu0  ;;  %v3513_v20 = vadd.f32 %v10011_v1, %v12293_v19 }
 0x2cd   : > { %10026 = vtanh.f32 %v2893_v28  ;;  %v2885_v49 = vadd.f32 %v11315_v41, %v2884_v26  ;;  %v11438_v57 = vpack.c.bf16 %v3580_v0, %v3579_v48  ;;  %v3511_v11 = vadd.f32 %v10013_v21, %v11140_v42 }
 0x2ce   : > { %v10015_v60 = vpop.eup %10014  ;;  %v8835_v51 = vpop.f32.mrf.mxu0  ;;  %v3585_v2 = vmul.f32 0.25, %v3513_v20 }
 0x2cf   : > { %10028 = vtanh.f32 %v2885_v49  ;;  %v2896_v13 = vadd.f32 %v11315_v41, %v8835_v51  ;;  %8891 = vmatmul.mubr.msk.bf16.vlgmr.msra.gmra.mxu1 %vm3681_vm1, %v11438_v57  ;;  %v3514_v61 = vadd.f32 %v10015_v60, %v11145_v50  ;;  %v3583_v33 = vmul.f32 0.25, %v3511_v11 }
 0x2d0   : > { %v10017_v5 = vpop.eup %10016  ;;  %8895 = vmatpush3.bf16.msra.mxu1 %v11130_v63  ;;  %v2887_v10 = vpop.f32.mrf.mxu0  ;;  %8896 = vmatprep.mubr.msk.bf16.mxu1 %vm3681_vm1, %v11426_v62 }
 0x2d1   : > { %10030 = vtanh.f32 %v2896_v13  ;;  %v2888_v4 = vadd.f32 %v11315_v41, %v2887_v10  ;;  %8900 = vmatprep.subr.bf16.mxu1 %v11443_v25  ;;  %v3512_v42 = vadd.f32 %v10017_v5, %v11150_v58  ;;  %v3586_v30 = vmul.f32 0.25, %v3514_v61 }
 0x2d2   : > { %v10019_v54 = vpop.eup %10018  ;;  %v8838_v7 = vpop.f32.mrf.mxu0 }
 0x2d3   : > { %10032 = vtanh.f32 %v2888_v4  ;;  %v2909_v50 = vadd.f32 %v11315_v41, %v8838_v7  ;;  %v3584_v63 = vmul.f32 0.25, %v3512_v42  ;;  %v11457_v52 = vpack.c.bf16 %v3586_v30, %v3585_v2 }
 0x2d4   : > { %v10021_v8 = vpop.eup %10020  ;;  %v2900_v1 = vpop.f32.mrf.mxu0  ;;  %v3517_v6 = vadd.f32 %v10019_v54, %v11155_v23 }
 0x2d5   : > { %10034 = vtanh.f32 %v2909_v50  ;;  %v2901_v48 = vadd.f32 %v11315_v41, %v2900_v1  ;;  %v11461_v28 = vpack.c.bf16 %v3584_v63, %v3583_v33  ;;  %v3515_v21 = vadd.f32 %v10021_v8, %v11161_v16 }
 0x2d6   : > { %v10023_v58 = vpop.eup %10022  ;;  %v8839_v0 = vpop.f32.mrf.mxu0  ;;  %v3589_v49 = vmul.f32 0.25, %v3517_v6 }
 0x2d7   : > { %10036 = vtanh.f32 %v2901_v48  ;;  %v2912_v26 = vadd.f32 %v11315_v41, %v8839_v0  ;;  %8897 = vmatmul.mubr.msk.bf16.vlgmr.msra.gmra.mxu1 %vm3681_vm1, %v11420_v43  ;;  %v3518_v19 = vadd.f32 %v10023_v58, %v11165_v56  ;;  %v3587_v61 = vmul.f32 0.25, %v3515_v21 }
 0x2d8   : > { %v10025_v20 = vpop.eup %10024  ;;  %8901 = vmatpush3.bf16.msra.mxu1 %v11443_v25  ;;  %v2903_v23 = vpop.f32.mrf.mxu0  ;;  %8902 = vmatprep.mubr.msk.bf16.mxu1 %vm3681_vm1, %v11387_v47 }
 0x2d9   : > { %10038 = vtanh.f32 %v2912_v26  ;;  %v2904_v60 = vadd.f32 %v11315_v41, %v2903_v23  ;;  %8906 = vmatprep.subr.bf16.mxu1 %v11443_v25  ;;  %v3516_v16 = vadd.f32 %v10025_v20, %v11171_v59  ;;  %v3590_v51 = vmul.f32 0.25, %v3518_v19  ;;  %v11482_v59 = vld [vmem:[%s12172_s3 + $0x18] sm:$0xff]  }
 0x2da   : > { %v10027_v11 = vpop.eup %10026  ;;  %v8842_v13 = vpop.f32.mrf.mxu0 }
 0x2db   : > { %10040 = vtanh.f32 %v2904_v60  ;;  %v2925_v56 = vadd.f32 %v11315_v41, %v8842_v13  ;;  %v3588_v5 = vmul.f32 0.25, %v3516_v16  ;;  %v11475_v10 = vpack.c.bf16 %v3590_v51, %v3589_v49 }
 0x2dc   : > { %v10029_v2 = vpop.eup %10028  ;;  %v2916_v47 = vpop.f32.mrf.mxu0  ;;  %v3521_v4 = vadd.f32 %v10027_v11, %v11175_v29 }
 0x2dd   : > { %10042 = vtanh.f32 %v2925_v56  ;;  %v2917_v42 = vadd.f32 %v11315_v41, %v2916_v47  ;;  %v11484_v30 = vpack.c.bf16 %v3588_v5, %v3587_v61  ;;  %v3519_v33 = vadd.f32 %v10029_v2, %v11180_v17 }
 0x2de   : > { %v10031_v54 = vpop.eup %10030  ;;  %v8843_v7 = vpop.f32.mrf.mxu0  ;;  %v3593_v1 = vmul.f32 0.25, %v3521_v4 }
 0x2df   : > { %10044 = vtanh.f32 %v2917_v42  ;;  %v2928_v50 = vadd.f32 %v11315_v41, %v8843_v7  ;;  %8903 = vmatmul.mubr.msk.bf16.vlgmr.msra.gmra.mxu1 %vm3681_vm1, %v11383_v9  ;;  %v3522_v29 = vadd.f32 %v10031_v54, %v11185_v31  ;;  %v3591_v21 = vmul.f32 0.25, %v3519_v33 }
 0x2e0   : > { %v10033_v63 = vpop.eup %10032  ;;  %8907 = vmatpush3.bf16.msra.mxu1 %v11443_v25  ;;  %v2919_v8 = vpop.f32.mrf.mxu0  ;;  %8908 = vmatprep.mubr.msk.bf16.mxu1 %vm3681_vm1, %v11438_v57 }
 0x2e1   : > { %10046 = vtanh.f32 %v2928_v50  ;;  %v2920_v6 = vadd.f32 %v11315_v41, %v2919_v8  ;;  %8912 = vmatprep.subr.bf16.mxu1 %v11482_v59  ;;  %v3520_v17 = vadd.f32 %v10033_v63, %v11190_v44  ;;  %v3594_v48 = vmul.f32 0.25, %v3522_v29 }
 0x2e2   : > { %v10035_v58 = vpop.eup %10034  ;;  %v8846_v0 = vpop.f32.mrf.mxu0 }
 0x2e3   : > { %10048 = vtanh.f32 %v2920_v6  ;;  %v2941_v31 = vadd.f32 %v11315_v41, %v8846_v0  ;;  %v3592_v25 = vmul.f32 0.25, %v3520_v17  ;;  %v11498_v26 = vpack.c.bf16 %v3594_v48, %v3593_v1 }
 0x2e4   : > { %v10037_v19 = vpop.eup %10036  ;;  %v2932_v20 = vpop.f32.mrf.mxu0  ;;  %v3525_v23 = vadd.f32 %v10035_v58, %v11195_v35 }
 0x2e5   : > { %v2933_v49 = vadd.f32 %v11315_v41, %v2932_v20  ;;  %v11502_v60 = vpack.c.bf16 %v3592_v25, %v3591_v21  ;;  %10050 = vtanh.f32 %v2941_v31  ;;  %v3523_v51 = vadd.f32 %v10037_v19, %v11200_v12 }
 0x2e6   : > { %v10039_v16 = vpop.eup %10038  ;;  %v8847_v44 = vpop.f32.mrf.mxu0  ;;  %v3597_v56 = vmul.f32 0.25, %v3525_v23 }
 0x2e7   : > { %10052 = vtanh.f32 %v2933_v49  ;;  %v2944_v11 = vadd.f32 %v11315_v41, %v8847_v44  ;;  %8909 = vmatmul.mubr.msk.bf16.vlgmr.msra.gmra.mxu1 %vm3681_vm1, %v11434_v32  ;;  %v3526_v13 = vadd.f32 %v10039_v16, %v11205_v45  ;;  %v3595_v42 = vmul.f32 0.25, %v3523_v51 }
 0x2e8   : > { %v10041_v61 = vpop.eup %10040  ;;  %8913 = vmatpush3.bf16.msra.mxu1 %v11482_v59  ;;  %v2935_v35 = vpop.f32.mrf.mxu0  ;;  %8914 = vmatprep.mubr.msk.bf16.mxu1 %vm3681_vm1, %v11383_v9 }
 0x2e9   : > { %10054 = vtanh.f32 %v2944_v11  ;;  %v2936_v5 = vadd.f32 %v11315_v41, %v2935_v35  ;;  %8918 = vmatprep.subr.bf16.mxu1 %v11482_v59  ;;  %v3524_v12 = vadd.f32 %v10041_v61, %v11209_v3  ;;  %v3598_v2 = vmul.f32 0.25, %v3526_v13  ;;  %v11523_v3 = vld [vmem:[%s12172_s3 + $0x20] sm:$0xff]  }
 0x2ea   : > { %v10043_v47 = vpop.eup %10042  ;;  %v8850_v4 = vpop.f32.mrf.mxu0 }
 0x2eb   : > { %10056 = vtanh.f32 %v2936_v5  ;;  %v2957_v45 = vadd.f32 %v11315_v41, %v8850_v4  ;;  %v3596_v54 = vmul.f32 0.25, %v3524_v12  ;;  %v11516_v7 = vpack.c.bf16 %v3598_v2, %v3597_v56  ;;  %v12294_v56 = vld [vmem:[#allocation28_spill] sm:$0xff] }
 0x2ec   : > { %v10045_v33 = vpop.eup %10044  ;;  %v2948_v9 = vpop.f32.mrf.mxu0  ;;  %v3529_v50 = vadd.f32 %v10043_v47, %v11214_v46  ;;  %v12295_v47 = vld [vmem:[#allocation29_spill] sm:$0xff] }
 0x2ed   : > { %v2949_v29 = vadd.f32 %v11315_v41, %v2948_v9  ;;  %v11525_v63 = vpack.c.bf16 %v3596_v54, %v3595_v42  ;;  %10058 = vtanh.f32 %v2957_v45  ;;  %v3527_v6 = vadd.f32 %v10045_v33, %v11219_v39 }
 0x2ee   : > { %v10047_v8 = vpop.eup %10046  ;;  %v8851_v1 = vpop.f32.mrf.mxu0  ;;  %v3601_v0 = vmul.f32 0.25, %v3529_v50 }
 0x2ef   : > { %10060 = vtanh.f32 %v2949_v29  ;;  %v2960_v17 = vadd.f32 %v11315_v41, %v8851_v1  ;;  %8915 = vmatmul.mubr.msk.bf16.vlgmr.msra.gmra.mxu1 %vm3681_vm1, %v11409_v24  ;;  %v3530_v46 = vadd.f32 %v10047_v8, %v11222_v34  ;;  %v3599_v19 = vmul.f32 0.25, %v3527_v6  ;;  %v11563_v6 = vld [vmem:[%s12172_s3 + $0x28] sm:$0xff]  }
 0x2f0   : > { %v10049_v48 = vpop.eup %10048  ;;  %8919 = vmatpush3.bf16.msra.mxu1 %v11482_v59  ;;  %v2951_v58 = vpop.f32.mrf.mxu0  ;;  %8920 = vmatprep.mubr.msk.bf16.mxu1 %vm3681_vm1, %v11434_v32 }
 0x2f1   : > { %10062 = vtanh.f32 %v2960_v17  ;;  %v2952_v21 = vadd.f32 %v11315_v41, %v2951_v58  ;;  %8924 = vmatprep.subr.bf16.mxu1 %v11523_v3  ;;  %v3528_v39 = vadd.f32 %v10049_v48, %v11227_v27  ;;  %v3602_v31 = vmul.f32 0.25, %v3530_v46  ;;  %v12296_v48 = vld [vmem:[#allocation3_spill] sm:$0xff] }
 0x2f2   : > { %v8854_v25 = vpop.f32.mrf.mxu0  ;;  %v10051_v20 = vpop.eup %10050 }
 0x2f3   : > { %10064 = vtanh.f32 %v2952_v21  ;;  %v2973_v34 = vadd.f32 %v11315_v41, %v8854_v25  ;;  %v3600_v59 = vmul.f32 0.25, %v3528_v39  ;;  %v11539_v23 = vpack.c.bf16 %v3602_v31, %v3601_v0  ;;  %v12297_v21 = vld [vmem:[#allocation5_spill] sm:$0xff]  ;;  %v12298_v25 = vld [vmem:[#allocation4_spill] sm:$0xff] }
 0x2f4   : > { %v10053_v49 = vpop.eup %10052  ;;  %v2964_v16 = vpop.f32.mrf.mxu0  ;;  %v3533_v27 = vadd.f32 %v10051_v20, %v11230_v36 }
 0x2f5   : > { %v2965_v44 = vadd.f32 %v11315_v41, %v2964_v16  ;;  %v11542_v51 = vpack.c.bf16 %v3600_v59, %v3599_v19  ;;  %10066 = vtanh.f32 %v2973_v34  ;;  %v3531_v35 = vadd.f32 %v10053_v49, %v11234_v14  ;;  %v12299_v16 = vld [vmem:[#allocation6_spill] sm:$0xff] }
 0x2f6   : > { %v10055_v11 = vpop.eup %10054  ;;  %v8855_v13 = vpop.f32.mrf.mxu0  ;;  %v3605_v14 = vmul.f32 0.25, %v3533_v27 }
 0x2f7   : > { %v2976_v61 = vadd.f32 %v11315_v41, %v8855_v13  ;;  %8921 = vmatmul.mubr.msk.bf16.vlgmr.msra.gmra.mxu1 %vm3681_vm1, %v11461_v28  ;;  %v3534_v5 = vadd.f32 %v10055_v11, %v12294_v56  ;;  %10068 = vtanh.f32 %v2965_v44  ;;  %v3603_v9 = vmul.f32 0.25, %v3531_v35 }
 0x2f8   : > { %v10057_v12 = vpop.eup %10056  ;;  %8925 = vmatpush3.bf16.msra.mxu1 %v11523_v3  ;;  %v2967_v2 = vpop.f32.mrf.mxu0  ;;  %8926 = vmatprep.mubr.msk.bf16.mxu1 %vm3681_vm1, %v11409_v24 }
 0x2f9   : > { %10070 = vtanh.f32 %v2976_v61  ;;  %v2968_v36 = vadd.f32 %v11315_v41, %v2967_v2  ;;  %8930 = vmatprep.subr.bf16.mxu1 %v11523_v3  ;;  %v3532_v4 = vadd.f32 %v10057_v12, %v12295_v47  ;;  %v3606_v42 = vmul.f32 0.25, %v3534_v5  ;;  %v12300_v2 = vld [vmem:[#allocation7_spill] sm:$0xff] }
 0x2fa   : > { %v8858_v45 = vpop.f32.mrf.mxu0  ;;  %v10059_v54 = vpop.eup %10058 }
 0x2fb   : > { %10072 = vtanh.f32 %v2968_v36  ;;  %v2989_v33 = vadd.f32 %v11315_v41, %v8858_v45  ;;  %v3604_v50 = vmul.f32 0.25, %v3532_v4  ;;  %v11557_v1 = vpack.c.bf16 %v3606_v42, %v3605_v14  ;;  %v12301_v4 = vld [vmem:[#allocation9_spill] sm:$0xff] }
 0x2fc   : > { %v10061_v29 = vpop.eup %10060  ;;  %v2980_v8 = vpop.f32.mrf.mxu0  ;;  %v3537_v58 = vadd.f32 %v10059_v54, %v12296_v48 }
 0x2fd   : > { %v2981_v24 = vadd.f32 %v11315_v41, %v2980_v8  ;;  %v11565_v17 = vpack.c.bf16 %v3604_v50, %v3603_v9  ;;  %10074 = vtanh.f32 %v2989_v33  ;;  %v3535_v19 = vadd.f32 %v10061_v29, %v12298_v25  ;;  %v12302_v33 = vld [vmem:[#allocation8_spill] sm:$0xff] }
 0x2fe   : > { %v10063_v46 = vpop.eup %10062  ;;  %v8859_v0 = vpop.f32.mrf.mxu0  ;;  %v3609_v55 = vmul.f32 0.25, %v3537_v58 }
 0x2ff   : > { %v3538_v39 = vadd.f32 %v10063_v46, %v12297_v21  ;;  %v2992_v31 = vadd.f32 %v11315_v41, %v8859_v0  ;;  %8927 = vmatmul.mubr.msk.bf16.vlgmr.msra.gmra.mxu1 %vm3681_vm1, %v3640_v37  ;;  %10076 = vtanh.f32 %v2981_v24  ;;  %v3607_v13 = vmul.f32 0.25, %v3535_v19  ;;  %v11606_v19 = vld [vmem:[%s12172_s3 + $0x30] sm:$0xff]  }
 0x300   : > { %v10065_v20 = vpop.eup %10064  ;;  %8931 = vmatpush3.bf16.msra.mxu1 %v11523_v3  ;;  %v2983_v34 = vpop.f32.mrf.mxu0  ;;  %8932 = vmatprep.mubr.msk.bf16.mxu1 %vm3681_vm1, %v11461_v28 }
 0x301   : > { %v3610_v59 = vmul.f32 0.25, %v3538_v39  ;;  %10078 = vtanh.f32 %v2992_v31  ;;  %v2984_v49 = vadd.f32 %v11315_v41, %v2983_v34  ;;  %8936 = vmatprep.subr.bf16.mxu1 %v11563_v6  ;;  %v3536_v38 = vadd.f32 %v10065_v20, %v12299_v16  ;;  %v12303_v20 = vld [vmem:[#allocation10_spill] sm:$0xff]  ;;  %v12304_v16 = vld [vmem:[#allocation12_spill] sm:$0xff] }
 0x302   : > { %v8862_v37 = vpop.f32.mrf.mxu0  ;;  %v10067_v44 = vpop.eup %10066 }
 0x303   : > { %10080 = vtanh.f32 %v2984_v49  ;;  %v3005_v11 = vadd.f32 %v11315_v41, %v8862_v37  ;;  %v3608_v3 = vmul.f32 0.25, %v3536_v38  ;;  %v11582_v61 = vpack.c.bf16 %v3610_v59, %v3609_v55 }
 0x304   : > { %v2996_v27 = vpop.f32.mrf.mxu0  ;;  %v10069_v35 = vpop.eup %10068  ;;  %v3541_v36 = vadd.f32 %v10067_v44, %v12300_v2  ;;  %v12305_v44 = vld [vmem:[#allocation11_spill] sm:$0xff] }
 0x305   : > { %v2997_v56 = vadd.f32 %v11315_v41, %v2996_v27  ;;  %v11585_v5 = vpack.c.bf16 %v3608_v3, %v3607_v13  ;;  %10082 = vtanh.f32 %v3005_v11  ;;  %v3539_v9 = vadd.f32 %v10069_v35, %v12302_v33  ;;  %v12306_v27 = vld [vmem:[#allocation13_spill] sm:$0xff] }
 0x306   : > { %v10071_v12 = vpop.eup %10070  ;;  %v8863_v47 = vpop.f32.mrf.mxu0  ;;  %v3613_v24 = vmul.f32 0.25, %v3541_v36 }
 0x307   : > { %v3542_v42 = vadd.f32 %v10071_v12, %v12301_v4  ;;  %10084 = vtanh.f32 %v2997_v56  ;;  %v3008_v45 = vadd.f32 %v11315_v41, %v8863_v47  ;;  %8933 = vmatmul.mubr.msk.bf16.vlgmr.msra.gmra.mxu1 %vm3681_vm1, %v11457_v52  ;;  %v3611_v39 = vmul.f32 0.25, %v3539_v9  ;;  %v12307_v9 = vld [vmem:[#allocation14_spill] sm:$0xff] }
 0x308   : > { %v10073_v14 = vpop.eup %10072  ;;  %8937 = vmatpush3.bf16.msra.mxu1 %v11563_v6  ;;  %v2999_v54 = vpop.f32.mrf.mxu0  ;;  %8938 = vmatprep.mubr.msk.bf16.mxu1 %vm3681_vm1, %v11426_v62 }
 0x309   : > { %v3614_v50 = vmul.f32 0.25, %v3542_v42  ;;  %10086 = vtanh.f32 %v3008_v45  ;;  %v3000_v29 = vadd.f32 %v11315_v41, %v2999_v54  ;;  %8942 = vmatprep.subr.bf16.mxu1 %v11563_v6  ;;  %v3540_v8 = vadd.f32 %v10073_v14, %v11275_v40 }
 0x30a   : > { %v8866_v46 = vpop.f32.mrf.mxu0  ;;  %v10075_v48 = vpop.eup %10074 }
 0x30b   : > { %10088 = vtanh.f32 %v3000_v29  ;;  %v3021_v58 = vadd.f32 %v11315_v41, %v8866_v46  ;;  %v3612_v0 = vmul.f32 0.25, %v3540_v8  ;;  %v11600_v62 = vpack.c.bf16 %v3614_v50, %v3613_v24  ;;  %v12308_v24 = vld [vmem:[#allocation15_spill] sm:$0xff] }
 0x30c   : > { %v3012_v21 = vpop.f32.mrf.mxu0  ;;  %v10077_v31 = vpop.eup %10076  ;;  %v3545_v34 = vadd.f32 %v10075_v48, %v12303_v20  ;;  %v12309_v48 = vld [vmem:[#allocation16_spill] sm:$0xff] }
 0x30d   : > { %10090 = vtanh.f32 %v3021_v58  ;;  %v3013_v25 = vadd.f32 %v11315_v41, %v3012_v21  ;;  %v11609_v49 = vpack.c.bf16 %v3612_v0, %v3611_v39  ;;  %v3543_v11 = vadd.f32 %v10077_v31, %v12305_v44 }
 0x30e   : > { %v10079_v40 = vpop.eup %10078  ;;  %v8867_v59 = vpop.f32.mrf.mxu0  ;;  %v3617_v12 = vmul.f32 0.25, %v3545_v34 }
 0x30f   : > { %v3546_v38 = vadd.f32 %v10079_v40, %v12304_v16  ;;  %10092 = vtanh.f32 %v3013_v25  ;;  %v3024_v55 = vadd.f32 %v11315_v41, %v8867_v59  ;;  %8939 = vmatmul.mubr.msk.bf16.vlgmr.msra.gmra.mxu1 %vm3681_vm1, %v11420_v43  ;;  %v3615_v42 = vmul.f32 0.25, %v3543_v11  ;;  %v12310_v25 = vld [vmem:[#allocation17_spill] sm:$0xff]  ;;  %v12311_v11 = vld [vmem:[#allocation18_spill] sm:$0xff] }
 0x310   : > { %v10081_v37 = vpop.eup %10080  ;;  %8943 = vmatpush3.bf16.msra.mxu1 %v11563_v6  ;;  %v3015_v13 = vpop.f32.mrf.mxu0  ;;  %8944 = vmatprep.mubr.msk.bf16.mxu1 %vm3681_vm1, %v11484_v30 }
 0x311   : > { %v3618_v3 = vmul.f32 0.25, %v3546_v38  ;;  %v3544_v35 = vadd.f32 %v10081_v37, %v12306_v27  ;;  %10094 = vtanh.f32 %v3024_v55  ;;  %v3016_v56 = vadd.f32 %v11315_v41, %v3015_v13  ;;  %8948 = vmatprep.subr.bf16.mxu1 %v11606_v19 }
 0x312   : > { %v8870_v2 = vpop.f32.mrf.mxu0  ;;  %v10083_v36 = vpop.eup %10082 }
 0x313   : > { %v3616_v47 = vmul.f32 0.25, %v3544_v35  ;;  %10096 = vtanh.f32 %v3016_v56  ;;  %v3037_v4 = vadd.f32 %v11315_v41, %v8870_v2  ;;  %v11623_v14 = vpack.c.bf16 %v3618_v3, %v3617_v12  ;;  %v9496_v35 = vld [vmem:[%s12172_s3 + $0x38] sm:$0xff]  }
 0x314   : > { %v10085_v6 = vpop.eup %10084  ;;  %v3028_v45 = vpop.f32.mrf.mxu0  ;;  %v3549_v50 = vadd.f32 %v10083_v36, %v12307_v9 }
 0x315   : > { %10098 = vtanh.f32 %v3037_v4  ;;  %v3029_v54 = vadd.f32 %v11315_v41, %v3028_v45  ;;  %v11627_v8 = vpack.c.bf16 %v3616_v47, %v3615_v42  ;;  %v3547_v46 = vadd.f32 %v10085_v6, %v12308_v24  ;;  %v10140_v47 = vld [vmem:[%s12171_s2] ss:$0 sm:$0xff] }
 0x316   : > { %v10087_v33 = vpop.eup %10086  ;;  %v8871_v29 = vpop.f32.mrf.mxu0  ;;  %v3621_v59 = vmul.f32 0.25, %v3549_v50 }
 0x317   : > { %v3550_v58 = vadd.f32 %v10087_v33, %v12309_v48  ;;  %10100 = vtanh.f32 %v3029_v54  ;;  %v3040_v0 = vadd.f32 %v11315_v41, %v8871_v29  ;;  %8945 = vmatmul.mubr.msk.bf16.vlgmr.msra.gmra.mxu1 %vm3681_vm1, %v11475_v10  ;;  %v3619_v38 = vmul.f32 0.25, %v3547_v46 }
 0x318   : > { %v10089_v21 = vpop.eup %10088  ;;  %8949 = vmatpush3.bf16.msra.mxu1 %v11606_v19  ;;  %v3031_v39 = vpop.f32.mrf.mxu0  ;;  %8950 = vmatprep.mubr.msk.bf16.mxu1 %vm3681_vm1, %v11420_v43 }
 0x319   : > { %v3622_v31 = vmul.f32 0.25, %v3550_v58  ;;  %v3548_v40 = vadd.f32 %v10089_v21, %v12310_v25  ;;  %10102 = vtanh.f32 %v3040_v0  ;;  %v3032_v20 = vadd.f32 %v11315_v41, %v3031_v39  ;;  %8954 = vmatprep.subr.bf16.mxu1 %v11606_v19  ;;  %v12314_v39 = vld [vmem:[#allocation21_spill] sm:$0xff] }
 0x31a   : > { %v10091_v34 = vpop.eup %10090  ;;  %v8874_v16 = vpop.f32.mrf.mxu0 }
 0x31b   : > { %v3620_v55 = vmul.f32 0.25, %v3548_v40  ;;  %10104 = vtanh.f32 %v3032_v20  ;;  %v3053_v37 = vadd.f32 %v11315_v41, %v8874_v16  ;;  %v3553_v13 = vadd.f32 %v10091_v34, %v12311_v11  ;;  %v9497_v11 = vld [vmem:[%s12172_s3 + $0x40] sm:$0xff]  }
 0x31c   : > { %v10093_v44 = vpop.eup %10092  ;;  %v3044_v43 = vpop.f32.mrf.mxu0  ;;  %v11642_v3 = vpack.c.bf16 %v3622_v31, %v3621_v59 }
 0x31d   : > { %10106 = vtanh.f32 %v3053_v37  ;;  %v3045_v27 = vadd.f32 %v11315_v41, %v3044_v43  ;;  %v11648_v56 = vpack.c.bf16 %v3620_v55, %v3619_v38  ;;  %v12312_v41 = vld [vmem:[#allocation19_spill] sm:$0xff]  ;;  %v3625_v45 = vmul.f32 0.25, %v3553_v13 }
 0x31e   : > { %v10095_v12 = vpop.eup %10094  ;;  %v8875_v2 = vpop.f32.mrf.mxu0  ;;  %v3551_v6 = vadd.f32 %v10093_v44, %v12312_v41  ;;  %v12316_v43 = vld [vmem:[#allocation23_spill] sm:$0xff] }
 0x31f   : > { %v3554_v36 = vadd.f32 %v10095_v12, %v11323_v15  ;;  %10108 = vtanh.f32 %v3045_v27  ;;  %v3056_v4 = vadd.f32 %v10140_v47, %v8875_v2  ;;  %8951 = vmatmul.mubr.msk.bf16.vlgmr.msra.gmra.mxu1 %vm3681_vm1, %v11438_v57  ;;  %v12317_v12 = vld [vmem:[#allocation24_spill] sm:$0xff] }
 0x320   : > { %v10097_v42 = vpop.eup %10096  ;;  %8955 = vmatpush3.bf16.msra.mxu1 %v11606_v19  ;;  %v3047_v54 = vpop.f32.mrf.mxu0  ;;  %8956 = vmatprep.mubr.msk.bf16.mxu1 %vm3681_vm1, %v11475_v10  ;;  %v11661_v29 = vmul.f32 0.25, %v3551_v6  ;;  %v12313_v19 = vld [vmem:[#allocation20_spill] sm:$0xff] }
 0x321   : > { %v3626_v15 = vmul.f32 0.25, %v3554_v36  ;;  %10110 = vtanh.f32 %v3056_v4  ;;  %v3048_v33 = vadd.f32 %v10140_v47, %v3047_v54  ;;  %8960 = vmatprep.subr.bf16.mxu1 %v9496_v35  ;;  %v3552_v9 = vadd.f32 %v10097_v42, %v11328_v22  ;;  %v12318_v4 = vld [vmem:[#allocation25_spill] sm:$0xff] }
 0x322   : > { %v10099_v50 = vpop.eup %10098 }
 0x323   : > { %10112 = vtanh.f32 %v3048_v33  ;;  %v11663_v24 = vmul.f32 0.25, %v3552_v9  ;;  %v11665_v46 = vpack.c.bf16 %v3626_v15, %v3625_v45  ;;  %v3557_v58 = vadd.f32 %v10099_v50, %v12313_v19  ;;  %v9502_v9 = vld [vmem:[%s12172_s3 + $0x68] sm:$0xff]  }
 0x324   : > { %v10101_v48 = vpop.eup %10100 }
 0x325   : > { %v3665_v0 = vpack.c.bf16 %v11663_v24, %v11661_v29  ;;  %v3555_v31 = vadd.f32 %v10101_v48, %v12314_v39  ;;  %v3629_v40 = vmul.f32 0.25, %v3557_v58 }
 0x326   : > { %v10103_v21 = vpop.eup %10102 }
 0x327   : > { %v3558_v25 = vadd.f32 %v10103_v21, %v11339_v18  ;;  %8957 = vmatmul.mubr.msk.bf16.vlgmr.msra.gmra.mxu1 %vm3681_vm1, %v11502_v60  ;;  %v3627_v16 = vmul.f32 0.25, %v3555_v31  ;;  %v12315_v18 = vld [vmem:[#allocation22_spill] sm:$0xff] }
 0x328   : > { %v10105_v22 = vpop.eup %10104  ;;  %8961 = vmatpush3.bf16.msra.mxu1 %v9496_v35  ;;  %8962 = vmatprep.mubr.msk.bf16.mxu1 %vm3681_vm1, %v11438_v57 }
 0x329   : > { %v3630_v20 = vmul.f32 0.25, %v3558_v25  ;;  %v3556_v34 = vadd.f32 %v10105_v22, %v11343_v53  ;;  %8966 = vmatprep.subr.bf16.mxu1 %v9496_v35  ;;  %v9503_v25 = vld [vmem:[%s12172_s3 + $0x70] sm:$0xff]  }
 0x32a   : > { %v10107_v59 = vpop.eup %10106 }
 0x32b   : > { %v3628_v38 = vmul.f32 0.25, %v3556_v34  ;;  %v11677_v55 = vpack.c.bf16 %v3630_v20, %v3629_v40  ;;  %v3561_v44 = vadd.f32 %v10107_v59, %v12315_v18 }
 0x32c   : > { %v10109_v37 = vpop.eup %10108 }
 0x32d   : > { %v11683_v13 = vpack.c.bf16 %v3628_v38, %v3627_v16  ;;  %v3559_v27 = vadd.f32 %v10109_v37, %v12316_v43  ;;  %v11691_v36 = vmul.f32 0.25, %v3561_v44 }
 0x32e   : > { %v10111_v57 = vpop.eup %10110 }
 0x32f   : > { %v3562_v53 = vadd.f32 %v10111_v57, %v12317_v12  ;;  %8963 = vmatmul.mubr.msk.bf16.vlgmr.msra.gmra.mxu1 %vm3681_vm1, %v11434_v32  ;;  %v3631_v6 = vmul.f32 0.25, %v3559_v27 }
 0x330   : > { %v10113_v2 = vpop.eup %10112  ;;  %8967 = vmatpush3.bf16.msra.mxu1 %v9496_v35  ;;  %8968 = vmatprep.mubr.msk.bf16.mxu1 %vm3681_vm1, %v11502_v60  ;;  %v9498_v35 = vld [vmem:[%s12172_s3 + $0x48] sm:$0xff]  }
 0x331   : > { %v11693_v47 = vmul.f32 0.25, %v3562_v53  ;;  %v3560_v41 = vadd.f32 %v10113_v2, %v12318_v4  ;;  %8972 = vmatprep.subr.bf16.mxu1 %v9497_v11 }
 0x333   : > { %v3632_v42 = vmul.f32 0.25, %v3560_v41  ;;  %v3670_v45 = vpack.c.bf16 %v11693_v47, %v11691_v36 }
 0x335   : > { %v11698_v54 = vpack.c.bf16 %v3632_v42, %v3631_v6 }
 0x337   : > { %8969 = vmatmul.mubr.msk.bf16.vlgmr.msra.gmra.mxu1 %vm3681_vm1, %v11498_v26 }
 0x338   : > { %8973 = vmatpush3.bf16.msra.mxu1 %v9497_v11  ;;  %8974 = vmatprep.mubr.msk.bf16.mxu1 %vm3681_vm1, %v11434_v32  ;;  %v9499_v32 = vld [vmem:[%s12172_s3 + $0x50] sm:$0xff]  }
 0x339   : > { %8978 = vmatprep.subr.bf16.mxu1 %v9497_v11 }
 0x33f   : > { %8975 = vmatmul.mubr.msk.bf16.vlgmr.msra.gmra.mxu1 %vm3681_vm1, %v11461_v28 }
 0x340   : > { %8979 = vmatpush3.bf16.msra.mxu1 %v9497_v11  ;;  %8980 = vmatprep.mubr.msk.bf16.mxu1 %vm3681_vm1, %v11498_v26  ;;  %v9504_v11 = vld [vmem:[%s12172_s3 + $0x78] sm:$0xff]  }
 0x341   : > { %8984 = vmatprep.subr.bf16.mxu1 %v9498_v35 }
 0x347   : > { %8981 = vmatmul.mubr.msk.bf16.vlgmr.msra.gmra.mxu1 %vm3681_vm1, %v11525_v63 }
 0x348   : > { %8985 = vmatpush3.bf16.msra.mxu1 %v9498_v35  ;;  %8986 = vmatprep.mubr.msk.bf16.mxu1 %vm3681_vm1, %v11461_v28  ;;  %v9500_v28 = vld [vmem:[%s12172_s3 + $0x58] sm:$0xff]  }
 0x349   : > { %8990 = vmatprep.subr.bf16.mxu1 %v9498_v35 }
 0x34f   : > { %8987 = vmatmul.mubr.msk.bf16.vlgmr.msra.gmra.mxu1 %vm3681_vm1, %v11457_v52  ;;  %v9501_v52 = vld [vmem:[%s12172_s3 + $0x60] sm:$0xff]  }
 0x350   : > { %8991 = vmatpush3.bf16.msra.mxu1 %v9498_v35  ;;  %8992 = vmatprep.mubr.msk.bf16.mxu1 %vm3681_vm1, %v11525_v63 }
 0x351   : > { %8996 = vmatprep.subr.bf16.mxu1 %v9499_v32 }
 0x357   : > { %8993 = vmatmul.mubr.msk.bf16.vlgmr.msra.gmra.mxu1 %vm3681_vm1, %v11516_v7 }
 0x358   : > { %8997 = vmatpush3.bf16.msra.mxu1 %v9499_v32  ;;  %8998 = vmatprep.mubr.msk.bf16.mxu1 %vm3681_vm1, %v11484_v30 }
 0x359   : > { %9002 = vmatprep.subr.bf16.mxu1 %v9499_v32 }
 0x35f   : > { %8999 = vmatmul.mubr.msk.bf16.vlgmr.msra.gmra.mxu1 %vm3681_vm1, %v11475_v10 }
 0x360   : > { %9003 = vmatpush3.bf16.msra.mxu1 %v9499_v32  ;;  %9004 = vmatprep.mubr.msk.bf16.mxu1 %vm3681_vm1, %v11542_v51 }
 0x361   : > { %9008 = vmatprep.subr.bf16.mxu1 %v9500_v28 }
 0x367   : > { %9005 = vmatmul.mubr.msk.bf16.vlgmr.msra.gmra.mxu1 %vm3681_vm1, %v11539_v23 }
 0x368   : > { %9009 = vmatpush3.bf16.msra.mxu1 %v9500_v28  ;;  %9010 = vmatprep.mubr.msk.bf16.mxu1 %vm3681_vm1, %v11475_v10 }
 0x369   : > { %9014 = vmatprep.subr.bf16.mxu1 %v9500_v28 }
 0x36f   : > { %9011 = vmatmul.mubr.msk.bf16.vlgmr.msra.gmra.mxu1 %vm3681_vm1, %v11502_v60 }
 0x370   : > { %9015 = vmatpush3.bf16.msra.mxu1 %v9500_v28  ;;  %9016 = vmatprep.mubr.msk.bf16.mxu1 %vm3681_vm1, %v11539_v23 }
 0x371   : > { %9020 = vmatprep.subr.bf16.mxu1 %v9501_v52 }
 0x377   : > { %v8880_v30 = vpop.f32.mrf.mxu1  ;;  %9017 = vmatmul.mubr.msk.bf16.vlgmr.msra.gmra.mxu1 %vm3681_vm1, %v11565_v17 }
 0x378   : > { %9021 = vmatpush3.bf16.msra.mxu1 %v9501_v52  ;;  %9022 = vmatprep.mubr.msk.bf16.mxu1 %vm3681_vm1, %v11502_v60 }
 0x379   : > { %v3722_v10 = vpop.f32.mrf.mxu1  ;;  %9026 = vmatprep.subr.bf16.mxu1 %v9501_v52 }
 0x37b   : > { %v8881_v15 = vpop.f32.mrf.mxu1 }
 0x37d   : > { %v3725_v33 = vpop.f32.mrf.mxu1 }
 0x37f   : > { %v8886_v50 = vpop.f32.mrf.mxu1  ;;  %9023 = vmatmul.mubr.msk.bf16.vlgmr.msra.gmra.mxu1 %vm3681_vm1, %v11498_v26 }
 0x380   : > { %v3789_v48 = vadd.f32 %v8886_v50, %v8880_v30  ;;  %9027 = vmatpush3.bf16.msra.mxu1 %v9501_v52  ;;  %9028 = vmatprep.mubr.msk.bf16.mxu1 %vm3681_vm1, %v11565_v17  ;;  %v9505_v30 = vld [vmem:[%s12172_s3 + $0x80] sm:$0xff]  }
 0x381   : > { %v3780_v19 = vpop.f32.mrf.mxu1  ;;  %9032 = vmatprep.subr.bf16.mxu1 %v9502_v9 }
 0x382   : > { %v3781_v60 = vadd.f32 %v3780_v19, %v3722_v10 }
 0x383   : > { %v8887_v58 = vpop.f32.mrf.mxu1 }
 0x384   : > { %v3792_v21 = vadd.f32 %v8887_v58, %v8881_v15 }
 0x385   : > { %v3783_v39 = vpop.f32.mrf.mxu1 }
 0x386   : > { %v3784_v31 = vadd.f32 %v3783_v39, %v3725_v33 }
 0x387   : > { %9029 = vmatmul.mubr.msk.bf16.vlgmr.msra.gmra.mxu1 %vm3681_vm1, %v11557_v1 }
 0x388   : > { %9033 = vmatpush3.bf16.msra.mxu1 %v9502_v9  ;;  %9034 = vmatprep.mubr.msk.bf16.mxu1 %vm3681_vm1, %v11498_v26 }
 0x389   : > { %9038 = vmatprep.subr.bf16.mxu1 %v9502_v9 }
 0x38f   : > { %v8892_v22 = vpop.f32.mrf.mxu1  ;;  %9035 = vmatmul.mubr.msk.bf16.vlgmr.msra.gmra.mxu1 %vm3681_vm1, %v11525_v63 }
 0x390   : > { %9039 = vmatpush3.bf16.msra.mxu1 %v9502_v9  ;;  %9040 = vmatprep.mubr.msk.bf16.mxu1 %vm3681_vm1, %v11557_v1 }
 0x391   : > { %v3835_v40 = vpop.f32.mrf.mxu1  ;;  %9044 = vmatprep.subr.bf16.mxu1 %v9503_v25 }
 0x393   : > { %v8893_v20 = vpop.f32.mrf.mxu1 }
 0x395   : > { %v3838_v34 = vpop.f32.mrf.mxu1 }
 0x397   : > { %v8898_v59 = vpop.f32.mrf.mxu1  ;;  %9041 = vmatmul.mubr.msk.bf16.vlgmr.msra.gmra.mxu1 %vm3681_vm1, %v11585_v5 }
 0x398   : > { %v3896_v26 = vadd.f32 %v8898_v59, %v8892_v22  ;;  %9045 = vmatpush3.bf16.msra.mxu1 %v9503_v25  ;;  %9046 = vmatprep.mubr.msk.bf16.mxu1 %vm3681_vm1, %v11525_v63 }
 0x399   : > { %v3887_v16 = vpop.f32.mrf.mxu1  ;;  %9050 = vmatprep.subr.bf16.mxu1 %v9503_v25 }
 0x39a   : > { %v3888_v38 = vadd.f32 %v3887_v16, %v3835_v40 }
 0x39b   : > { %v8899_v37 = vpop.f32.mrf.mxu1 }
 0x39c   : > { %v3899_v18 = vadd.f32 %v8899_v37, %v8893_v20  ;;  %v9506_v20 = vld [vmem:[%s12172_s3 + $0x88] sm:$0xff]  }
 0x39d   : > { %v3890_v44 = vpop.f32.mrf.mxu1 }
 0x39e   : > { %v3891_v57 = vadd.f32 %v3890_v44, %v3838_v34 }
 0x39f   : > { %v8904_v43 = vpop.f32.mrf.mxu1  ;;  %9047 = vmatmul.mubr.msk.bf16.vlgmr.msra.gmra.mxu1 %vm3681_vm1, %v11516_v7 }
 0x3a0   : > { %v3964_v27 = vadd.f32 %v8904_v43, %v3789_v48  ;;  %9051 = vmatpush3.bf16.msra.mxu1 %v9503_v25  ;;  %9052 = vmatprep.mubr.msk.bf16.mxu1 %vm3681_vm1, %v11585_v5 }
 0x3a1   : > { %v3947_v63 = vpop.f32.mrf.mxu1  ;;  %9056 = vmatprep.subr.bf16.mxu1 %v9504_v11 }
 0x3a2   : > { %v3962_v12 = vadd.f32 %v3947_v63, %v3781_v60 }
 0x3a3   : > { %v8905_v53 = vpop.f32.mrf.mxu1 }
 0x3a4   : > { %v3965_v2 = vadd.f32 %v8905_v53, %v3792_v21 }
 0x3a5   : > { %v3950_v4 = vpop.f32.mrf.mxu1 }
 0x3a6   : > { %v3963_v41 = vadd.f32 %v3950_v4, %v3784_v31 }
 0x3a7   : > { %v8910_v6 = vpop.f32.mrf.mxu1  ;;  %9053 = vmatmul.mubr.msk.bf16.vlgmr.msra.gmra.mxu1 %vm3681_vm1, %v11582_v61 }
 0x3a8   : > { %v4020_v42 = vadd.f32 %v8910_v6, %v3896_v26  ;;  %9057 = vmatpush3.bf16.msra.mxu1 %v9504_v11  ;;  %9058 = vmatprep.mubr.msk.bf16.mxu1 %vm3681_vm1, %v11542_v51 }
 0x3a9   : > { %v4003_v7 = vpop.f32.mrf.mxu1  ;;  %9062 = vmatprep.subr.bf16.mxu1 %v9504_v11 }
 0x3aa   : > { %v4018_v35 = vadd.f32 %v4003_v7, %v3888_v38 }
 0x3ab   : > { %v8911_v32 = vpop.f32.mrf.mxu1 }
 0x3ac   : > { %v4021_v28 = vadd.f32 %v8911_v32, %v3899_v18 }
 0x3ad   : > { %v4006_v52 = vpop.f32.mrf.mxu1 }
 0x3ae   : > { %v4019_v10 = vadd.f32 %v4006_v52, %v3891_v57 }
 0x3af   : > { %v8916_v15 = vpop.f32.mrf.mxu1  ;;  %9059 = vmatmul.mubr.msk.bf16.vlgmr.msra.gmra.mxu1 %vm3681_vm1, %v11539_v23 }
 0x3b0   : > { %v4084_v33 = vadd.f32 %v8916_v15, %v3964_v27  ;;  %9063 = vmatpush3.bf16.msra.mxu1 %v9504_v11  ;;  %9064 = vmatprep.mubr.msk.bf16.mxu1 %vm3681_vm1, %v11609_v49 }
 0x3b1   : > { %v4067_v51 = vpop.f32.mrf.mxu1  ;;  %9068 = vmatprep.subr.bf16.mxu1 %v9505_v30 }
 0x3b2   : > { %v4082_v9 = vadd.f32 %v4067_v51, %v3962_v12 }
 0x3b3   : > { %v8917_v50 = vpop.f32.mrf.mxu1 }
 0x3b4   : > { %v4085_v48 = vadd.f32 %v8917_v50, %v3965_v2  ;;  %v9507_v2 = vld [vmem:[%s12172_s3 + $0x90] sm:$0xff]   ;;  %v9508_v50 = vld [vmem:[%s12172_s3 + $0x98] sm:$0xff]  }
 0x3b5   : > { %v4070_v19 = vpop.f32.mrf.mxu1 }
 0x3b6   : > { %v4083_v60 = vadd.f32 %v4070_v19, %v3963_v41 }
 0x3b7   : > { %v8922_v58 = vpop.f32.mrf.mxu1  ;;  %9065 = vmatmul.mubr.msk.bf16.vlgmr.msra.gmra.mxu1 %vm3681_vm1, %v11600_v62 }
 0x3b8   : > { %v4140_v21 = vadd.f32 %v8922_v58, %v4020_v42  ;;  %9069 = vmatpush3.bf16.msra.mxu1 %v9505_v30  ;;  %9070 = vmatprep.mubr.msk.bf16.mxu1 %vm3681_vm1, %v11539_v23 }
 0x3b9   : > { %v4123_v39 = vpop.f32.mrf.mxu1  ;;  %9074 = vmatprep.subr.bf16.mxu1 %v9505_v30 }
 0x3ba   : > { %v4138_v31 = vadd.f32 %v4123_v39, %v4018_v35 }
 0x3bb   : > { %v8923_v25 = vpop.f32.mrf.mxu1 }
 0x3bc   : > { %v4141_v22 = vadd.f32 %v8923_v25, %v4021_v28 }
 0x3bd   : > { %v4126_v40 = vpop.f32.mrf.mxu1 }
 0x3be   : > { %v4139_v34 = vadd.f32 %v4126_v40, %v4019_v10 }
 0x3bf   : > { %v8928_v59 = vpop.f32.mrf.mxu1  ;;  %9071 = vmatmul.mubr.msk.bf16.vlgmr.msra.gmra.mxu1 %vm3681_vm1, %v11565_v17 }
 0x3c0   : > { %v4204_v26 = vadd.f32 %v8928_v59, %v4084_v33  ;;  %9075 = vmatpush3.bf16.msra.mxu1 %v9505_v30  ;;  %9076 = vmatprep.mubr.msk.bf16.mxu1 %vm3681_vm1, %v11600_v62 }
 0x3c1   : > { %v4187_v23 = vpop.f32.mrf.mxu1  ;;  %9080 = vmatprep.subr.bf16.mxu1 %v9506_v20 }
 0x3c2   : > { %v4202_v16 = vadd.f32 %v4187_v23, %v4082_v9 }
 0x3c3   : > { %v8929_v38 = vpop.f32.mrf.mxu1 }
 0x3c4   : > { %v4205_v37 = vadd.f32 %v8929_v38, %v4085_v48 }
 0x3c5   : > { %v4190_v18 = vpop.f32.mrf.mxu1 }
 0x3c6   : > { %v4203_v44 = vadd.f32 %v4190_v18, %v4083_v60 }
 0x3c7   : > { %v8934_v11 = vpop.f32.mrf.mxu1  ;;  %9077 = vmatmul.mubr.msk.bf16.vlgmr.msra.gmra.mxu1 %vm3681_vm1, %v11627_v8 }
 0x3c8   : > { %v4260_v57 = vadd.f32 %v8934_v11, %v4140_v21  ;;  %9081 = vmatpush3.bf16.msra.mxu1 %v9506_v20  ;;  %9082 = vmatprep.mubr.msk.bf16.mxu1 %vm3681_vm1, %v11565_v17 }
 0x3c9   : > { %v4243_v43 = vpop.f32.mrf.mxu1  ;;  %9086 = vmatprep.subr.bf16.mxu1 %v9506_v20 }
 0x3ca   : > { %v4258_v27 = vadd.f32 %v4243_v43, %v4138_v31 }
 0x3cb   : > { %v8935_v63 = vpop.f32.mrf.mxu1 }
 0x3cc   : > { %v4261_v12 = vadd.f32 %v8935_v63, %v4141_v22 }
 0x3cd   : > { %v4246_v53 = vpop.f32.mrf.mxu1 }
 0x3ce   : > { %v4259_v4 = vadd.f32 %v4246_v53, %v4139_v34 }
 0x3cf   : > { %v8940_v41 = vpop.f32.mrf.mxu1  ;;  %9083 = vmatmul.mubr.msk.bf16.vlgmr.msra.gmra.mxu1 %vm3681_vm1, %v11557_v1 }
 0x3d0   : > { %v4321_v6 = vadd.f32 %v8940_v41, %v4204_v26  ;;  %9087 = vmatpush3.bf16.msra.mxu1 %v9506_v20  ;;  %9088 = vmatprep.mubr.msk.bf16.mxu1 %vm3681_vm1, %v11627_v8 }
 0x3d1   : > { %v4304_v17 = vpop.f32.mrf.mxu1  ;;  %9092 = vmatprep.subr.bf16.mxu1 %v9507_v2 }
 0x3d2   : > { %v4319_v42 = vadd.f32 %v4304_v17, %v4202_v16  ;;  %v9509_v16 = vld [vmem:[%s12172_s3 + $0xa0] sm:$0xff]  }
 0x3d3   : > { %v8941_v7 = vpop.f32.mrf.mxu1 }
 0x3d4   : > { %v4322_v35 = vadd.f32 %v8941_v7, %v4205_v37 }
 0x3d5   : > { %v4307_v32 = vpop.f32.mrf.mxu1 }
 0x3d6   : > { %v4320_v28 = vadd.f32 %v4307_v32, %v4203_v44 }
 0x3d7   : > { %v8946_v52 = vpop.f32.mrf.mxu1  ;;  %9089 = vmatmul.mubr.msk.bf16.vlgmr.msra.gmra.mxu1 %vm3681_vm1, %v11623_v14 }
 0x3d8   : > { %v4380_v30 = vadd.f32 %v8946_v52, %v4260_v57  ;;  %9093 = vmatpush3.bf16.msra.mxu1 %v9507_v2  ;;  %9094 = vmatprep.mubr.msk.bf16.mxu1 %vm3681_vm1, %v11557_v1 }
 0x3d9   : > { %v4363_v10 = vpop.f32.mrf.mxu1  ;;  %9098 = vmatprep.subr.bf16.mxu1 %v9507_v2 }
 0x3da   : > { %v4378_v15 = vadd.f32 %v4363_v10, %v4258_v27 }
 0x3db   : > { %v8947_v33 = vpop.f32.mrf.mxu1 }
 0x3dc   : > { %v4381_v51 = vadd.f32 %v8947_v33, %v4261_v12 }
 0x3dd   : > { %v4366_v9 = vpop.f32.mrf.mxu1 }
 0x3de   : > { %v4379_v48 = vadd.f32 %v4366_v9, %v4259_v4  ;;  %v9511_v9 = vld [vmem:[%s12172_s3 + $0xb0] sm:$0xff]  }
 0x3df   : > { %v8952_v19 = vpop.f32.mrf.mxu1  ;;  %9095 = vmatmul.mubr.msk.bf16.vlgmr.msra.gmra.mxu1 %vm3681_vm1, %v11585_v5 }
 0x3e0   : > { %v4441_v60 = vadd.f32 %v8952_v19, %v4321_v6  ;;  %9099 = vmatpush3.bf16.msra.mxu1 %v9507_v2  ;;  %9100 = vmatprep.mubr.msk.bf16.mxu1 %vm3681_vm1, %v11623_v14  ;;  %v9510_v6 = vld [vmem:[%s12172_s3 + $0xa8] sm:$0xff]  }
 0x3e1   : > { %v4424_v1 = vpop.f32.mrf.mxu1  ;;  %9104 = vmatprep.subr.bf16.mxu1 %v9508_v50 }
 0x3e2   : > { %v4439_v58 = vadd.f32 %v4424_v1, %v4319_v42 }
 0x3e3   : > { %v8953_v21 = vpop.f32.mrf.mxu1 }
 0x3e4   : > { %v4442_v39 = vadd.f32 %v8953_v21, %v4322_v35 }
 0x3e5   : > { %v4427_v31 = vpop.f32.mrf.mxu1 }
 0x3e6   : > { %v4440_v25 = vadd.f32 %v4427_v31, %v4320_v28 }
 0x3e7   : > { %v8958_v22 = vpop.f32.mrf.mxu1  ;;  %9101 = vmatmul.mubr.msk.bf16.vlgmr.msra.gmra.mxu1 %vm3681_vm1, %v11648_v56 }
 0x3e8   : > { %v4497_v40 = vadd.f32 %v8958_v22, %v4380_v30  ;;  %9105 = vmatpush3.bf16.msra.mxu1 %v9508_v50  ;;  %9106 = vmatprep.mubr.msk.bf16.mxu1 %vm3681_vm1, %v11585_v5 }
 0x3e9   : > { %v4480_v20 = vpop.f32.mrf.mxu1  ;;  %9110 = vmatprep.subr.bf16.mxu1 %v9508_v50 }
 0x3ea   : > { %v4495_v34 = vadd.f32 %v4480_v20, %v4378_v15 }
 0x3eb   : > { %v8959_v59 = vpop.f32.mrf.mxu1 }
 0x3ec   : > { %v4498_v26 = vadd.f32 %v8959_v59, %v4381_v51  ;;  %v9512_v59 = vld [vmem:[%s12172_s3 + $0xb8] sm:$0xff]  }
 0x3ed   : > { %v4483_v23 = vpop.f32.mrf.mxu1 }
 0x3ee   : > { %v4496_v38 = vadd.f32 %v4483_v23, %v4379_v48 }
 0x3ef   : > { %v8964_v37 = vpop.f32.mrf.mxu1  ;;  %9107 = vmatmul.mubr.msk.bf16.vlgmr.msra.gmra.mxu1 %vm3681_vm1, %v11582_v61 }
 0x3f0   : > { %v4558_v18 = vadd.f32 %v8964_v37, %v4441_v60  ;;  %9111 = vmatpush3.bf16.msra.mxu1 %v9508_v50  ;;  %9112 = vmatprep.mubr.msk.bf16.mxu1 %vm3681_vm1, %v11648_v56 }
 0x3f1   : > { %v4541_v5 = vpop.f32.mrf.mxu1  ;;  %9116 = vmatprep.subr.bf16.mxu1 %v9509_v16 }
 0x3f2   : > { %v4556_v44 = vadd.f32 %v4541_v5, %v4439_v58 }
 0x3f3   : > { %v8965_v11 = vpop.f32.mrf.mxu1 }
 0x3f4   : > { %v4559_v57 = vadd.f32 %v8965_v11, %v4442_v39 }
 0x3f5   : > { %v4544_v43 = vpop.f32.mrf.mxu1 }
 0x3f6   : > { %v4557_v27 = vadd.f32 %v4544_v43, %v4440_v25 }
 0x3f7   : > { %v8970_v63 = vpop.f32.mrf.mxu1  ;;  %9113 = vmatmul.mubr.msk.bf16.vlgmr.msra.gmra.mxu1 %vm3681_vm1, %v11642_v3 }
 0x3f8   : > { %v4614_v12 = vadd.f32 %v8970_v63, %v4497_v40  ;;  %9117 = vmatpush3.bf16.msra.mxu1 %v9509_v16  ;;  %9118 = vmatprep.mubr.msk.bf16.mxu1 %vm3681_vm1, %v11609_v49 }
 0x3f9   : > { %v4597_v61 = vpop.f32.mrf.mxu1  ;;  %9122 = vmatprep.subr.bf16.mxu1 %v9509_v16 }
 0x3fa   : > { %v4612_v53 = vadd.f32 %v4597_v61, %v4495_v34  ;;  %v9513_v61 = vld [vmem:[%s12172_s3 + $0xc0] sm:$0xff]  }
 0x3fb   : > { %v8971_v2 = vpop.f32.mrf.mxu1 }
 0x3fc   : > { %v4615_v4 = vadd.f32 %v8971_v2, %v4498_v26 }
 0x3fd   : > { %v4600_v41 = vpop.f32.mrf.mxu1 }
 0x3fe   : > { %v4613_v17 = vadd.f32 %v4600_v41, %v4496_v38 }
 0x3ff   : > { %v8976_v42 = vpop.f32.mrf.mxu1  ;;  %9119 = vmatmul.mubr.msk.bf16.vlgmr.msra.gmra.mxu1 %vm3681_vm1, %v11600_v62 }
 0x400   : > { %v4675_v7 = vadd.f32 %v8976_v42, %v4558_v18  ;;  %9123 = vmatpush3.bf16.msra.mxu1 %v9509_v16  ;;  %9124 = vmatprep.mubr.msk.bf16.mxu1 %vm3681_vm1, %v3665_v0 }
 0x401   : > { %v4658_v49 = vpop.f32.mrf.mxu1  ;;  %9128 = vmatprep.subr.bf16.mxu1 %v9510_v6 }
 0x402   : > { %v4673_v35 = vadd.f32 %v4658_v49, %v4556_v44 }
 0x403   : > { %v8977_v32 = vpop.f32.mrf.mxu1 }
 0x404   : > { %v4676_v28 = vadd.f32 %v8977_v32, %v4559_v57 }
 0x405   : > { %v4661_v52 = vpop.f32.mrf.mxu1 }
 0x406   : > { %v4674_v30 = vadd.f32 %v4661_v52, %v4557_v27 }
 0x407   : > { %v8982_v10 = vpop.f32.mrf.mxu1  ;;  %9125 = vmatmul.mubr.msk.bf16.vlgmr.msra.gmra.mxu1 %vm3681_vm1, %v11665_v46 }
 0x408   : > { %v4731_v15 = vadd.f32 %v8982_v10, %v4614_v12  ;;  %9129 = vmatpush3.bf16.msra.mxu1 %v9510_v6  ;;  %9130 = vmatprep.mubr.msk.bf16.mxu1 %vm3681_vm1, %v11600_v62 }
 0x409   : > { %v4714_v33 = vpop.f32.mrf.mxu1  ;;  %9134 = vmatprep.subr.bf16.mxu1 %v9510_v6 }
 0x40a   : > { %v4729_v29 = vadd.f32 %v4714_v33, %v4612_v53 }
 0x40b   : > { %v8983_v24 = vpop.f32.mrf.mxu1 }
 0x40c   : > { %v4732_v0 = vadd.f32 %v8983_v24, %v4615_v4 }
 0x40d   : > { %v4717_v51 = vpop.f32.mrf.mxu1 }
 0x40e   : > { %v4730_v50 = vadd.f32 %v4717_v51, %v4613_v17 }
 0x40f   : > { %v8988_v48 = vpop.f32.mrf.mxu1  ;;  %9131 = vmatmul.mubr.msk.bf16.vlgmr.msra.gmra.mxu1 %vm3681_vm1, %v11627_v8 }
 0x410   : > { %v4792_v19 = vadd.f32 %v8988_v48, %v4675_v7  ;;  %9135 = vmatpush3.bf16.msra.mxu1 %v9510_v6  ;;  %9136 = vmatprep.mubr.msk.bf16.mxu1 %vm3681_vm1, %v11665_v46 }
 0x411   : > { %v4775_v62 = vpop.f32.mrf.mxu1  ;;  %9140 = vmatprep.subr.bf16.mxu1 %v9511_v9 }
 0x412   : > { %v4790_v60 = vadd.f32 %v4775_v62, %v4673_v35 }
 0x413   : > { %v8989_v1 = vpop.f32.mrf.mxu1 }
 0x414   : > { %v4793_v58 = vadd.f32 %v8989_v1, %v4676_v28 }
 0x415   : > { %v4778_v21 = vpop.f32.mrf.mxu1 }
 0x416   : > { %v4791_v39 = vadd.f32 %v4778_v21, %v4674_v30 }
 0x417   : > { %v8994_v31 = vpop.f32.mrf.mxu1  ;;  %9137 = vmatmul.mubr.msk.bf16.vlgmr.msra.gmra.mxu1 %vm3681_vm1, %v11683_v13 }
 0x418   : > { %v4848_v25 = vadd.f32 %v8994_v31, %v4731_v15  ;;  %9141 = vmatpush3.bf16.msra.mxu1 %v9511_v9  ;;  %9142 = vmatprep.mubr.msk.bf16.mxu1 %vm3681_vm1, %v11627_v8 }
 0x419   : > { %v4831_v22 = vpop.f32.mrf.mxu1  ;;  %9146 = vmatprep.subr.bf16.mxu1 %v9511_v9 }
 0x41a   : > { %v4846_v40 = vadd.f32 %v4831_v22, %v4729_v29 }
 0x41b   : > { %v8995_v46 = vpop.f32.mrf.mxu1 }
 0x41c   : > { %v4849_v20 = vadd.f32 %v8995_v46, %v4732_v0 }
 0x41d   : > { %v4834_v34 = vpop.f32.mrf.mxu1 }
 0x41e   : > { %v4847_v26 = vadd.f32 %v4834_v34, %v4730_v50 }
 0x41f   : > { %v9000_v23 = vpop.f32.mrf.mxu1  ;;  %9143 = vmatmul.mubr.msk.bf16.vlgmr.msra.gmra.mxu1 %vm3681_vm1, %v11623_v14 }
 0x420   : > { %v4909_v16 = vadd.f32 %v9000_v23, %v4792_v19  ;;  %9147 = vmatpush3.bf16.msra.mxu1 %v9511_v9  ;;  %9148 = vmatprep.mubr.msk.bf16.mxu1 %vm3681_vm1, %v11683_v13 }
 0x421   : > { %v4892_v8 = vpop.f32.mrf.mxu1  ;;  %9152 = vmatprep.subr.bf16.mxu1 %v9512_v59 }
 0x422   : > { %v4907_v38 = vadd.f32 %v4892_v8, %v4790_v60 }
 0x423   : > { %v9001_v37 = vpop.f32.mrf.mxu1 }
 0x424   : > { %v4910_v18 = vadd.f32 %v9001_v37, %v4793_v58 }
 0x425   : > { %v4895_v5 = vpop.f32.mrf.mxu1 }
 0x426   : > { %v11867_v44 = vadd.f32 %v4895_v5, %v4791_v39 }
 0x427   : > { %v9006_v11 = vpop.f32.mrf.mxu1  ;;  %9149 = vmatmul.mubr.msk.bf16.vlgmr.msra.gmra.mxu1 %vm3681_vm1, %v11677_v55 }
 0x428   : > { %v4968_v57 = vadd.f32 %v9006_v11, %v4848_v25  ;;  %9153 = vmatpush3.bf16.msra.mxu1 %v9512_v59  ;;  %9154 = vmatprep.mubr.msk.bf16.mxu1 %vm3681_vm1, %v11623_v14 }
 0x429   : > { %v4951_v43 = vpop.f32.mrf.mxu1  ;;  %9158 = vmatprep.subr.bf16.mxu1 %v9512_v59 }
 0x42a   : > { %v4966_v13 = vadd.f32 %v4951_v43, %v4846_v40 }
 0x42b   : > { %v9007_v27 = vpop.f32.mrf.mxu1 }
 0x42c   : > { %v4969_v63 = vadd.f32 %v9007_v27, %v4849_v20 }
 0x42d   : > { %v4954_v12 = vpop.f32.mrf.mxu1 }
 0x42e   : > { %v11876_v53 = vadd.f32 %v4954_v12, %v4847_v26 }
 0x42f   : > { %v9012_v2 = vpop.f32.mrf.mxu1  ;;  %9155 = vmatmul.mubr.msk.bf16.vlgmr.msra.gmra.mxu1 %vm3681_vm1, %v11648_v56 }
 0x430   : > { %v5029_v4 = vadd.f32 %v9012_v2, %v4909_v16  ;;  %9159 = vmatpush3.bf16.msra.mxu1 %v9512_v59  ;;  %9160 = vmatprep.mubr.msk.bf16.mxu1 %vm3681_vm1, %v11677_v55 }
 0x431   : > { %v5012_v14 = vpop.f32.mrf.mxu1  ;;  %9164 = vmatprep.subr.bf16.mxu1 %v9513_v61 }
 0x432   : > { %v5027_v41 = vadd.f32 %v5012_v14, %v4907_v38 }
 0x433   : > { %v9013_v6 = vpop.f32.mrf.mxu1 }
 0x434   : > { %v5030_v17 = vadd.f32 %v9013_v6, %v4910_v18 }
 0x435   : > { %v11882_v42 = vpop.f32.mrf.mxu1 }
 0x437   : > { %v9018_v7 = vpop.f32.mrf.mxu1  ;;  %9161 = vmatmul.mubr.msk.bf16.vlgmr.msra.gmra.mxu1 %vm3681_vm1, %v11698_v54 }
 0x438   : > { %v5085_v49 = vadd.f32 %v9018_v7, %v4968_v57  ;;  %9165 = vmatpush3.bf16.msra.mxu1 %v9513_v61  ;;  %9166 = vmatprep.mubr.msk.bf16.mxu1 %vm3681_vm1, %v11648_v56 }
 0x439   : > { %v5068_v35 = vpop.f32.mrf.mxu1  ;;  %9170 = vmatprep.subr.bf16.mxu1 %v9513_v61 }
 0x43a   : > { %v5083_v32 = vadd.f32 %v5068_v35, %v4966_v13 }
 0x43b   : > { %v9019_v55 = vpop.f32.mrf.mxu1 }
 0x43c   : > { %v5086_v28 = vadd.f32 %v9019_v55, %v4969_v63 }
 0x43d   : > { %v11888_v52 = vpop.f32.mrf.mxu1 }
 0x43f   : > { %v9024_v30 = vpop.f32.mrf.mxu1  ;;  %9167 = vmatmul.mubr.msk.bf16.vlgmr.msra.gmra.mxu1 %vm3681_vm1, %v11642_v3 }
 0x440   : > { %v5146_v10 = vadd.f32 %v9024_v30, %v5029_v4  ;;  %9171 = vmatpush3.bf16.msra.mxu1 %v9513_v61  ;;  %9172 = vmatprep.mubr.msk.bf16.mxu1 %vm3681_vm1, %v11698_v54 }
 0x441   : > { %v5129_v15 = vpop.f32.mrf.mxu1 }
 0x442   : > { %v5144_v33 = vadd.f32 %v5129_v15, %v5027_v41 }
 0x443   : > { %v9025_v29 = vpop.f32.mrf.mxu1 }
 0x444   : > { %v5147_v56 = vadd.f32 %v9025_v29, %v5030_v17 }
 0x445   : > { %v11894_v24 = vpop.f32.mrf.mxu1 }
 0x447   : > { %v9030_v0 = vpop.f32.mrf.mxu1  ;;  %9173 = vmatmul.mubr.msk.bf16.vlgmr.msra.gmra.mxu1 %vm3681_vm1, %v3670_v45 }
 0x448   : > { %v5202_v51 = vadd.f32 %v9030_v0, %v5085_v49 }
 0x449   : > { %v5185_v9 = vpop.f32.mrf.mxu1 }
 0x44a   : > { %v5200_v3 = vadd.f32 %v5185_v9, %v5083_v32 }
 0x44b   : > { %v9031_v50 = vpop.f32.mrf.mxu1 }
 0x44c   : > { %v5203_v48 = vadd.f32 %v9031_v50, %v5086_v28 }
 0x44d   : > { %v11900_v19 = vpop.f32.mrf.mxu1 }
 0x44f   : > { %v9036_v54 = vpop.f32.mrf.mxu1 }
 0x450   : > { %v5263_v62 = vadd.f32 %v9036_v54, %v5146_v10 }
 0x451   : > { %v5246_v60 = vpop.f32.mrf.mxu1 }
 0x452   : > { %v5261_v1 = vadd.f32 %v5246_v60, %v5144_v33 }
 0x453   : > { %v9037_v58 = vpop.f32.mrf.mxu1 }
 0x454   : > { %v5264_v21 = vadd.f32 %v9037_v58, %v5147_v56 }
 0x455   : > { %v11902_v39 = vpop.f32.mrf.mxu1 }
 0x457   : > { %v9042_v31 = vpop.f32.mrf.mxu1 }
 0x458   : > { %v5319_v25 = vadd.f32 %v9042_v31, %v5202_v51 }
 0x459   : > { %v5302_v36 = vpop.f32.mrf.mxu1 }
 0x45a   : > { %v5317_v47 = vadd.f32 %v5302_v36, %v5200_v3 }
 0x45b   : > { %v9043_v45 = vpop.f32.mrf.mxu1 }
 0x45c   : > { %v5320_v22 = vadd.f32 %v9043_v45, %v5203_v48 }
 0x45d   : > { %v11904_v40 = vpop.f32.mrf.mxu1 }
 0x45f   : > { %v9048_v46 = vpop.f32.mrf.mxu1 }
 0x460   : > { %v5380_v20 = vadd.f32 %v9048_v46, %v5263_v62 }
 0x461   : > { %v5363_v34 = vpop.f32.mrf.mxu1 }
 0x462   : > { %v5378_v59 = vadd.f32 %v5363_v34, %v5261_v1  ;;  %v9514_v34 = vld [vmem:[%s12174_s5] sm:$0xff]  }
 0x463   : > { %v9049_v26 = vpop.f32.mrf.mxu1 }
 0x464   : > { %v5381_v23 = vadd.f32 %v9049_v26, %v5264_v21  ;;  %v10149_v26 = vmov 0.0  }
 0x465   : > { %v11906_v16 = vpop.f32.mrf.mxu1  ;;  %9176 = vmatprep.subr.bf16.mxu1 %v10149_v26  ;;  %9178 = vmatprep.mubr.msk.bf16.mxu1 %vm10150_vm2, %v10149_v26 }
 0x466   : > { %9177 = vmatpush3.bf16.msra.mxu1 %v9514_v34 }
 0x467   : > { %v9054_v8 = vpop.f32.mrf.mxu1  ;;  %9182 = vmatprep.subr.bf16.mxu1 %v10149_v26 }
 0x468   : > { %v5436_v38 = vadd.f32 %v9054_v8, %v5319_v25 }
 0x469   : > { %v5419_v37 = vpop.f32.mrf.mxu1 }
 0x46a   : > { %v5434_v18 = vadd.f32 %v5419_v37, %v5317_v47 }
 0x46b   : > { %v9055_v5 = vpop.f32.mrf.mxu1 }
 0x46c   : > { %v5437_v11 = vadd.f32 %v9055_v5, %v5320_v22 }
 0x46d   : > { %v11908_v57 = vpop.f32.mrf.mxu1 }
 0x46f   : > { %v9060_v43 = vpop.f32.mrf.mxu1 }
 0x470   : > { %v5497_v13 = vadd.f32 %v9060_v43, %v5380_v20 }
 0x471   : > { %v5480_v27 = vpop.f32.mrf.mxu1 }
 0x472   : > { %v5495_v63 = vadd.f32 %v5480_v27, %v5378_v59 }
 0x473   : > { %v9061_v12 = vpop.f32.mrf.mxu1 }
 0x474   : > { %v5498_v61 = vadd.f32 %v9061_v12, %v5381_v23  ;;  %v5084_v12 = vadd.f32 %v11888_v52, %v11876_v53 }
 0x475   : > { %v11910_v2 = vpop.f32.mrf.mxu1 }
 0x477   : > { %v9066_v4 = vpop.f32.mrf.mxu1 }
 0x478   : > { %v5556_v14 = vadd.f32 %v9066_v4, %v5436_v38  ;;  %v5201_v4 = vadd.f32 %v11900_v19, %v5084_v12 }
 0x479   : > { %v5539_v41 = vpop.f32.mrf.mxu1 }
 0x47a   : > { %v5554_v6 = vadd.f32 %v5539_v41, %v5434_v18 }
 0x47b   : > { %v9067_v17 = vpop.f32.mrf.mxu1 }
 0x47c   : > { %v5557_v7 = vadd.f32 %v9067_v17, %v5437_v11 }
 0x47d   : > { %v11912_v49 = vpop.f32.mrf.mxu1 }
 0x47f   : > { %v9072_v35 = vpop.f32.mrf.mxu1 }
 0x480   : > { %v5617_v32 = vadd.f32 %v9072_v35, %v5497_v13  ;;  %v5028_v35 = vadd.f32 %v11882_v42, %v11867_v44 }
 0x481   : > { %v5600_v55 = vpop.f32.mrf.mxu1 }
 0x482   : > { %v5615_v28 = vadd.f32 %v5600_v55, %v5495_v63 }
 0x483   : > { %v9073_v30 = vpop.f32.mrf.mxu1 }
 0x484   : > { %v5618_v10 = vadd.f32 %v9073_v30, %v5498_v61  ;;  %v5145_v30 = vadd.f32 %v11894_v24, %v5028_v35 }
 0x485   : > { %v11914_v15 = vpop.f32.mrf.mxu1 }
 0x486   : > { %v5262_v19 = vadd.f32 %v11902_v39, %v5145_v30 }
 0x487   : > { %v9078_v33 = vpop.f32.mrf.mxu1 }
 0x488   : > { %v5673_v29 = vadd.f32 %v9078_v33, %v5556_v14 }
 0x489   : > { %v5656_v56 = vpop.f32.mrf.mxu1 }
 0x48a   : > { %v5671_v0 = vadd.f32 %v5656_v56, %v5554_v6  ;;  %v5318_v6 = vadd.f32 %v11904_v40, %v5201_v4 }
 0x48b   : > { %v9079_v51 = vpop.f32.mrf.mxu1 }
 0x48c   : > { %v5674_v9 = vadd.f32 %v9079_v51, %v5557_v7 }
 0x48d   : > { %v5659_v3 = vpop.f32.mrf.mxu1 }
 0x48f   : > { %v9084_v50 = vpop.f32.mrf.mxu1 }
 0x490   : > { %v5734_v48 = vadd.f32 %v9084_v50, %v5617_v32  ;;  %v5435_v32 = vadd.f32 %v11908_v57, %v5318_v6 }
 0x491   : > { %v5717_v54 = vpop.f32.mrf.mxu1 }
 0x492   : > { %v5732_v62 = vadd.f32 %v5717_v54, %v5615_v28  ;;  %v5555_v53 = vadd.f32 %v11912_v49, %v5435_v32 }
 0x493   : > { %v9085_v60 = vpop.f32.mrf.mxu1 }
 0x494   : > { %v5735_v1 = vadd.f32 %v9085_v60, %v5618_v10  ;;  %v5672_v10 = vadd.f32 %v5659_v3, %v5555_v53 }
 0x495   : > { %v5720_v58 = vpop.f32.mrf.mxu1 }
 0x497   : > { %v9090_v21 = vpop.f32.mrf.mxu1 }
 0x498   : > { %v5790_v31 = vadd.f32 %v9090_v21, %v5673_v29  ;;  %v5379_v29 = vadd.f32 %v11906_v16, %v5262_v19 }
 0x499   : > { %v5773_v25 = vpop.f32.mrf.mxu1 }
 0x49a   : > { %v5788_v36 = vadd.f32 %v5773_v25, %v5671_v0  ;;  %v5496_v42 = vadd.f32 %v11910_v2, %v5379_v29 }
 0x49b   : > { %v9091_v47 = vpop.f32.mrf.mxu1 }
 0x49c   : > { %v5791_v45 = vadd.f32 %v9091_v47, %v5674_v9  ;;  %v5616_v24 = vadd.f32 %v11914_v15, %v5496_v42 }
 0x49d   : > { %v5776_v22 = vpop.f32.mrf.mxu1 }
 0x49e   : > { %v5789_v56 = vadd.f32 %v5776_v22, %v5672_v10  ;;  %v5733_v50 = vadd.f32 %v5720_v58, %v5616_v24 }
 0x49f   : > { %v9096_v46 = vpop.f32.mrf.mxu1 }
 0x4a0   : > { %v5851_v20 = vadd.f32 %v9096_v46, %v5734_v48 }
 0x4a1   : > { %v5834_v59 = vpop.f32.mrf.mxu1 }
 0x4a2   : > { %v5849_v23 = vadd.f32 %v5834_v59, %v5732_v62 }
 0x4a3   : > { %v9097_v8 = vpop.f32.mrf.mxu1 }
 0x4a4   : > { %v5852_v38 = vadd.f32 %v9097_v8, %v5735_v1 }
 0x4a5   : > { %v5837_v37 = vpop.f32.mrf.mxu1 }
 0x4a6   : > { %v5850_v48 = vadd.f32 %v5837_v37, %v5733_v50  ;;  %v8177_v50 = vld [vmem:[%s12173_s4] ss:$0 sm:$0xff] }
 0x4a7   : > { %v9102_v18 = vpop.f32.mrf.mxu1 }
 0x4a8   : > { %v5907_v5 = vadd.f32 %v9102_v18, %v5790_v31 }
 0x4a9   : > { %v5890_v11 = vpop.f32.mrf.mxu1 }
 0x4aa   : > { %v11923_v43 = vadd.f32 %v5890_v11, %v5788_v36 }
 0x4ab   : > { %v9103_v13 = vpop.f32.mrf.mxu1 }
 0x4ac   : > { %v5908_v27 = vadd.f32 %v9103_v13, %v5791_v45 }
 0x4ad   : > { %v5893_v63 = vpop.f32.mrf.mxu1 }
 0x4ae   : > { %v5906_v57 = vadd.f32 %v5893_v63, %v5789_v56 }
 0x4af   : > { %v9108_v61 = vpop.f32.mrf.mxu1 }
 0x4b0   : > { %v5968_v14 = vadd.f32 %v9108_v61, %v5851_v20 }
 0x4b1   : > { %v5951_v41 = vpop.f32.mrf.mxu1 }
 0x4b2   : > { %v11929_v17 = vadd.f32 %v5951_v41, %v5849_v23 }
 0x4b3   : > { %v9109_v7 = vpop.f32.mrf.mxu1 }
 0x4b4   : > { %v5969_v55 = vadd.f32 %v9109_v7, %v5852_v38 }
 0x4b5   : > { %v5954_v28 = vpop.f32.mrf.mxu1 }
 0x4b6   : > { %v5967_v62 = vadd.f32 %v5954_v28, %v5850_v48 }
 0x4b7   : > { %v9114_v52 = vpop.f32.mrf.mxu1 }
 0x4b8   : > { %v11937_v33 = vadd.f32 %v9114_v52, %v5907_v5 }
 0x4b9   : > { %v11939_v40 = vpop.f32.mrf.mxu1 }
 0x4bb   : > { %v9115_v44 = vpop.f32.mrf.mxu1 }
 0x4bc   : > { %v6025_v0 = vadd.f32 %v9115_v44, %v5908_v27 }
 0x4bd   : > { %v6010_v51 = vpop.f32.mrf.mxu1 }
 0x4be   : > { %v6023_v49 = vadd.f32 %v6010_v51, %v5906_v57 }
 0x4bf   : > { %v9120_v9 = vpop.f32.mrf.mxu1 }
 0x4c0   : > { %v6085_v39 = vadd.f32 %v9120_v9, %v5968_v14 }
 0x4c1   : > { %v6068_v3 = vpop.f32.mrf.mxu1 }
 0x4c2   : > { %v6083_v19 = vadd.f32 %v6068_v3, %v11929_v17 }
 0x4c3   : > { %v9121_v54 = vpop.f32.mrf.mxu1 }
 0x4c4   : > { %v6086_v60 = vadd.f32 %v9121_v54, %v5969_v55 }
 0x4c5   : > { %v6071_v1 = vpop.f32.mrf.mxu1 }
 0x4c6   : > { %v6084_v16 = vadd.f32 %v6071_v1, %v5967_v62 }
 0x4c7   : > { %v9126_v21 = vpop.f32.mrf.mxu1 }
 0x4c8   : > { %v6144_v48 = vadd.f32 %v9126_v21, %v11937_v33 }
 0x4c9   : > { %v6127_v31 = vpop.f32.mrf.mxu1 }
 0x4cb   : > { %v9127_v25 = vpop.f32.mrf.mxu1 }
 0x4cc   : > { %v6145_v2 = vadd.f32 %v9127_v25, %v6025_v0 }
 0x4cd   : > { %v6130_v36 = vpop.f32.mrf.mxu1 }
 0x4ce   : > { %v6143_v47 = vadd.f32 %v6130_v36, %v6023_v49  ;;  %v6022_v49 = vadd.f32 %v11939_v40, %v11923_v43 }
 0x4cf   : > { %v9132_v45 = vpop.f32.mrf.mxu1 }
 0x4d0   : > { %v6205_v10 = vadd.f32 %v9132_v45, %v6085_v39  ;;  %v6142_v3 = vadd.f32 %v6127_v31, %v6022_v49 }
 0x4d1   : > { %v6188_v22 = vpop.f32.mrf.mxu1 }
 0x4d2   : > { %v6203_v56 = vadd.f32 %v6188_v22, %v6083_v19 }
 0x4d3   : > { %v9133_v15 = vpop.f32.mrf.mxu1 }
 0x4d4   : > { %v6206_v46 = vadd.f32 %v9133_v15, %v6086_v60 }
 0x4d5   : > { %v6191_v20 = vpop.f32.mrf.mxu1 }
 0x4d6   : > { %v6204_v58 = vadd.f32 %v6191_v20, %v6084_v16 }
 0x4d7   : > { %v9138_v34 = vpop.f32.mrf.mxu1 }
 0x4d8   : > { %v6261_v62 = vadd.f32 %v9138_v34, %v6144_v48 }
 0x4d9   : > { %v6244_v59 = vpop.f32.mrf.mxu1 }
 0x4da   : > { %v6259_v16 = vadd.f32 %v6244_v59, %v6142_v3  ;;  %v9524_v3 = vld [vmem:[%s12174_s5 + $0x50] sm:$0xff]  }
 0x4db   : > { %v9139_v23 = vpop.f32.mrf.mxu1 }
 0x4dc   : > { %v6262_v8 = vadd.f32 %v9139_v23, %v6145_v2 }
 0x4dd   : > { %v6247_v38 = vpop.f32.mrf.mxu1 }
 0x4de   : > { %v6260_v37 = vadd.f32 %v6247_v38, %v6143_v47 }
 0x4df   : > { %v9144_v18 = vpop.f32.mrf.mxu1 }
 0x4e0   : > { %v6322_v44 = vadd.f32 %v9144_v18, %v6205_v10  ;;  %v9517_v10 = vld [vmem:[%s12174_s5 + $0x18] sm:$0xff]  }
 0x4e1   : > { %v6305_v5 = vpop.f32.mrf.mxu1 }
 0x4e2   : > { %v6320_v0 = vadd.f32 %v6305_v5, %v6203_v56  ;;  %v9518_v56 = vld [vmem:[%s12174_s5 + $0x20] sm:$0xff]  }
 0x4e3   : > { %v9145_v11 = vpop.f32.mrf.mxu1 }
 0x4e4   : > { %v6323_v13 = vadd.f32 %v9145_v11, %v6206_v46 }
 0x4e5   : > { %v6308_v27 = vpop.f32.mrf.mxu1 }
 0x4e6   : > { %v6321_v63 = vadd.f32 %v6308_v27, %v6204_v58 }
 0x4e7   : > { %v9150_v12 = vpop.f32.mrf.mxu1 }
 0x4e8   : > { %v6378_v2 = vadd.f32 %v9150_v12, %v6261_v62  ;;  %v9525_v62 = vld [vmem:[%s12174_s5 + $0x58] sm:$0xff]  }
 0x4e9   : > { %v6361_v61 = vpop.f32.mrf.mxu1 }
 0x4ea   : > { %v6376_v43 = vadd.f32 %v6361_v61, %v6259_v16 }
 0x4eb   : > { %v9151_v4 = vpop.f32.mrf.mxu1 }
 0x4ec   : > { %v6379_v14 = vadd.f32 %v9151_v4, %v6262_v8 }
 0x4ed   : > { %v6364_v41 = vpop.f32.mrf.mxu1 }
 0x4ee   : > { %v6377_v6 = vadd.f32 %v6364_v41, %v6260_v37 }
 0x4ef   : > { %v9156_v7 = vpop.f32.mrf.mxu1 }
 0x4f0   : > { %v6439_v51 = vadd.f32 %v9156_v7, %v6322_v44 }
 0x4f1   : > { %v6422_v35 = vpop.f32.mrf.mxu1 }
 0x4f2   : > { %v6437_v17 = vadd.f32 %v6422_v35, %v6320_v0  ;;  %v9520_v0 = vld [vmem:[%s12174_s5 + $0x30] sm:$0xff]  }
 0x4f3   : > { %v9157_v32 = vpop.f32.mrf.mxu1 }
 0x4f4   : > { %v6440_v55 = vadd.f32 %v9157_v32, %v6323_v13 }
 0x4f5   : > { %v6425_v28 = vpop.f32.mrf.mxu1 }
 0x4f6   : > { %v6438_v30 = vadd.f32 %v6425_v28, %v6321_v63  ;;  %v9515_v28 = vld [vmem:[%s12174_s5 + $0x8] sm:$0xff]  }
 0x4f7   : > { %v9162_v53 = vpop.f32.mrf.mxu1 }
 0x4f8   : > { %v6495_v45 = vadd.f32 %v9162_v53, %v6378_v2 }
 0x4f9   : > { %v6478_v52 = vpop.f32.mrf.mxu1 }
 0x4fa   : > { %v6493_v21 = vadd.f32 %v6478_v52, %v6376_v43  ;;  %v9516_v52 = vld [vmem:[%s12174_s5 + $0x10] sm:$0xff]   ;;  %v9529_v43 = vld [vmem:[%s12174_s5 + $0x78] sm:$0xff]  }
 0x4fb   : > { %v9163_v29 = vpop.f32.mrf.mxu1 }
 0x4fc   : > { %v6496_v42 = vadd.f32 %v9163_v29, %v6379_v14 }
 0x4fd   : > { %v6481_v57 = vpop.f32.mrf.mxu1 }
 0x4fe   : > { %v6494_v24 = vadd.f32 %v6481_v57, %v6377_v6 }
 0x4ff   : > { %v9168_v9 = vpop.f32.mrf.mxu1 }
 0x500   : > { %v6556_v39 = vadd.f32 %v9168_v9, %v6439_v51  ;;  %v9522_v9 = vld [vmem:[%s12174_s5 + $0x40] sm:$0xff]  }
 0x501   : > { %v6539_v54 = vpop.f32.mrf.mxu1 }
 0x502   : > { %v6623_v60 = vadd.f32 %v8177_v50, %v6556_v39  ;;  %v6554_v1 = vadd.f32 %v6539_v54, %v6437_v17  ;;  %v9523_v17 = vld [vmem:[%s12174_s5 + $0x48] sm:$0xff]  }
 0x503   : > { %v9169_v25 = vpop.f32.mrf.mxu1 }
 0x504   : > { %v6621_v36 = vadd.f32 %v8177_v50, %v6554_v1  ;;  %v6557_v47 = vadd.f32 %v9169_v25, %v6440_v55  ;;  %10114 = vtanh.f32 %v6623_v60  ;;  %v9526_v1 = vld [vmem:[%s12174_s5 + $0x60] sm:$0xff]   ;;  %v9527_v25 = vld [vmem:[%s12174_s5 + $0x68] sm:$0xff]  }
 0x505   : > { %v6542_v40 = vpop.f32.mrf.mxu1 }
 0x506   : > { %10116 = vtanh.f32 %v6621_v36  ;;  %v6624_v22 = vadd.f32 %v8177_v50, %v6557_v47  ;;  %v6555_v15 = vadd.f32 %v6542_v40, %v6438_v30  ;;  %v9528_v36 = vld [vmem:[%s12174_s5 + $0x70] sm:$0xff]  }
 0x507   : > { %v9174_v33 = vpop.f32.mrf.mxu1 }
 0x508   : > { %v6622_v46 = vadd.f32 %v8177_v50, %v6555_v15  ;;  %v6612_v31 = vadd.f32 %v9174_v33, %v6495_v45  ;;  %10118 = vtanh.f32 %v6624_v22  ;;  %v9530_v22 = vld [vmem:[%s12176_s7 + $0x38] sm:$0xff]   ;;  %v9531_v15 = vld [vmem:[%s12176_s7 + $0x30] sm:$0xff]   ;;  %v9532_v33 = vld [vmem:[%s12176_s7 + $0x28] sm:$0xff]  }
 0x509   : > { %v6595_v20 = vpop.f32.mrf.mxu1 }
 0x50a   : > { %10120 = vtanh.f32 %v6622_v46  ;;  %v6610_v58 = vadd.f32 %v6595_v20, %v6493_v21  ;;  %v6631_v59 = vadd.f32 %v8177_v50, %v6612_v31  ;;  %v9533_v21 = vld [vmem:[%s12176_s7 + $0x20] sm:$0xff]   ;;  %v9534_v46 = vld [vmem:[%s12176_s7 + $0x18] sm:$0xff]   ;;  %v9535_v31 = vld [vmem:[%s12176_s7 + $0x10] sm:$0xff]  }
 0x50b   : > { %v9175_v34 = vpop.f32.mrf.mxu1 }
 0x50c   : > { %v6629_v23 = vadd.f32 %v8177_v50, %v6610_v58  ;;  %v6613_v8 = vadd.f32 %v9175_v34, %v6496_v42  ;;  %v9519_v42 = vld [vmem:[%s12174_s5 + $0x28] sm:$0xff]  }
 0x50d   : > { %v6598_v38 = vpop.f32.mrf.mxu1  ;;  %v9536_v34 = vld [vmem:[%s12176_s7 + $0x8] sm:$0xff]  }
 0x50e   : > { %10122 = vtanh.f32 %v6629_v23  ;;  %v6632_v37 = vadd.f32 %v8177_v50, %v6613_v8  ;;  %v6611_v18 = vadd.f32 %v6598_v38, %v6494_v24  ;;  %v9521_v24 = vld [vmem:[%s12174_s5 + $0x38] sm:$0xff]  }
 0x50f   : > { %10124 = vtanh.f32 %v6631_v59  ;;  %v6645_v59 = vld [vmem:[%s12175_s6] sm:$0x1] }
 0x510   : > { %v6630_v5 = vadd.f32 %v8177_v50, %v6611_v18 }
 0x511   : > { %v10115_v11 = vpop.eup %10114 }
 0x512   : > { %10126 = vtanh.f32 %v6630_v5 }
 0x513   : > { %v10117_v13 = vpop.eup %10116  ;;  %10128 = vtanh.f32 %v6632_v37  ;;  %v9537_v37 = vld [vmem:[%s12176_s7] sm:$0xff]  }
 0x514   : > { %v6637_v27 = vadd.f32 %v10117_v13, %v10115_v11 }
 0x515   : > { %v10119_v63 = vpop.eup %10118 }
 0x517   : > { %v10121_v12 = vpop.eup %10120 }
 0x518   : > { %v6638_v61 = vadd.f32 %v10121_v12, %v10119_v63 }
 0x51b   : > { %v10123_v4 = vpop.eup %10122 }
 0x51c   : > { %v6639_v14 = vadd.f32 %v10123_v4, %v6637_v27  ;;  %v10125_v41 = vpop.eup %10124 }
 0x51e   : > { %v6641_v6 = vadd.f32 %v10125_v41, %v6639_v14 }
 0x51f   : > { %v10127_v7 = vpop.eup %10126 }
 0x520   : > { %v6640_v35 = vadd.f32 %v10127_v7, %v6638_v61  ;;  %v6643_v32 = vmul.f32 0.25, %v6641_v6  ;;  %v10129_v55 = vpop.eup %10128 }
 0x522   : > { %v6646_v30 = vpack.c.bf16 %v6643_v32, %v6643_v32  ;;  %v6642_v53 = vadd.f32 %v10129_v55, %v6640_v35 }
 0x524   : > { %9179 = vmatmul.mubr.msk.bf16.vlgmr.msra.gmra.mxu1 %vm3681_vm1, %v6646_v30  ;;  %v6701_v19 = vshrl.u32 %v6646_v30, 16  ;;  %v6756_v29 = vrot.slane %v6646_v30, 1  ;;  %v6862_v57 = vrot.slane %v6646_v30, 2  ;;  %v6968_v49 = vrot.slane %v6646_v30, 3 }
 0x525   : > { %9183 = vmatpush3.bf16.msra.mxu1 %v9515_v28  ;;  %9184 = vmatprep.mubr.msk.bf16.mxu1 %vm10150_vm2, %v10149_v26  ;;  %v6644_v48 = vmul.f32 0.25, %v6642_v53 }
 0x526   : > { %9188 = vmatprep.subr.bf16.mxu1 %v10149_v26  ;;  %v6809_v44 = vrot.slane %v6701_v19, 1  ;;  %v6915_v51 = vrot.slane %v6701_v19, 2  ;;  %v7021_v50 = vrot.slane %v6701_v19, 3 }
 0x527   : > { %v7072_v39 = vpack.c.bf16 %v6644_v48, %v6644_v48 }
 0x529   : > { %v7127_v54 = vshrl.u32 %v7072_v39, 16  ;;  %v7182_v60 = vrot.slane %v7072_v39, 1  ;;  %v7288_v2 = vrot.slane %v7072_v39, 2  ;;  %v7394_v40 = vrot.slane %v7072_v39, 3 }
 0x52b   : > { %v7235_v16 = vrot.slane %v7127_v54, 1  ;;  %v7341_v47 = vrot.slane %v7127_v54, 2  ;;  %v7447_v45 = vrot.slane %v7127_v54, 3 }
 0x52c   : > { %9185 = vmatmul.mubr.msk.bf16.vlgmr.msra.gmra.mxu1 %vm3681_vm1, %v6701_v19 }
 0x52d   : > { %9189 = vmatpush3.bf16.msra.mxu1 %v9516_v52  ;;  %9190 = vmatprep.mubr.msk.bf16.mxu1 %vm10150_vm2, %v10149_v26 }
 0x52e   : > { %9194 = vmatprep.subr.bf16.mxu1 %v10149_v26 }
 0x534   : > { %9191 = vmatmul.mubr.msk.bf16.vlgmr.msra.gmra.mxu1 %vm3681_vm1, %v6756_v29 }
 0x535   : > { %9195 = vmatpush3.bf16.msra.mxu1 %v9517_v10  ;;  %9196 = vmatprep.mubr.msk.bf16.mxu1 %vm10150_vm2, %v10149_v26 }
 0x536   : > { %9200 = vmatprep.subr.bf16.mxu1 %v10149_v26 }
 0x53c   : > { %9197 = vmatmul.mubr.msk.bf16.vlgmr.msra.gmra.mxu1 %vm3681_vm1, %v6809_v44 }
 0x53d   : > { %9201 = vmatpush3.bf16.msra.mxu1 %v9518_v56  ;;  %9202 = vmatprep.mubr.msk.bf16.mxu1 %vm10150_vm2, %v10149_v26 }
 0x53e   : > { %9206 = vmatprep.subr.bf16.mxu1 %v10149_v26 }
 0x544   : > { %9203 = vmatmul.mubr.msk.bf16.vlgmr.msra.gmra.mxu1 %vm3681_vm1, %v6862_v57 }
 0x545   : > { %9207 = vmatpush3.bf16.msra.mxu1 %v9519_v42  ;;  %9208 = vmatprep.mubr.msk.bf16.mxu1 %vm10150_vm2, %v10149_v26 }
 0x546   : > { %9212 = vmatprep.subr.bf16.mxu1 %v10149_v26 }
 0x54c   : > { %9209 = vmatmul.mubr.msk.bf16.vlgmr.msra.gmra.mxu1 %vm3681_vm1, %v6915_v51 }
 0x54d   : > { %9213 = vmatpush3.bf16.msra.mxu1 %v9520_v0  ;;  %9214 = vmatprep.mubr.msk.bf16.mxu1 %vm10150_vm2, %v10149_v26 }
 0x54e   : > { %9218 = vmatprep.subr.bf16.mxu1 %v10149_v26 }
 0x554   : > { %9215 = vmatmul.mubr.msk.bf16.vlgmr.msra.gmra.mxu1 %vm3681_vm1, %v6968_v49 }
 0x555   : > { %9219 = vmatpush3.bf16.msra.mxu1 %v9521_v24  ;;  %9220 = vmatprep.mubr.msk.bf16.mxu1 %vm10150_vm2, %v10149_v26 }
 0x556   : > { %9224 = vmatprep.subr.bf16.mxu1 %v10149_v26 }
 0x55c   : > { %9221 = vmatmul.mubr.msk.bf16.vlgmr.msra.gmra.mxu1 %vm3681_vm1, %v7021_v50 }
 0x55d   : > { %9225 = vmatpush3.bf16.msra.mxu1 %v9522_v9  ;;  %9226 = vmatprep.mubr.msk.bf16.mxu1 %vm10150_vm2, %v10149_v26 }
 0x55e   : > { %9230 = vmatprep.subr.bf16.mxu1 %v10149_v26 }
 0x564   : > { %9227 = vmatmul.mubr.msk.bf16.vlgmr.msra.gmra.mxu1 %vm3681_vm1, %v7072_v39 }
 0x565   : > { %9231 = vmatpush3.bf16.msra.mxu1 %v9523_v17  ;;  %9232 = vmatprep.mubr.msk.bf16.mxu1 %vm10150_vm2, %v10149_v26 }
 0x566   : > { %9236 = vmatprep.subr.bf16.mxu1 %v10149_v26 }
 0x56c   : > { %9233 = vmatmul.mubr.msk.bf16.vlgmr.msra.gmra.mxu1 %vm3681_vm1, %v7127_v54 }
 0x56d   : > { %9237 = vmatpush3.bf16.msra.mxu1 %v9524_v3  ;;  %9238 = vmatprep.mubr.msk.bf16.mxu1 %vm10150_vm2, %v10149_v26 }
 0x56e   : > { %9242 = vmatprep.subr.bf16.mxu1 %v10149_v26 }
 0x574   : > { %9239 = vmatmul.mubr.msk.bf16.vlgmr.msra.gmra.mxu1 %vm3681_vm1, %v7182_v60 }
 0x575   : > { %9243 = vmatpush3.bf16.msra.mxu1 %v9525_v62  ;;  %9244 = vmatprep.mubr.msk.bf16.mxu1 %vm10150_vm2, %v10149_v26 }
 0x576   : > { %9248 = vmatprep.subr.bf16.mxu1 %v10149_v26 }
 0x57c   : > { %9245 = vmatmul.mubr.msk.bf16.vlgmr.msra.gmra.mxu1 %vm3681_vm1, %v7235_v16 }
 0x57d   : > { %9249 = vmatpush3.bf16.msra.mxu1 %v9526_v1  ;;  %9250 = vmatprep.mubr.msk.bf16.mxu1 %vm10150_vm2, %v10149_v26 }
 0x57e   : > { %9254 = vmatprep.subr.bf16.mxu1 %v10149_v26 }
 0x584   : > { %9251 = vmatmul.mubr.msk.bf16.vlgmr.msra.gmra.mxu1 %vm3681_vm1, %v7288_v2 }
 0x585   : > { %9255 = vmatpush3.bf16.msra.mxu1 %v9527_v25  ;;  %9256 = vmatprep.mubr.msk.bf16.mxu1 %vm10150_vm2, %v10149_v26 }
 0x586   : > { %9260 = vmatprep.subr.bf16.mxu1 %v10149_v26 }
 0x58c   : > { %9257 = vmatmul.mubr.msk.bf16.vlgmr.msra.gmra.mxu1 %vm3681_vm1, %v7341_v47 }
 0x58d   : > { %9261 = vmatpush3.bf16.msra.mxu1 %v9528_v36  ;;  %9262 = vmatprep.mubr.msk.bf16.mxu1 %vm10150_vm2, %v10149_v26 }
 0x58e   : > { %9266 = vmatprep.subr.bf16.mxu1 %v10149_v26 }
 0x594   : > { %9263 = vmatmul.mubr.msk.bf16.vlgmr.msra.gmra.mxu1 %vm3681_vm1, %v7394_v40 }
 0x595   : > { %9267 = vmatpush3.bf16.msra.mxu1 %v9529_v43  ;;  %9268 = vmatprep.mubr.msk.bf16.mxu1 %vm10150_vm2, %v10149_v26 }
 0x596   : > { %9272 = vmatprep.subr.bf16.mxu1 %v10149_v26 }
 0x59c   : > { %9269 = vmatmul.mubr.msk.bf16.vlgmr.msra.gmra.mxu1 %vm3681_vm1, %v7447_v45 }
 0x59d   : > { %9288 = vmatprep.mubr.msk.bf16.mxu1 %vm10150_vm2, %v10149_v26  ;;  %9273 = vmatpush3.bf16.msra.mxu1 %v9530_v22 }
 0x59e   : > { %9274 = vmatprep.subr.bf16.mxu1 %v10149_v26 }
 0x5a1   : > { %9275 = vmatpush3.bf16.msra.mxu1 %v9531_v15 }
 0x5a2   : > { %9276 = vmatprep.subr.bf16.mxu1 %v10149_v26 }
 0x5a5   : > { %9277 = vmatpush3.bf16.msra.mxu1 %v9532_v33 }
 0x5a6   : > { %9278 = vmatprep.subr.bf16.mxu1 %v10149_v26 }
 0x5a9   : > { %9279 = vmatpush3.bf16.msra.mxu1 %v9533_v21 }
 0x5aa   : > { %9280 = vmatprep.subr.bf16.mxu1 %v10149_v26 }
 0x5ad   : > { %9281 = vmatpush3.bf16.msra.mxu1 %v9534_v46 }
 0x5ae   : > { %9282 = vmatprep.subr.bf16.mxu1 %v10149_v26 }
 0x5b1   : > { %9283 = vmatpush3.bf16.msra.mxu1 %v9535_v31 }
 0x5b2   : > { %9284 = vmatprep.subr.bf16.mxu1 %v10149_v26 }
 0x5b5   : > { %9285 = vmatpush3.bf16.msra.mxu1 %v9536_v34 }
 0x5b6   : > { %9286 = vmatprep.subr.bf16.mxu1 %v10149_v26 }
 0x5b9   : > { %9287 = vmatpush3.bf16.msra.mxu1 %v9537_v37 }
 0x5ba   : > { %9292 = vmatprep.subr.mxu1 %v10149_v26 }
 0x5e4   : > { %v6692_v20 = vpop.f32.mrf.mxu1 }
 0x5e5   : > { %v6698_v38 = vadd.f32 %v6692_v20, %v6645_v59 }
 0x5e6   : > { %v9180_v58 = vpop.f32.mrf.mxu1 }
 0x5e8   : > { %v6695_v23 = vpop.f32.mrf.mxu1 }
 0x5ea   : > { %v9181_v8 = vpop.f32.mrf.mxu1 }
 0x5ec   : > { %v6746_v18 = vpop.f32.mrf.mxu1 }
 0x5ed   : > { %v6752_v5 = vadd.f32 %v6746_v18, %v6698_v38 }
 0x5ee   : > { %v9186_v11 = vpop.f32.mrf.mxu1 }
 0x5f0   : > { %v6749_v13 = vpop.f32.mrf.mxu1 }
 0x5f2   : > { %v9187_v27 = vpop.f32.mrf.mxu1 }
 0x5f4   : > { %v6800_v63 = vpop.f32.mrf.mxu1 }
 0x5f5   : > { %v6806_v12 = vadd.f32 %v6800_v63, %v6752_v5 }
 0x5f6   : > { %v9192_v61 = vpop.f32.mrf.mxu1 }
 0x5f8   : > { %v6803_v4 = vpop.f32.mrf.mxu1 }
 0x5fa   : > { %v9193_v14 = vpop.f32.mrf.mxu1 }
 0x5fc   : > { %v6853_v41 = vpop.f32.mrf.mxu1 }
 0x5fd   : > { %v6859_v6 = vadd.f32 %v6853_v41, %v6806_v12 }
 0x5fe   : > { %v9198_v7 = vpop.f32.mrf.mxu1 }
 0x600   : > { %v6856_v35 = vpop.f32.mrf.mxu1 }
 0x602   : > { %v9199_v32 = vpop.f32.mrf.mxu1 }
 0x603   : > { %v7621_v32 = vld [vmem:[%s12178_s9 + $0x78] sm:$0xff] }
 0x604   : > { %v6906_v55 = vpop.f32.mrf.mxu1 }
 0x605   : > { %v6912_v28 = vadd.f32 %v6906_v55, %v6859_v6  ;;  %v7620_v55 = vld [vmem:[%s12178_s9 + $0x70] sm:$0xff] }
 0x606   : > { %v9204_v30 = vpop.f32.mrf.mxu1 }
 0x607   : > { %v7618_v30 = vld [vmem:[%s12178_s9 + $0x60] sm:$0xff] }
 0x608   : > { %v6909_v53 = vpop.f32.mrf.mxu1 }
 0x609   : > { %v7617_v53 = vld [vmem:[%s12178_s9 + $0x58] sm:$0xff] }
 0x60a   : > { %v9205_v52 = vpop.f32.mrf.mxu1 }
 0x60b   : > { %v7616_v52 = vld [vmem:[%s12178_s9 + $0x50] sm:$0xff] }
 0x60c   : > { %v6959_v19 = vpop.f32.mrf.mxu1 }
 0x60d   : > { %v6965_v33 = vadd.f32 %v6959_v19, %v6912_v28  ;;  %v7619_v28 = vld [vmem:[%s12178_s9 + $0x68] sm:$0xff] }
 0x60e   : > { %v9210_v10 = vpop.f32.mrf.mxu1  ;;  %v7615_v19 = vld [vmem:[%s12178_s9 + $0x48] sm:$0xff] }
 0x60f   : > { %v7614_v10 = vld [vmem:[%s12178_s9 + $0x40] sm:$0xff] }
 0x610   : > { %v6962_v29 = vpop.f32.mrf.mxu1 }
 0x611   : > { %v7613_v29 = vld [vmem:[%s12178_s9 + $0x38] sm:$0xff] }
 0x612   : > { %v9211_v56 = vpop.f32.mrf.mxu1 }
 0x613   : > { %v7612_v56 = vld [vmem:[%s12178_s9 + $0x30] sm:$0xff] }
 0x614   : > { %v7012_v44 = vpop.f32.mrf.mxu1 }
 0x615   : > { %v7018_v46 = vadd.f32 %v7012_v44, %v6965_v33  ;;  %v7611_v44 = vld [vmem:[%s12178_s9 + $0x28] sm:$0xff] }
 0x616   : > { %v9216_v42 = vpop.f32.mrf.mxu1 }
 0x617   : > { %v7610_v42 = vld [vmem:[%s12178_s9 + $0x20] sm:$0xff] }
 0x618   : > { %v7015_v57 = vpop.f32.mrf.mxu1 }
 0x619   : > { %v7609_v57 = vld [vmem:[%s12178_s9 + $0x18] sm:$0xff] }
 0x61a   : > { %v9217_v0 = vpop.f32.mrf.mxu1 }
 0x61b   : > { %v7608_v0 = vld [vmem:[%s12178_s9 + $0x10] sm:$0xff] }
 0x61c   : > { %v7065_v51 = vpop.f32.mrf.mxu1 }
 0x61d   : > { %v7071_v20 = vadd.f32 %v7065_v51, %v7018_v46  ;;  %v7607_v51 = vld [vmem:[%s12178_s9 + $0x8] sm:$0xff] }
 0x61e   : > { %v9222_v24 = vpop.f32.mrf.mxu1 }
 0x61f   : > { %v7606_v24 = vld [vmem:[%s12178_s9] sm:$0xff] }
 0x620   : > { %v7068_v49 = vpop.f32.mrf.mxu1 }
 0x621   : > { %v7516_v49 = vld [vmem:[%s12177_s8] sm:$0x1] }
 0x622   : > { %v9223_v9 = vpop.f32.mrf.mxu1 }
 0x624   : > { %v7118_v50 = vpop.f32.mrf.mxu1 }
 0x625   : > { %v7124_v34 = vadd.f32 %v7118_v50, %v7071_v20 }
 0x626   : > { %v9228_v48 = vpop.f32.mrf.mxu1 }
 0x628   : > { %v7121_v17 = vpop.f32.mrf.mxu1 }
 0x62a   : > { %v9229_v39 = vpop.f32.mrf.mxu1 }
 0x62c   : > { %v7172_v3 = vpop.f32.mrf.mxu1 }
 0x62d   : > { %v7178_v23 = vadd.f32 %v7172_v3, %v7124_v34 }
 0x62e   : > { %v9234_v54 = vpop.f32.mrf.mxu1 }
 0x62f   : > { %v10151_v54 = vmov 0  }
 0x630   : > { %v7175_v62 = vpop.f32.mrf.mxu1  ;;  %9339 = vset.pattern.permute.xlu0 %v10151_v54 }
 0x631   : > { %v7622_v62 = vld [vmem:[#allocation2] sm:$0x1] }
 0x632   : > { %v9235_v60 = vpop.f32.mrf.mxu1 }
 0x634   : > { %v7226_v1 = vpop.f32.mrf.mxu1 }
 0x635   : > { %v7232_v38 = vadd.f32 %v7226_v1, %v7178_v23 }
 0x636   : > { %v9240_v16 = vpop.f32.mrf.mxu1 }
 0x638   : > { %v7229_v25 = vpop.f32.mrf.mxu1 }
 0x63a   : > { %v9241_v2 = vpop.f32.mrf.mxu1 }
 0x63c   : > { %v7279_v36 = vpop.f32.mrf.mxu1 }
 0x63d   : > { %v7285_v18 = vadd.f32 %v7279_v36, %v7232_v38 }
 0x63e   : > { %v9246_v47 = vpop.f32.mrf.mxu1 }
 0x640   : > { %v7282_v43 = vpop.f32.mrf.mxu1 }
 0x642   : > { %v9247_v40 = vpop.f32.mrf.mxu1 }
 0x644   : > { %v7332_v45 = vpop.f32.mrf.mxu1 }
 0x645   : > { %v7338_v11 = vadd.f32 %v7332_v45, %v7285_v18 }
 0x646   : > { %v9252_v22 = vpop.f32.mrf.mxu1 }
 0x648   : > { %v7335_v15 = vpop.f32.mrf.mxu1 }
 0x64a   : > { %v9253_v21 = vpop.f32.mrf.mxu1 }
 0x64c   : > { %v7385_v31 = vpop.f32.mrf.mxu1 }
 0x64d   : > { %v7391_v27 = vadd.f32 %v7385_v31, %v7338_v11 }
 0x64e   : > { %v9258_v58 = vpop.f32.mrf.mxu1 }
 0x650   : > { %v7388_v59 = vpop.f32.mrf.mxu1 }
 0x652   : > { %v9259_v8 = vpop.f32.mrf.mxu1 }
 0x654   : > { %v7438_v37 = vpop.f32.mrf.mxu1 }
 0x655   : > { %v7444_v12 = vadd.f32 %v7438_v37, %v7391_v27 }
 0x656   : > { %v9264_v5 = vpop.f32.mrf.mxu1 }
 0x658   : > { %v7441_v13 = vpop.f32.mrf.mxu1 }
 0x65a   : > { %v9265_v63 = vpop.f32.mrf.mxu1 }
 0x65c   : > { %v7491_v61 = vpop.f32.mrf.mxu1 }
 0x65d   : > { %v7497_v4 = vadd.f32 %v7491_v61, %v7444_v12 }
 0x65e   : > { %v9270_v14 = vpop.f32.mrf.mxu1 }
 0x65f   : > { %10130 = vtanh.f32 %v7497_v4 }
 0x660   : > { %v7494_v41 = vpop.f32.mrf.mxu1 }
 0x662   : > { %v9271_v6 = vpop.f32.mrf.mxu1 }
 0x66c   : > { %v10131_v7 = vpop.eup %10130 }
 0x66d   : > { %v7499_v35 = vpack.c.bf16 %v10131_v7, %v10131_v7 }
 0x66f   : > { %9289 = vmatmul.mubr.bf16.vlgmr.msra.gmra.mxu1 %v7499_v35 }
 0x670   : > { %9293 = vmatpush3.msra.mxu1 %v7621_v32  ;;  %9324 = vmatprep.mubr.msk.f32.mxu1 %vm10150_vm2, %v10149_v26 }
 0x671   : > { %9294 = vmatprep.subr.mxu1 %v10149_v26 }
 0x672   : > { %9295 = vmatpush3.msra.mxu1 %v7620_v55 }
 0x673   : > { %9296 = vmatprep.subr.mxu1 %v10149_v26 }
 0x674   : > { %9297 = vmatpush3.msra.mxu1 %v7619_v28 }
 0x675   : > { %9298 = vmatprep.subr.mxu1 %v10149_v26 }
 0x676   : > { %9299 = vmatpush3.msra.mxu1 %v7618_v30 }
 0x677   : > { %9300 = vmatprep.subr.mxu1 %v10149_v26 }
 0x678   : > { %9301 = vmatpush3.msra.mxu1 %v7617_v53 }
 0x679   : > { %9302 = vmatprep.subr.mxu1 %v10149_v26 }
 0x67a   : > { %9303 = vmatpush3.msra.mxu1 %v7616_v52 }
 0x67b   : > { %9304 = vmatprep.subr.mxu1 %v10149_v26 }
 0x67c   : > { %9305 = vmatpush3.msra.mxu1 %v7615_v19 }
 0x67d   : > { %9306 = vmatprep.subr.mxu1 %v10149_v26 }
 0x67e   : > { %9307 = vmatpush3.msra.mxu1 %v7614_v10 }
 0x67f   : > { %9308 = vmatprep.subr.mxu1 %v10149_v26 }
 0x680   : > { %9309 = vmatpush3.msra.mxu1 %v7613_v29 }
 0x681   : > { %9310 = vmatprep.subr.mxu1 %v10149_v26 }
 0x682   : > { %9311 = vmatpush3.msra.mxu1 %v7612_v56 }
 0x683   : > { %9312 = vmatprep.subr.mxu1 %v10149_v26 }
 0x684   : > { %9313 = vmatpush3.msra.mxu1 %v7611_v44 }
 0x685   : > { %9314 = vmatprep.subr.mxu1 %v10149_v26 }
 0x686   : > { %9315 = vmatpush3.msra.mxu1 %v7610_v42 }
 0x687   : > { %9316 = vmatprep.subr.mxu1 %v10149_v26 }
 0x688   : > { %9317 = vmatpush3.msra.mxu1 %v7609_v57 }
 0x689   : > { %9318 = vmatprep.subr.mxu1 %v10149_v26 }
 0x68a   : > { %9319 = vmatpush3.msra.mxu1 %v7608_v0 }
 0x68b   : > { %9320 = vmatprep.subr.mxu1 %v10149_v26 }
 0x68c   : > { %9321 = vmatpush3.msra.mxu1 %v7607_v51 }
 0x68d   : > { %9322 = vmatprep.subr.mxu1 %v10149_v26 }
 0x68e   : > { %9323 = vmatpush3.msra.mxu1 %v7606_v24 }
 0x72f   : > { %v7599_v9 = vpop.f32.mrf.mxu1 }
 0x730   : > { %v7600_v50 = vadd.f32 %v7599_v9, %v7516_v49 }
 0x731   : > { %v9290_v48 = vpop.f32.mrf.mxu1 }
 0x732   : > { %10132 = vtanh.f32 %v7600_v50 }
 0x733   : > { %v7602_v17 = vpop.f32.mrf.mxu1 }
 0x735   : > { %v9291_v39 = vpop.f32.mrf.mxu1 }
 0x73f   : > { %v10133_v3 = vpop.eup %10132 }
 0x740   : > { %9325 = vmatmul.mubr.f32.vlgmr.msra.gmra.mxu1 %v10133_v3 }
 0x800   : > { %v7689_v60 = vpop.f32.mrf.mxu1 }
 0x801   : > { %v7690_v1 = vadd.f32 %v7689_v60, %v7622_v62 }
 0x802   : > { %v9326_v26 = vpop.f32.mrf.mxu1 }
 0x803   : > { %v8218_v16 = vmul.f32 -1.442695, %v7690_v1 }
 0x805   : > { %10134 = vpow2.f32 %v8218_v16 }
 0x812   : > { %v10135_v25 = vpop.eup %10134 }
 0x813   : > { %v7696_v2 = vadd.f32 1.0, %v10135_v25 }
 0x815   : > { %10136 = vrcp.f32 %v7696_v2 }
 0x822   : > { %v10137_v36 = vpop.eup %10136 }
 0x823   : > { %7701 = vperm.xlu0 %9339, %v10137_v36  }
 0x89e   : > { %v7702_v47 = vpop.permute.xlu0 %7701 }
 0x89f   : > { %7704 = vst [vmem:[%s384_s17] sm:$0x1] %v7702_v47 }
 0x8a0 PF: > { %s23_s19 = sadd.s32 1, %s10147_s19  }
 0x8a1   : > { %p20_p4 = scmp.ge.s32.totalorder %s23_s19, 4  }
 0x8a3   :  { %22 = sbr.rel (!%p20_p4) target bundleno = 3 (0x3), region = 94 }

</bundles_post_ra>
